<compile_context>
chip_gen: v5e
topology: v5e:2x2
jax: 0.10.0
libtpu: 0.0.40
codegen_flags: <defaults>
</compile_context>

<pallas_src>
import jax
import jax.numpy as jnp
import numpy as np
from jax import lax
from jax.experimental import pallas as pl
from jax.experimental.pallas import tpu as pltpu


def _gru_cell(x, h, w_ih, w_hh, b_ih, b_hh, H):
    """PyTorch-semantics GRUCell (reference only). Weights (in,3H)/(H,3H), gate order r|z|n."""
    gi = jnp.dot(x, w_ih, preferred_element_type=jnp.float32) + b_ih
    gh = jnp.dot(h, w_hh, preferred_element_type=jnp.float32) + b_hh
    r = jax.nn.sigmoid(gi[:, 0:H] + gh[:, 0:H])
    z = jax.nn.sigmoid(gi[:, H:2 * H] + gh[:, H:2 * H])
    n = jnp.tanh(gi[:, 2 * H:3 * H] + r * gh[:, 2 * H:3 * H])
    return (1.0 - z) * n + z * h


def reverse_video_decoder_kernel(
        ctx_ref,      # (B, S, C)  encoder context, batch-major
        y_ref,        # (T, B, V)  ground-truth video features
        w_c2c_ref,    # (C, M)     attention ctx2ctx
        w_ih1_ref,    # (C, 3H)    dec1 input weights (applied to ctx, precomputed)
        w0f_ref,      # (2H, 4H)   fused dec0 weights  [e|h] -> [rz | gi_n | gh_n]
        b0f_ref,      # (1, 4H)
        w1f_ref,      # (H, M+3H)  fused [att hid2ctx | dec1 w_hh]
        b1f_ref,      # (1, M+3H)  [0 | b_hh1]
        b_ih1_ref,    # (1, 3H)
        w_mlp_ref,    # (1, M)     attention MLP vector (mlp_bias=False)
        w2f_ref,      # (H, H+V)   fused [w_out @ w_emb | w_out]
        b2f_ref,      # (1, H+V)   [b_out @ w_emb + b_emb | b_out]
        e0_ref,       # (1, H)     emb(zeros) = tanh(b_emb)
        loss_ref,     # (1, 1)
):
    B, S, C = ctx_ref.shape
    T, _, V = y_ref.shape
    H = e0_ref.shape[1]
    M = w_mlp_ref.shape[1]
    G = 3 * H

    # ---- one-time precomputes (outside the recurrence) ----
    ctx2 = ctx_ref[...].reshape(B * S, C)
    ctx_p = jnp.dot(ctx2, w_c2c_ref[...],
                    preferred_element_type=jnp.float32).reshape(B, S, M)
    ctx_ih1 = jnp.dot(ctx2, w_ih1_ref[...],
                      preferred_element_type=jnp.float32).reshape(B, S, G)

    w0f = w0f_ref[...]
    w1f = w1f_ref[...]
    w2f = w2f_ref[...]
    w_mlp = w_mlp_ref[...]                                        # (1, M)
    # hoisted bias broadcasts (JAX does not CSE broadcast_in_dim inside the loop)
    b0f = jnp.broadcast_to(b0f_ref[...], (B, 4 * H))
    b1f = jnp.broadcast_to(b1f_ref[...], (B, M + G))
    b2f = jnp.broadcast_to(b2f_ref[...], (B, H + V))
    b_ih1 = jnp.broadcast_to(b_ih1_ref[...], (B, G))

    def step(t, carry):
        e, h, sse = carry
        # ---- dec0 (GRUCell) as one fused matmul ----
        xh = jnp.concatenate([e, h], axis=1)                      # (B, 2H)
        g0 = jnp.dot(xh, w0f, preferred_element_type=jnp.float32) + b0f   # (B, 4H)
        r0 = jax.nn.sigmoid(g0[:, 0:H])
        z0 = jax.nn.sigmoid(g0[:, H:2 * H])
        n0 = jnp.tanh(g0[:, 2 * H:3 * H] + r0 * g0[:, 3 * H:4 * H])
        h1 = (1.0 - z0) * n0 + z0 * h                             # (B, H)

        # ---- fused: attention hid2ctx projection + dec1 recurrent gates ----
        g1 = jnp.dot(h1, w1f, preferred_element_type=jnp.float32) + b1f   # (B, M+3H)
        hid_p = g1[:, 0:M]                                        # (B, M)
        gh1 = g1[:, M:M + G]                                      # (B, 3H) = h1@w_hh1 + b_hh1

        # ---- MLP attention (softmax over S; ctx_mask=None, temp=1.0), VPU/XLU only ----
        act = jnp.tanh(ctx_p + hid_p[:, None, :])                 # (B, S, M)
        scores = jnp.sum(act * w_mlp, axis=-1)                    # (B, S)
        scores = scores - jnp.max(scores, axis=-1, keepdims=True)
        e_sc = jnp.exp(scores)
        alpha = e_sc / jnp.sum(e_sc, axis=-1, keepdims=True)      # (B, S)

        # gi1 = (sum_s alpha*ctx) @ w_ih1 + b_ih1, with ctx@w_ih1 hoisted out of the loop
        gi1 = jnp.sum(alpha[:, :, None] * ctx_ih1, axis=1) + b_ih1  # (B, 3H)

        # ---- dec1 (GRUCell) gates ----
        r1 = jax.nn.sigmoid(gi1[:, 0:H] + gh1[:, 0:H])
        z1 = jax.nn.sigmoid(gi1[:, H:2 * H] + gh1[:, H:2 * H])
        n1 = jnp.tanh(gi1[:, 2 * H:3 * H] + r1 * gh1[:, 2 * H:3 * H])
        h2 = (1.0 - z1) * n1 + z1 * h1                            # (B, H)

        # ---- fused hid2out + next-step emb: h2 @ [w_out@w_emb | w_out] ----
        g2 = jnp.dot(h2, w2f, preferred_element_type=jnp.float32) + b2f   # (B, H+V)
        e_next = jnp.tanh(g2[:, 0:H])                             # emb(pred) for step t+1
        pred = g2[:, H:H + V]                                     # hid2out(h2)

        # MSELoss(size_average=False): accumulate squared error, reduce once after loop
        diff = pred - y_ref[t]
        return (e_next, h2, sse + diff * diff)

    e0 = jnp.broadcast_to(e0_ref[...], (B, H))   # emb(zeros) — predicted_v starts at 0
    h0 = jnp.zeros((B, H), jnp.float32)          # dec_init='zero', GRU -> 1 state
    sse0 = jnp.zeros((B, V), jnp.float32)
    _, _, sse = lax.fori_loop(0, T, step, (e0, h0, sse0), unroll=True)
    loss_ref[...] = jnp.sum(sse, keepdims=True)
    # TODO(synk): LSTM variant / dec_init in ('mean_ctx','feats') / dropout_out>0 not
    # exercised by the defaults used here; only the GRU + zero-init path is implemented.


def reverse_video_decoder_loss(ctx, y, params):
    (w_emb, b_emb, w_ih0, w_hh0, b_ih0, b_hh0, w_c2c, w_h2c, w_mlp,
     w_ih1, w_hh1, b_ih1, b_hh1, w_out, b_out) = params
    S, B, C = ctx.shape
    T, _, V = y.shape
    H = w_hh0.shape[0]
    M = w_c2c.shape[1]
    f32 = jnp.float32

    # ---- one-time parameter packing (hoisted out of the kernel's time loop) ----
    # dec0 fused weight: [e|h] @ W0f -> [ (gi+gh)_rz | gi_n | gh_n ]
    w0f = jnp.concatenate([
        jnp.concatenate([w_ih0[:, :2 * H], w_ih0[:, 2 * H:], jnp.zeros((H, H), f32)], axis=1),
        jnp.concatenate([w_hh0[:, :2 * H], jnp.zeros((H, H), f32), w_hh0[:, 2 * H:]], axis=1),
    ], axis=0)                                                            # (2H, 4H)
    b0f = jnp.concatenate([b_ih0[:, :2 * H] + b_hh0[:, :2 * H],
                           b_ih0[:, 2 * H:], b_hh0[:, 2 * H:]], axis=1)   # (1, 4H)

    # fused [attention hid2ctx | dec1 recurrent weights]
    w1f = jnp.concatenate([w_h2c, w_hh1], axis=1)                         # (H, M+3H)
    b1f = jnp.concatenate([jnp.zeros((1, M), f32), b_hh1], axis=1)        # (1, M+3H)

    # fold hid2out into next-step emb: tanh(pred@w_emb+b_emb) = tanh(h2@(w_out@w_emb)+b_oe)
    w_oe = w_out @ w_emb                                                  # (H, H)
    b_oe = b_out @ w_emb + b_emb                                          # (1, H)
    w2f = jnp.concatenate([w_oe, w_out], axis=1)                          # (H, H+V)
    b2f = jnp.concatenate([b_oe, b_out], axis=1)                          # (1, H+V)

    w_mlp_row = w_mlp.reshape(1, M)                                       # (1, M)
    e0_row = jnp.tanh(b_emb)                                              # emb(zeros), exact

    ctx_bt = jnp.swapaxes(ctx, 0, 1)                                      # (B, S, C)

    inputs = (ctx_bt, y, w_c2c, w_ih1, w0f, b0f, w1f, b1f, b_ih1,
              w_mlp_row, w2f, b2f, e0_row)
    out = pl.pallas_call(
        reverse_video_decoder_kernel,
        out_shape=jax.ShapeDtypeStruct((1, 1), jnp.float32),
        in_specs=[pl.BlockSpec(memory_space=pltpu.MemorySpace.VMEM)] * len(inputs),
        out_specs=pl.BlockSpec(memory_space=pltpu.MemorySpace.VMEM),
    )(*inputs)
    return out[0, 0]


def reference_loss(ctx, y, params):
    """Pure-JAX reference mirroring the PyTorch forward (unfused)."""
    (w_emb, b_emb, w_ih0, w_hh0, b_ih0, b_hh0, w_c2c, w_h2c, w_mlp,
     w_ih1, w_hh1, b_ih1, b_hh1, w_out, b_out) = params
    S, B, C = ctx.shape
    T, _, V = y.shape
    H = w_hh0.shape[0]
    ctx_p = jnp.einsum('sbc,cm->sbm', ctx, w_c2c)
    pred = jnp.zeros((B, V), jnp.float32)
    h = jnp.zeros((B, H), jnp.float32)
    loss = 0.0
    for t in range(T):
        e = jnp.tanh(pred @ w_emb + b_emb)
        h1 = _gru_cell(e, h, w_ih0, w_hh0, b_ih0, b_hh0, H)
        act = jnp.tanh(ctx_p + (h1 @ w_h2c)[None, :, :])
        scores = jnp.einsum('sbm,mo->sbo', act, w_mlp)[..., 0]
        alpha = jax.nn.softmax(scores, axis=0)
        z_t = jnp.sum(alpha[:, :, None] * ctx, axis=0)
        h2 = _gru_cell(z_t, h1, w_ih1, w_hh1, b_ih1, b_hh1, H)
        pred = h2 @ w_out + b_out
        loss = loss + jnp.sum((pred - y[t]) ** 2)
        h = h2
    return loss


def init_params(key, H, C, V, M):
    ks = jax.random.split(key, 15)
    s = 0.1
    rn = lambda k, shape: jax.random.normal(k, shape, jnp.float32) * s
    w_emb = rn(ks[0], (V, H));     b_emb = rn(ks[1], (1, H))
    w_ih0 = rn(ks[2], (H, 3 * H)); w_hh0 = rn(ks[3], (H, 3 * H))
    b_ih0 = rn(ks[4], (1, 3 * H)); b_hh0 = rn(ks[5], (1, 3 * H))
    w_c2c = rn(ks[6], (C, M));     w_h2c = rn(ks[7], (H, M))
    w_mlp = rn(ks[8], (M, 1))
    w_ih1 = rn(ks[9], (C, 3 * H)); w_hh1 = rn(ks[10], (H, 3 * H))
    b_ih1 = rn(ks[11], (1, 3 * H)); b_hh1 = rn(ks[12], (1, 3 * H))
    w_out = rn(ks[13], (H, V));    b_out = rn(ks[14], (1, V))
    return (w_emb, b_emb, w_ih0, w_hh0, b_ih0, b_hh0, w_c2c, w_h2c, w_mlp,
            w_ih1, w_hh1, b_ih1, b_hh1, w_out, b_out)


if __name__ == "__main__":
    # Small shapes implied by the forward: ctx (S,B,C), y (T,B,V).
    S, T, B = 8, 8, 2
    H = 32                       # hidden_size
    C = H                        # ctx_size_dict[ctx_name] (must equal hidden for dec1)
    V = 16                       # video_dim
    M = C                        # att_bottleneck='ctx'

    key = jax.random.PRNGKey(0)
    k_ctx, k_y, k_p = jax.random.split(key, 3)
    ctx = jax.random.normal(k_ctx, (S, B, C), jnp.float32)
    y = jax.random.normal(k_y, (T, B, V), jnp.float32)
    params = init_params(k_p, H, C, V, M)

    loss = jax.block_until_ready(
        jax.jit(reverse_video_decoder_loss)(ctx, y, params))
    ref = jax.block_until_ready(reference_loss(ctx, y, params))

    np.testing.assert_allclose(np.asarray(loss), np.asarray(ref), rtol=1e-4, atol=1e-3)
    print("KERNEL_OK")
</pallas_src>

<mosaic_0001>
module attributes {stable_mosaic.version = 11 : i64} {
  func.func @reverse_video_decoder_kernel(%arg0: memref<2x8x32xf32, #tpu.memory_space<vmem>>, %arg1: memref<8x2x16xf32, #tpu.memory_space<vmem>>, %arg2: memref<32x32xf32, #tpu.memory_space<vmem>>, %arg3: memref<32x96xf32, #tpu.memory_space<vmem>>, %arg4: memref<64x128xf32, #tpu.memory_space<vmem>>, %arg5: memref<1x128xf32, #tpu.memory_space<vmem>>, %arg6: memref<32x128xf32, #tpu.memory_space<vmem>>, %arg7: memref<1x128xf32, #tpu.memory_space<vmem>>, %arg8: memref<1x96xf32, #tpu.memory_space<vmem>>, %arg9: memref<1x32xf32, #tpu.memory_space<vmem>>, %arg10: memref<32x48xf32, #tpu.memory_space<vmem>>, %arg11: memref<1x48xf32, #tpu.memory_space<vmem>>, %arg12: memref<1x32xf32, #tpu.memory_space<vmem>>, %arg13: memref<1x1xf32, #tpu.memory_space<vmem>>) attributes {dimension_semantics = [], scalar_prefetch = 0 : i64, scratch_operands = 0 : i64, tpu.core_type = #tpu.core_type<tc>} {
    %c0 = arith.constant 0 : index
    %c0_0 = arith.constant 0 : index
    %c0_1 = arith.constant 0 : index
    %0 = vector.load %arg0[%c0, %c0_0, %c0_1] : memref<2x8x32xf32, #tpu.memory_space<vmem>>, vector<2x8x32xf32>
    %1 = vector.shape_cast %0 : vector<2x8x32xf32> to vector<16x32xf32>
    %c0_2 = arith.constant 0 : index
    %c0_3 = arith.constant 0 : index
    %2 = vector.load %arg2[%c0_2, %c0_3] : memref<32x32xf32, #tpu.memory_space<vmem>>, vector<32x32xf32>
    %cst = arith.constant dense<0.000000e+00> : vector<16x32xf32>
    %3 = tpu.matmul %1, %2, %cst {dimension_numbers = #tpu.dot_dimension_numbers<[1], [0], [0], [1], [0, 0, 1, 1], [], []>} : vector<16x32xf32>, vector<32x32xf32>, vector<16x32xf32> -> vector<16x32xf32>
    %4 = vector.shape_cast %3 : vector<16x32xf32> to vector<2x8x32xf32>
    %c0_4 = arith.constant 0 : index
    %c0_5 = arith.constant 0 : index
    %5 = vector.load %arg3[%c0_4, %c0_5] : memref<32x96xf32, #tpu.memory_space<vmem>>, vector<32x96xf32>
    %cst_6 = arith.constant dense<0.000000e+00> : vector<16x96xf32>
    %6 = tpu.matmul %1, %5, %cst_6 {dimension_numbers = #tpu.dot_dimension_numbers<[1], [0], [0], [1], [0, 0, 1, 1], [], []>} : vector<16x32xf32>, vector<32x96xf32>, vector<16x96xf32> -> vector<16x96xf32>
    %7 = vector.shape_cast %6 : vector<16x96xf32> to vector<2x8x96xf32>
    %c0_7 = arith.constant 0 : index
    %c0_8 = arith.constant 0 : index
    %8 = vector.load %arg4[%c0_7, %c0_8] : memref<64x128xf32, #tpu.memory_space<vmem>>, vector<64x128xf32>
    %c0_9 = arith.constant 0 : index
    %c0_10 = arith.constant 0 : index
    %9 = vector.load %arg6[%c0_9, %c0_10] : memref<32x128xf32, #tpu.memory_space<vmem>>, vector<32x128xf32>
    %c0_11 = arith.constant 0 : index
    %c0_12 = arith.constant 0 : index
    %10 = vector.load %arg10[%c0_11, %c0_12] : memref<32x48xf32, #tpu.memory_space<vmem>>, vector<32x48xf32>
    %c0_13 = arith.constant 0 : index
    %c0_14 = arith.constant 0 : index
    %11 = vector.load %arg9[%c0_13, %c0_14] : memref<1x32xf32, #tpu.memory_space<vmem>>, vector<1x32xf32>
    %c0_15 = arith.constant 0 : index
    %c0_16 = arith.constant 0 : index
    %12 = vector.load %arg5[%c0_15, %c0_16] : memref<1x128xf32, #tpu.memory_space<vmem>>, vector<1x128xf32>
    %13 = vector.shape_cast %12 : vector<1x128xf32> to vector<1x128xf32>
    %14 = vector.broadcast %13 : vector<1x128xf32> to vector<2x128xf32>
    %c0_17 = arith.constant 0 : index
    %c0_18 = arith.constant 0 : index
    %15 = vector.load %arg7[%c0_17, %c0_18] : memref<1x128xf32, #tpu.memory_space<vmem>>, vector<1x128xf32>
    %16 = vector.shape_cast %15 : vector<1x128xf32> to vector<1x128xf32>
    %17 = vector.broadcast %16 : vector<1x128xf32> to vector<2x128xf32>
    %c0_19 = arith.constant 0 : index
    %c0_20 = arith.constant 0 : index
    %18 = vector.load %arg11[%c0_19, %c0_20] : memref<1x48xf32, #tpu.memory_space<vmem>>, vector<1x48xf32>
    %19 = vector.shape_cast %18 : vector<1x48xf32> to vector<1x48xf32>
    %20 = vector.broadcast %19 : vector<1x48xf32> to vector<2x48xf32>
    %c0_21 = arith.constant 0 : index
    %c0_22 = arith.constant 0 : index
    %21 = vector.load %arg8[%c0_21, %c0_22] : memref<1x96xf32, #tpu.memory_space<vmem>>, vector<1x96xf32>
    %22 = vector.shape_cast %21 : vector<1x96xf32> to vector<1x96xf32>
    %23 = vector.broadcast %22 : vector<1x96xf32> to vector<2x96xf32>
    %c0_23 = arith.constant 0 : index
    %c0_24 = arith.constant 0 : index
    %24 = vector.load %arg12[%c0_23, %c0_24] : memref<1x32xf32, #tpu.memory_space<vmem>>, vector<1x32xf32>
    %25 = vector.shape_cast %24 : vector<1x32xf32> to vector<1x32xf32>
    %26 = vector.broadcast %25 : vector<1x32xf32> to vector<2x32xf32>
    %cst_25 = arith.constant 0.000000e+00 : f32
    %27 = vector.broadcast %cst_25 : f32 to vector<2x32xf32>
    %cst_26 = arith.constant 0.000000e+00 : f32
    %28 = vector.broadcast %cst_26 : f32 to vector<2x16xf32>
    %c0_i32 = arith.constant 0 : i32
    %29 = tpu.concatenate %26, %27 in 1 : vector<2x32xf32>, vector<2x32xf32> -> vector<2x64xf32>
    %cst_27 = arith.constant dense<0.000000e+00> : vector<2x128xf32>
    %30 = tpu.matmul %29, %8, %cst_27 {dimension_numbers = #tpu.dot_dimension_numbers<[1], [0], [0], [1], [0, 0, 1, 1], [], []>} : vector<2x64xf32>, vector<64x128xf32>, vector<2x128xf32> -> vector<2x128xf32>
    %31 = arith.addf %30, %14 : vector<2x128xf32>
    %32 = vector.extract_strided_slice %31 {offsets = [0, 0], sizes = [2, 32], strides = [1, 1]} : vector<2x128xf32> to vector<2x32xf32>
    %33 = arith.negf %32 : vector<2x32xf32>
    %34 = math.exp %33 : vector<2x32xf32>
    %cst_28 = arith.constant 1.000000e+00 : f32
    %35 = vector.broadcast %cst_28 : f32 to vector<2x32xf32>
    %36 = arith.addf %35, %34 : vector<2x32xf32>
    %37 = arith.divf %35, %36 : vector<2x32xf32>
    %38 = vector.extract_strided_slice %31 {offsets = [0, 32], sizes = [2, 32], strides = [1, 1]} : vector<2x128xf32> to vector<2x32xf32>
    %39 = arith.negf %38 : vector<2x32xf32>
    %40 = math.exp %39 : vector<2x32xf32>
    %cst_29 = arith.constant 1.000000e+00 : f32
    %41 = vector.broadcast %cst_29 : f32 to vector<2x32xf32>
    %42 = arith.addf %41, %40 : vector<2x32xf32>
    %43 = arith.divf %41, %42 : vector<2x32xf32>
    %44 = vector.extract_strided_slice %31 {offsets = [0, 64], sizes = [2, 32], strides = [1, 1]} : vector<2x128xf32> to vector<2x32xf32>
    %45 = vector.extract_strided_slice %31 {offsets = [0, 96], sizes = [2, 32], strides = [1, 1]} : vector<2x128xf32> to vector<2x32xf32>
    %46 = arith.mulf %37, %45 : vector<2x32xf32>
    %47 = arith.addf %44, %46 : vector<2x32xf32>
    %48 = math.tanh %47 : vector<2x32xf32>
    %cst_30 = arith.constant 1.000000e+00 : f32
    %49 = vector.broadcast %cst_30 : f32 to vector<2x32xf32>
    %50 = arith.subf %49, %43 : vector<2x32xf32>
    %51 = arith.mulf %50, %48 : vector<2x32xf32>
    %52 = arith.mulf %43, %27 : vector<2x32xf32>
    %53 = arith.addf %51, %52 : vector<2x32xf32>
    %cst_31 = arith.constant dense<0.000000e+00> : vector<2x128xf32>
    %54 = tpu.matmul %53, %9, %cst_31 {dimension_numbers = #tpu.dot_dimension_numbers<[1], [0], [0], [1], [0, 0, 1, 1], [], []>} : vector<2x32xf32>, vector<32x128xf32>, vector<2x128xf32> -> vector<2x128xf32>
    %55 = arith.addf %54, %17 : vector<2x128xf32>
    %56 = vector.extract_strided_slice %55 {offsets = [0, 0], sizes = [2, 32], strides = [1, 1]} : vector<2x128xf32> to vector<2x32xf32>
    %57 = vector.extract_strided_slice %55 {offsets = [0, 32], sizes = [2, 96], strides = [1, 1]} : vector<2x128xf32> to vector<2x96xf32>
    %58 = vector.shape_cast %56 : vector<2x32xf32> to vector<2x1x32xf32>
    %59 = vector.broadcast %58 : vector<2x1x32xf32> to vector<2x8x32xf32>
    %60 = arith.addf %4, %59 : vector<2x8x32xf32>
    %61 = math.tanh %60 : vector<2x8x32xf32>
    %62 = vector.shape_cast %11 : vector<1x32xf32> to vector<1x1x32xf32>
    %63 = vector.broadcast %62 : vector<1x1x32xf32> to vector<2x8x32xf32>
    %64 = arith.mulf %61, %63 : vector<2x8x32xf32>
    %cst_32 = arith.constant dense<0.000000e+00> : vector<2x8xf32>
    %65 = vector.multi_reduction <add>, %64, %cst_32 [2] : vector<2x8x32xf32> to vector<2x8xf32>
    %cst_33 = arith.constant dense<0xFF800000> : vector<2xf32>
    %66 = vector.multi_reduction <maximumf>, %65, %cst_33 [1] : vector<2x8xf32> to vector<2xf32>
    %67 = vector.shape_cast %66 : vector<2xf32> to vector<2x1xf32>
    %68 = vector.broadcast %67 : vector<2x1xf32> to vector<2x8xf32>
    %69 = arith.subf %65, %68 : vector<2x8xf32>
    %70 = math.exp %69 : vector<2x8xf32>
    %cst_34 = arith.constant dense<0.000000e+00> : vector<2xf32>
    %71 = vector.multi_reduction <add>, %70, %cst_34 [1] : vector<2x8xf32> to vector<2xf32>
    %72 = vector.shape_cast %71 : vector<2xf32> to vector<2x1xf32>
    %73 = vector.broadcast %72 : vector<2x1xf32> to vector<2x8xf32>
    %74 = arith.divf %70, %73 : vector<2x8xf32>
    %75 = vector.shape_cast %74 : vector<2x8xf32> to vector<2x8x1xf32>
    %76 = vector.broadcast %75 : vector<2x8x1xf32> to vector<2x8x96xf32>
    %77 = arith.mulf %76, %7 : vector<2x8x96xf32>
    %cst_35 = arith.constant dense<0.000000e+00> : vector<2x96xf32>
    %78 = vector.multi_reduction <add>, %77, %cst_35 [1] : vector<2x8x96xf32> to vector<2x96xf32>
    %79 = arith.addf %78, %23 : vector<2x96xf32>
    %80 = vector.extract_strided_slice %79 {offsets = [0, 0], sizes = [2, 32], strides = [1, 1]} : vector<2x96xf32> to vector<2x32xf32>
    %81 = vector.extract_strided_slice %57 {offsets = [0, 0], sizes = [2, 32], strides = [1, 1]} : vector<2x96xf32> to vector<2x32xf32>
    %82 = arith.addf %80, %81 : vector<2x32xf32>
    %83 = arith.negf %82 : vector<2x32xf32>
    %84 = math.exp %83 : vector<2x32xf32>
    %cst_36 = arith.constant 1.000000e+00 : f32
    %85 = vector.broadcast %cst_36 : f32 to vector<2x32xf32>
    %86 = arith.addf %85, %84 : vector<2x32xf32>
    %87 = arith.divf %85, %86 : vector<2x32xf32>
    %88 = vector.extract_strided_slice %79 {offsets = [0, 32], sizes = [2, 32], strides = [1, 1]} : vector<2x96xf32> to vector<2x32xf32>
    %89 = vector.extract_strided_slice %57 {offsets = [0, 32], sizes = [2, 32], strides = [1, 1]} : vector<2x96xf32> to vector<2x32xf32>
    %90 = arith.addf %88, %89 : vector<2x32xf32>
    %91 = arith.negf %90 : vector<2x32xf32>
    %92 = math.exp %91 : vector<2x32xf32>
    %cst_37 = arith.constant 1.000000e+00 : f32
    %93 = vector.broadcast %cst_37 : f32 to vector<2x32xf32>
    %94 = arith.addf %93, %92 : vector<2x32xf32>
    %95 = arith.divf %93, %94 : vector<2x32xf32>
    %96 = vector.extract_strided_slice %79 {offsets = [0, 64], sizes = [2, 32], strides = [1, 1]} : vector<2x96xf32> to vector<2x32xf32>
    %97 = vector.extract_strided_slice %57 {offsets = [0, 64], sizes = [2, 32], strides = [1, 1]} : vector<2x96xf32> to vector<2x32xf32>
    %98 = arith.mulf %87, %97 : vector<2x32xf32>
    %99 = arith.addf %96, %98 : vector<2x32xf32>
    %100 = math.tanh %99 : vector<2x32xf32>
    %cst_38 = arith.constant 1.000000e+00 : f32
    %101 = vector.broadcast %cst_38 : f32 to vector<2x32xf32>
    %102 = arith.subf %101, %95 : vector<2x32xf32>
    %103 = arith.mulf %102, %100 : vector<2x32xf32>
    %104 = arith.mulf %95, %53 : vector<2x32xf32>
    %105 = arith.addf %103, %104 : vector<2x32xf32>
    %cst_39 = arith.constant dense<0.000000e+00> : vector<2x48xf32>
    %106 = tpu.matmul %105, %10, %cst_39 {dimension_numbers = #tpu.dot_dimension_numbers<[1], [0], [0], [1], [0, 0, 1, 1], [], []>} : vector<2x32xf32>, vector<32x48xf32>, vector<2x48xf32> -> vector<2x48xf32>
    %107 = arith.addf %106, %20 : vector<2x48xf32>
    %108 = vector.extract_strided_slice %107 {offsets = [0, 0], sizes = [2, 32], strides = [1, 1]} : vector<2x48xf32> to vector<2x32xf32>
    %109 = math.tanh %108 : vector<2x32xf32>
    %110 = vector.extract_strided_slice %107 {offsets = [0, 32], sizes = [2, 16], strides = [1, 1]} : vector<2x48xf32> to vector<2x16xf32>
    %111 = arith.index_cast %c0_i32 : i32 to index
    %c0_40 = arith.constant 0 : index
    %c0_41 = arith.constant 0 : index
    %112 = vector.load %arg1[%111, %c0_40, %c0_41] : memref<8x2x16xf32, #tpu.memory_space<vmem>>, vector<1x2x16xf32>
    %113 = vector.shape_cast %112 : vector<1x2x16xf32> to vector<2x16xf32>
    %114 = arith.subf %110, %113 : vector<2x16xf32>
    %115 = arith.mulf %114, %114 : vector<2x16xf32>
    %116 = arith.addf %28, %115 : vector<2x16xf32>
    %c1_i32 = arith.constant 1 : i32
    %117 = tpu.concatenate %109, %105 in 1 : vector<2x32xf32>, vector<2x32xf32> -> vector<2x64xf32>
    %cst_42 = arith.constant dense<0.000000e+00> : vector<2x128xf32>
    %118 = tpu.matmul %117, %8, %cst_42 {dimension_numbers = #tpu.dot_dimension_numbers<[1], [0], [0], [1], [0, 0, 1, 1], [], []>} : vector<2x64xf32>, vector<64x128xf32>, vector<2x128xf32> -> vector<2x128xf32>
    %119 = arith.addf %118, %14 : vector<2x128xf32>
    %120 = vector.extract_strided_slice %119 {offsets = [0, 0], sizes = [2, 32], strides = [1, 1]} : vector<2x128xf32> to vector<2x32xf32>
    %121 = arith.negf %120 : vector<2x32xf32>
    %122 = math.exp %121 : vector<2x32xf32>
    %cst_43 = arith.constant 1.000000e+00 : f32
    %123 = vector.broadcast %cst_43 : f32 to vector<2x32xf32>
    %124 = arith.addf %123, %122 : vector<2x32xf32>
    %125 = arith.divf %123, %124 : vector<2x32xf32>
    %126 = vector.extract_strided_slice %119 {offsets = [0, 32], sizes = [2, 32], strides = [1, 1]} : vector<2x128xf32> to vector<2x32xf32>
    %127 = arith.negf %126 : vector<2x32xf32>
    %128 = math.exp %127 : vector<2x32xf32>
    %cst_44 = arith.constant 1.000000e+00 : f32
    %129 = vector.broadcast %cst_44 : f32 to vector<2x32xf32>
    %130 = arith.addf %129, %128 : vector<2x32xf32>
    %131 = arith.divf %129, %130 : vector<2x32xf32>
    %132 = vector.extract_strided_slice %119 {offsets = [0, 64], sizes = [2, 32], strides = [1, 1]} : vector<2x128xf32> to vector<2x32xf32>
    %133 = vector.extract_strided_slice %119 {offsets = [0, 96], sizes = [2, 32], strides = [1, 1]} : vector<2x128xf32> to vector<2x32xf32>
    %134 = arith.mulf %125, %133 : vector<2x32xf32>
    %135 = arith.addf %132, %134 : vector<2x32xf32>
    %136 = math.tanh %135 : vector<2x32xf32>
    %cst_45 = arith.constant 1.000000e+00 : f32
    %137 = vector.broadcast %cst_45 : f32 to vector<2x32xf32>
    %138 = arith.subf %137, %131 : vector<2x32xf32>
    %139 = arith.mulf %138, %136 : vector<2x32xf32>
    %140 = arith.mulf %131, %105 : vector<2x32xf32>
    %141 = arith.addf %139, %140 : vector<2x32xf32>
    %cst_46 = arith.constant dense<0.000000e+00> : vector<2x128xf32>
    %142 = tpu.matmul %141, %9, %cst_46 {dimension_numbers = #tpu.dot_dimension_numbers<[1], [0], [0], [1], [0, 0, 1, 1], [], []>} : vector<2x32xf32>, vector<32x128xf32>, vector<2x128xf32> -> vector<2x128xf32>
    %143 = arith.addf %142, %17 : vector<2x128xf32>
    %144 = vector.extract_strided_slice %143 {offsets = [0, 0], sizes = [2, 32], strides = [1, 1]} : vector<2x128xf32> to vector<2x32xf32>
    %145 = vector.extract_strided_slice %143 {offsets = [0, 32], sizes = [2, 96], strides = [1, 1]} : vector<2x128xf32> to vector<2x96xf32>
    %146 = vector.shape_cast %144 : vector<2x32xf32> to vector<2x1x32xf32>
    %147 = vector.broadcast %146 : vector<2x1x32xf32> to vector<2x8x32xf32>
    %148 = arith.addf %4, %147 : vector<2x8x32xf32>
    %149 = math.tanh %148 : vector<2x8x32xf32>
    %150 = vector.shape_cast %11 : vector<1x32xf32> to vector<1x1x32xf32>
    %151 = vector.broadcast %150 : vector<1x1x32xf32> to vector<2x8x32xf32>
    %152 = arith.mulf %149, %151 : vector<2x8x32xf32>
    %cst_47 = arith.constant dense<0.000000e+00> : vector<2x8xf32>
    %153 = vector.multi_reduction <add>, %152, %cst_47 [2] : vector<2x8x32xf32> to vector<2x8xf32>
    %cst_48 = arith.constant dense<0xFF800000> : vector<2xf32>
    %154 = vector.multi_reduction <maximumf>, %153, %cst_48 [1] : vector<2x8xf32> to vector<2xf32>
    %155 = vector.shape_cast %154 : vector<2xf32> to vector<2x1xf32>
    %156 = vector.broadcast %155 : vector<2x1xf32> to vector<2x8xf32>
    %157 = arith.subf %153, %156 : vector<2x8xf32>
    %158 = math.exp %157 : vector<2x8xf32>
    %cst_49 = arith.constant dense<0.000000e+00> : vector<2xf32>
    %159 = vector.multi_reduction <add>, %158, %cst_49 [1] : vector<2x8xf32> to vector<2xf32>
    %160 = vector.shape_cast %159 : vector<2xf32> to vector<2x1xf32>
    %161 = vector.broadcast %160 : vector<2x1xf32> to vector<2x8xf32>
    %162 = arith.divf %158, %161 : vector<2x8xf32>
    %163 = vector.shape_cast %162 : vector<2x8xf32> to vector<2x8x1xf32>
    %164 = vector.broadcast %163 : vector<2x8x1xf32> to vector<2x8x96xf32>
    %165 = arith.mulf %164, %7 : vector<2x8x96xf32>
    %cst_50 = arith.constant dense<0.000000e+00> : vector<2x96xf32>
    %166 = vector.multi_reduction <add>, %165, %cst_50 [1] : vector<2x8x96xf32> to vector<2x96xf32>
    %167 = arith.addf %166, %23 : vector<2x96xf32>
    %168 = vector.extract_strided_slice %167 {offsets = [0, 0], sizes = [2, 32], strides = [1, 1]} : vector<2x96xf32> to vector<2x32xf32>
    %169 = vector.extract_strided_slice %145 {offsets = [0, 0], sizes = [2, 32], strides = [1, 1]} : vector<2x96xf32> to vector<2x32xf32>
    %170 = arith.addf %168, %169 : vector<2x32xf32>
    %171 = arith.negf %170 : vector<2x32xf32>
    %172 = math.exp %171 : vector<2x32xf32>
    %cst_51 = arith.constant 1.000000e+00 : f32
    %173 = vector.broadcast %cst_51 : f32 to vector<2x32xf32>
    %174 = arith.addf %173, %172 : vector<2x32xf32>
    %175 = arith.divf %173, %174 : vector<2x32xf32>
    %176 = vector.extract_strided_slice %167 {offsets = [0, 32], sizes = [2, 32], strides = [1, 1]} : vector<2x96xf32> to vector<2x32xf32>
    %177 = vector.extract_strided_slice %145 {offsets = [0, 32], sizes = [2, 32], strides = [1, 1]} : vector<2x96xf32> to vector<2x32xf32>
    %178 = arith.addf %176, %177 : vector<2x32xf32>
    %179 = arith.negf %178 : vector<2x32xf32>
    %180 = math.exp %179 : vector<2x32xf32>
    %cst_52 = arith.constant 1.000000e+00 : f32
    %181 = vector.broadcast %cst_52 : f32 to vector<2x32xf32>
    %182 = arith.addf %181, %180 : vector<2x32xf32>
    %183 = arith.divf %181, %182 : vector<2x32xf32>
    %184 = vector.extract_strided_slice %167 {offsets = [0, 64], sizes = [2, 32], strides = [1, 1]} : vector<2x96xf32> to vector<2x32xf32>
    %185 = vector.extract_strided_slice %145 {offsets = [0, 64], sizes = [2, 32], strides = [1, 1]} : vector<2x96xf32> to vector<2x32xf32>
    %186 = arith.mulf %175, %185 : vector<2x32xf32>
    %187 = arith.addf %184, %186 : vector<2x32xf32>
    %188 = math.tanh %187 : vector<2x32xf32>
    %cst_53 = arith.constant 1.000000e+00 : f32
    %189 = vector.broadcast %cst_53 : f32 to vector<2x32xf32>
    %190 = arith.subf %189, %183 : vector<2x32xf32>
    %191 = arith.mulf %190, %188 : vector<2x32xf32>
    %192 = arith.mulf %183, %141 : vector<2x32xf32>
    %193 = arith.addf %191, %192 : vector<2x32xf32>
    %cst_54 = arith.constant dense<0.000000e+00> : vector<2x48xf32>
    %194 = tpu.matmul %193, %10, %cst_54 {dimension_numbers = #tpu.dot_dimension_numbers<[1], [0], [0], [1], [0, 0, 1, 1], [], []>} : vector<2x32xf32>, vector<32x48xf32>, vector<2x48xf32> -> vector<2x48xf32>
    %195 = arith.addf %194, %20 : vector<2x48xf32>
    %196 = vector.extract_strided_slice %195 {offsets = [0, 0], sizes = [2, 32], strides = [1, 1]} : vector<2x48xf32> to vector<2x32xf32>
    %197 = math.tanh %196 : vector<2x32xf32>
    %198 = vector.extract_strided_slice %195 {offsets = [0, 32], sizes = [2, 16], strides = [1, 1]} : vector<2x48xf32> to vector<2x16xf32>
    %199 = arith.index_cast %c1_i32 : i32 to index
    %c0_55 = arith.constant 0 : index
    %c0_56 = arith.constant 0 : index
    %200 = vector.load %arg1[%199, %c0_55, %c0_56] : memref<8x2x16xf32, #tpu.memory_space<vmem>>, vector<1x2x16xf32>
    %201 = vector.shape_cast %200 : vector<1x2x16xf32> to vector<2x16xf32>
    %202 = arith.subf %198, %201 : vector<2x16xf32>
    %203 = arith.mulf %202, %202 : vector<2x16xf32>
    %204 = arith.addf %116, %203 : vector<2x16xf32>
    %c2_i32 = arith.constant 2 : i32
    %205 = tpu.concatenate %197, %193 in 1 : vector<2x32xf32>, vector<2x32xf32> -> vector<2x64xf32>
    %cst_57 = arith.constant dense<0.000000e+00> : vector<2x128xf32>
    %206 = tpu.matmul %205, %8, %cst_57 {dimension_numbers = #tpu.dot_dimension_numbers<[1], [0], [0], [1], [0, 0, 1, 1], [], []>} : vector<2x64xf32>, vector<64x128xf32>, vector<2x128xf32> -> vector<2x128xf32>
    %207 = arith.addf %206, %14 : vector<2x128xf32>
    %208 = vector.extract_strided_slice %207 {offsets = [0, 0], sizes = [2, 32], strides = [1, 1]} : vector<2x128xf32> to vector<2x32xf32>
    %209 = arith.negf %208 : vector<2x32xf32>
    %210 = math.exp %209 : vector<2x32xf32>
    %cst_58 = arith.constant 1.000000e+00 : f32
    %211 = vector.broadcast %cst_58 : f32 to vector<2x32xf32>
    %212 = arith.addf %211, %210 : vector<2x32xf32>
    %213 = arith.divf %211, %212 : vector<2x32xf32>
    %214 = vector.extract_strided_slice %207 {offsets = [0, 32], sizes = [2, 32], strides = [1, 1]} : vector<2x128xf32> to vector<2x32xf32>
    %215 = arith.negf %214 : vector<2x32xf32>
    %216 = math.exp %215 : vector<2x32xf32>
    %cst_59 = arith.constant 1.000000e+00 : f32
    %217 = vector.broadcast %cst_59 : f32 to vector<2x32xf32>
    %218 = arith.addf %217, %216 : vector<2x32xf32>
    %219 = arith.divf %217, %218 : vector<2x32xf32>
    %220 = vector.extract_strided_slice %207 {offsets = [0, 64], sizes = [2, 32], strides = [1, 1]} : vector<2x128xf32> to vector<2x32xf32>
    %221 = vector.extract_strided_slice %207 {offsets = [0, 96], sizes = [2, 32], strides = [1, 1]} : vector<2x128xf32> to vector<2x32xf32>
    %222 = arith.mulf %213, %221 : vector<2x32xf32>
    %223 = arith.addf %220, %222 : vector<2x32xf32>
    %224 = math.tanh %223 : vector<2x32xf32>
    %cst_60 = arith.constant 1.000000e+00 : f32
    %225 = vector.broadcast %cst_60 : f32 to vector<2x32xf32>
    %226 = arith.subf %225, %219 : vector<2x32xf32>
    %227 = arith.mulf %226, %224 : vector<2x32xf32>
    %228 = arith.mulf %219, %193 : vector<2x32xf32>
    %229 = arith.addf %227, %228 : vector<2x32xf32>
    %cst_61 = arith.constant dense<0.000000e+00> : vector<2x128xf32>
    %230 = tpu.matmul %229, %9, %cst_61 {dimension_numbers = #tpu.dot_dimension_numbers<[1], [0], [0], [1], [0, 0, 1, 1], [], []>} : vector<2x32xf32>, vector<32x128xf32>, vector<2x128xf32> -> vector<2x128xf32>
    %231 = arith.addf %230, %17 : vector<2x128xf32>
    %232 = vector.extract_strided_slice %231 {offsets = [0, 0], sizes = [2, 32], strides = [1, 1]} : vector<2x128xf32> to vector<2x32xf32>
    %233 = vector.extract_strided_slice %231 {offsets = [0, 32], sizes = [2, 96], strides = [1, 1]} : vector<2x128xf32> to vector<2x96xf32>
    %234 = vector.shape_cast %232 : vector<2x32xf32> to vector<2x1x32xf32>
    %235 = vector.broadcast %234 : vector<2x1x32xf32> to vector<2x8x32xf32>
    %236 = arith.addf %4, %235 : vector<2x8x32xf32>
    %237 = math.tanh %236 : vector<2x8x32xf32>
    %238 = vector.shape_cast %11 : vector<1x32xf32> to vector<1x1x32xf32>
    %239 = vector.broadcast %238 : vector<1x1x32xf32> to vector<2x8x32xf32>
    %240 = arith.mulf %237, %239 : vector<2x8x32xf32>
    %cst_62 = arith.constant dense<0.000000e+00> : vector<2x8xf32>
    %241 = vector.multi_reduction <add>, %240, %cst_62 [2] : vector<2x8x32xf32> to vector<2x8xf32>
    %cst_63 = arith.constant dense<0xFF800000> : vector<2xf32>
    %242 = vector.multi_reduction <maximumf>, %241, %cst_63 [1] : vector<2x8xf32> to vector<2xf32>
    %243 = vector.shape_cast %242 : vector<2xf32> to vector<2x1xf32>
    %244 = vector.broadcast %243 : vector<2x1xf32> to vector<2x8xf32>
    %245 = arith.subf %241, %244 : vector<2x8xf32>
    %246 = math.exp %245 : vector<2x8xf32>
    %cst_64 = arith.constant dense<0.000000e+00> : vector<2xf32>
    %247 = vector.multi_reduction <add>, %246, %cst_64 [1] : vector<2x8xf32> to vector<2xf32>
    %248 = vector.shape_cast %247 : vector<2xf32> to vector<2x1xf32>
    %249 = vector.broadcast %248 : vector<2x1xf32> to vector<2x8xf32>
    %250 = arith.divf %246, %249 : vector<2x8xf32>
    %251 = vector.shape_cast %250 : vector<2x8xf32> to vector<2x8x1xf32>
    %252 = vector.broadcast %251 : vector<2x8x1xf32> to vector<2x8x96xf32>
    %253 = arith.mulf %252, %7 : vector<2x8x96xf32>
    %cst_65 = arith.constant dense<0.000000e+00> : vector<2x96xf32>
    %254 = vector.multi_reduction <add>, %253, %cst_65 [1] : vector<2x8x96xf32> to vector<2x96xf32>
    %255 = arith.addf %254, %23 : vector<2x96xf32>
    %256 = vector.extract_strided_slice %255 {offsets = [0, 0], sizes = [2, 32], strides = [1, 1]} : vector<2x96xf32> to vector<2x32xf32>
    %257 = vector.extract_strided_slice %233 {offsets = [0, 0], sizes = [2, 32], strides = [1, 1]} : vector<2x96xf32> to vector<2x32xf32>
    %258 = arith.addf %256, %257 : vector<2x32xf32>
    %259 = arith.negf %258 : vector<2x32xf32>
    %260 = math.exp %259 : vector<2x32xf32>
    %cst_66 = arith.constant 1.000000e+00 : f32
    %261 = vector.broadcast %cst_66 : f32 to vector<2x32xf32>
    %262 = arith.addf %261, %260 : vector<2x32xf32>
    %263 = arith.divf %261, %262 : vector<2x32xf32>
    %264 = vector.extract_strided_slice %255 {offsets = [0, 32], sizes = [2, 32], strides = [1, 1]} : vector<2x96xf32> to vector<2x32xf32>
    %265 = vector.extract_strided_slice %233 {offsets = [0, 32], sizes = [2, 32], strides = [1, 1]} : vector<2x96xf32> to vector<2x32xf32>
    %266 = arith.addf %264, %265 : vector<2x32xf32>
    %267 = arith.negf %266 : vector<2x32xf32>
    %268 = math.exp %267 : vector<2x32xf32>
    %cst_67 = arith.constant 1.000000e+00 : f32
    %269 = vector.broadcast %cst_67 : f32 to vector<2x32xf32>
    %270 = arith.addf %269, %268 : vector<2x32xf32>
    %271 = arith.divf %269, %270 : vector<2x32xf32>
    %272 = vector.extract_strided_slice %255 {offsets = [0, 64], sizes = [2, 32], strides = [1, 1]} : vector<2x96xf32> to vector<2x32xf32>
    %273 = vector.extract_strided_slice %233 {offsets = [0, 64], sizes = [2, 32], strides = [1, 1]} : vector<2x96xf32> to vector<2x32xf32>
    %274 = arith.mulf %263, %273 : vector<2x32xf32>
    %275 = arith.addf %272, %274 : vector<2x32xf32>
    %276 = math.tanh %275 : vector<2x32xf32>
    %cst_68 = arith.constant 1.000000e+00 : f32
    %277 = vector.broadcast %cst_68 : f32 to vector<2x32xf32>
    %278 = arith.subf %277, %271 : vector<2x32xf32>
    %279 = arith.mulf %278, %276 : vector<2x32xf32>
    %280 = arith.mulf %271, %229 : vector<2x32xf32>
    %281 = arith.addf %279, %280 : vector<2x32xf32>
    %cst_69 = arith.constant dense<0.000000e+00> : vector<2x48xf32>
    %282 = tpu.matmul %281, %10, %cst_69 {dimension_numbers = #tpu.dot_dimension_numbers<[1], [0], [0], [1], [0, 0, 1, 1], [], []>} : vector<2x32xf32>, vector<32x48xf32>, vector<2x48xf32> -> vector<2x48xf32>
    %283 = arith.addf %282, %20 : vector<2x48xf32>
    %284 = vector.extract_strided_slice %283 {offsets = [0, 0], sizes = [2, 32], strides = [1, 1]} : vector<2x48xf32> to vector<2x32xf32>
    %285 = math.tanh %284 : vector<2x32xf32>
    %286 = vector.extract_strided_slice %283 {offsets = [0, 32], sizes = [2, 16], strides = [1, 1]} : vector<2x48xf32> to vector<2x16xf32>
    %287 = arith.index_cast %c2_i32 : i32 to index
    %c0_70 = arith.constant 0 : index
    %c0_71 = arith.constant 0 : index
    %288 = vector.load %arg1[%287, %c0_70, %c0_71] : memref<8x2x16xf32, #tpu.memory_space<vmem>>, vector<1x2x16xf32>
    %289 = vector.shape_cast %288 : vector<1x2x16xf32> to vector<2x16xf32>
    %290 = arith.subf %286, %289 : vector<2x16xf32>
    %291 = arith.mulf %290, %290 : vector<2x16xf32>
    %292 = arith.addf %204, %291 : vector<2x16xf32>
    %c3_i32 = arith.constant 3 : i32
    %293 = tpu.concatenate %285, %281 in 1 : vector<2x32xf32>, vector<2x32xf32> -> vector<2x64xf32>
    %cst_72 = arith.constant dense<0.000000e+00> : vector<2x128xf32>
    %294 = tpu.matmul %293, %8, %cst_72 {dimension_numbers = #tpu.dot_dimension_numbers<[1], [0], [0], [1], [0, 0, 1, 1], [], []>} : vector<2x64xf32>, vector<64x128xf32>, vector<2x128xf32> -> vector<2x128xf32>
    %295 = arith.addf %294, %14 : vector<2x128xf32>
    %296 = vector.extract_strided_slice %295 {offsets = [0, 0], sizes = [2, 32], strides = [1, 1]} : vector<2x128xf32> to vector<2x32xf32>
    %297 = arith.negf %296 : vector<2x32xf32>
    %298 = math.exp %297 : vector<2x32xf32>
    %cst_73 = arith.constant 1.000000e+00 : f32
    %299 = vector.broadcast %cst_73 : f32 to vector<2x32xf32>
    %300 = arith.addf %299, %298 : vector<2x32xf32>
    %301 = arith.divf %299, %300 : vector<2x32xf32>
    %302 = vector.extract_strided_slice %295 {offsets = [0, 32], sizes = [2, 32], strides = [1, 1]} : vector<2x128xf32> to vector<2x32xf32>
    %303 = arith.negf %302 : vector<2x32xf32>
    %304 = math.exp %303 : vector<2x32xf32>
    %cst_74 = arith.constant 1.000000e+00 : f32
    %305 = vector.broadcast %cst_74 : f32 to vector<2x32xf32>
    %306 = arith.addf %305, %304 : vector<2x32xf32>
    %307 = arith.divf %305, %306 : vector<2x32xf32>
    %308 = vector.extract_strided_slice %295 {offsets = [0, 64], sizes = [2, 32], strides = [1, 1]} : vector<2x128xf32> to vector<2x32xf32>
    %309 = vector.extract_strided_slice %295 {offsets = [0, 96], sizes = [2, 32], strides = [1, 1]} : vector<2x128xf32> to vector<2x32xf32>
    %310 = arith.mulf %301, %309 : vector<2x32xf32>
    %311 = arith.addf %308, %310 : vector<2x32xf32>
    %312 = math.tanh %311 : vector<2x32xf32>
    %cst_75 = arith.constant 1.000000e+00 : f32
    %313 = vector.broadcast %cst_75 : f32 to vector<2x32xf32>
    %314 = arith.subf %313, %307 : vector<2x32xf32>
    %315 = arith.mulf %314, %312 : vector<2x32xf32>
    %316 = arith.mulf %307, %281 : vector<2x32xf32>
    %317 = arith.addf %315, %316 : vector<2x32xf32>
    %cst_76 = arith.constant dense<0.000000e+00> : vector<2x128xf32>
    %318 = tpu.matmul %317, %9, %cst_76 {dimension_numbers = #tpu.dot_dimension_numbers<[1], [0], [0], [1], [0, 0, 1, 1], [], []>} : vector<2x32xf32>, vector<32x128xf32>, vector<2x128xf32> -> vector<2x128xf32>
    %319 = arith.addf %318, %17 : vector<2x128xf32>
    %320 = vector.extract_strided_slice %319 {offsets = [0, 0], sizes = [2, 32], strides = [1, 1]} : vector<2x128xf32> to vector<2x32xf32>
    %321 = vector.extract_strided_slice %319 {offsets = [0, 32], sizes = [2, 96], strides = [1, 1]} : vector<2x128xf32> to vector<2x96xf32>
    %322 = vector.shape_cast %320 : vector<2x32xf32> to vector<2x1x32xf32>
    %323 = vector.broadcast %322 : vector<2x1x32xf32> to vector<2x8x32xf32>
    %324 = arith.addf %4, %323 : vector<2x8x32xf32>
    %325 = math.tanh %324 : vector<2x8x32xf32>
    %326 = vector.shape_cast %11 : vector<1x32xf32> to vector<1x1x32xf32>
    %327 = vector.broadcast %326 : vector<1x1x32xf32> to vector<2x8x32xf32>
    %328 = arith.mulf %325, %327 : vector<2x8x32xf32>
    %cst_77 = arith.constant dense<0.000000e+00> : vector<2x8xf32>
    %329 = vector.multi_reduction <add>, %328, %cst_77 [2] : vector<2x8x32xf32> to vector<2x8xf32>
    %cst_78 = arith.constant dense<0xFF800000> : vector<2xf32>
    %330 = vector.multi_reduction <maximumf>, %329, %cst_78 [1] : vector<2x8xf32> to vector<2xf32>
    %331 = vector.shape_cast %330 : vector<2xf32> to vector<2x1xf32>
    %332 = vector.broadcast %331 : vector<2x1xf32> to vector<2x8xf32>
    %333 = arith.subf %329, %332 : vector<2x8xf32>
    %334 = math.exp %333 : vector<2x8xf32>
    %cst_79 = arith.constant dense<0.000000e+00> : vector<2xf32>
    %335 = vector.multi_reduction <add>, %334, %cst_79 [1] : vector<2x8xf32> to vector<2xf32>
    %336 = vector.shape_cast %335 : vector<2xf32> to vector<2x1xf32>
    %337 = vector.broadcast %336 : vector<2x1xf32> to vector<2x8xf32>
    %338 = arith.divf %334, %337 : vector<2x8xf32>
    %339 = vector.shape_cast %338 : vector<2x8xf32> to vector<2x8x1xf32>
    %340 = vector.broadcast %339 : vector<2x8x1xf32> to vector<2x8x96xf32>
    %341 = arith.mulf %340, %7 : vector<2x8x96xf32>
    %cst_80 = arith.constant dense<0.000000e+00> : vector<2x96xf32>
    %342 = vector.multi_reduction <add>, %341, %cst_80 [1] : vector<2x8x96xf32> to vector<2x96xf32>
    %343 = arith.addf %342, %23 : vector<2x96xf32>
    %344 = vector.extract_strided_slice %343 {offsets = [0, 0], sizes = [2, 32], strides = [1, 1]} : vector<2x96xf32> to vector<2x32xf32>
    %345 = vector.extract_strided_slice %321 {offsets = [0, 0], sizes = [2, 32], strides = [1, 1]} : vector<2x96xf32> to vector<2x32xf32>
    %346 = arith.addf %344, %345 : vector<2x32xf32>
    %347 = arith.negf %346 : vector<2x32xf32>
    %348 = math.exp %347 : vector<2x32xf32>
    %cst_81 = arith.constant 1.000000e+00 : f32
    %349 = vector.broadcast %cst_81 : f32 to vector<2x32xf32>
    %350 = arith.addf %349, %348 : vector<2x32xf32>
    %351 = arith.divf %349, %350 : vector<2x32xf32>
    %352 = vector.extract_strided_slice %343 {offsets = [0, 32], sizes = [2, 32], strides = [1, 1]} : vector<2x96xf32> to vector<2x32xf32>
    %353 = vector.extract_strided_slice %321 {offsets = [0, 32], sizes = [2, 32], strides = [1, 1]} : vector<2x96xf32> to vector<2x32xf32>
    %354 = arith.addf %352, %353 : vector<2x32xf32>
    %355 = arith.negf %354 : vector<2x32xf32>
    %356 = math.exp %355 : vector<2x32xf32>
    %cst_82 = arith.constant 1.000000e+00 : f32
    %357 = vector.broadcast %cst_82 : f32 to vector<2x32xf32>
    %358 = arith.addf %357, %356 : vector<2x32xf32>
    %359 = arith.divf %357, %358 : vector<2x32xf32>
    %360 = vector.extract_strided_slice %343 {offsets = [0, 64], sizes = [2, 32], strides = [1, 1]} : vector<2x96xf32> to vector<2x32xf32>
    %361 = vector.extract_strided_slice %321 {offsets = [0, 64], sizes = [2, 32], strides = [1, 1]} : vector<2x96xf32> to vector<2x32xf32>
    %362 = arith.mulf %351, %361 : vector<2x32xf32>
    %363 = arith.addf %360, %362 : vector<2x32xf32>
    %364 = math.tanh %363 : vector<2x32xf32>
    %cst_83 = arith.constant 1.000000e+00 : f32
    %365 = vector.broadcast %cst_83 : f32 to vector<2x32xf32>
    %366 = arith.subf %365, %359 : vector<2x32xf32>
    %367 = arith.mulf %366, %364 : vector<2x32xf32>
    %368 = arith.mulf %359, %317 : vector<2x32xf32>
    %369 = arith.addf %367, %368 : vector<2x32xf32>
    %cst_84 = arith.constant dense<0.000000e+00> : vector<2x48xf32>
    %370 = tpu.matmul %369, %10, %cst_84 {dimension_numbers = #tpu.dot_dimension_numbers<[1], [0], [0], [1], [0, 0, 1, 1], [], []>} : vector<2x32xf32>, vector<32x48xf32>, vector<2x48xf32> -> vector<2x48xf32>
    %371 = arith.addf %370, %20 : vector<2x48xf32>
    %372 = vector.extract_strided_slice %371 {offsets = [0, 0], sizes = [2, 32], strides = [1, 1]} : vector<2x48xf32> to vector<2x32xf32>
    %373 = math.tanh %372 : vector<2x32xf32>
    %374 = vector.extract_strided_slice %371 {offsets = [0, 32], sizes = [2, 16], strides = [1, 1]} : vector<2x48xf32> to vector<2x16xf32>
    %375 = arith.index_cast %c3_i32 : i32 to index
    %c0_85 = arith.constant 0 : index
    %c0_86 = arith.constant 0 : index
    %376 = vector.load %arg1[%375, %c0_85, %c0_86] : memref<8x2x16xf32, #tpu.memory_space<vmem>>, vector<1x2x16xf32>
    %377 = vector.shape_cast %376 : vector<1x2x16xf32> to vector<2x16xf32>
    %378 = arith.subf %374, %377 : vector<2x16xf32>
    %379 = arith.mulf %378, %378 : vector<2x16xf32>
    %380 = arith.addf %292, %379 : vector<2x16xf32>
    %c4_i32 = arith.constant 4 : i32
    %381 = tpu.concatenate %373, %369 in 1 : vector<2x32xf32>, vector<2x32xf32> -> vector<2x64xf32>
    %cst_87 = arith.constant dense<0.000000e+00> : vector<2x128xf32>
    %382 = tpu.matmul %381, %8, %cst_87 {dimension_numbers = #tpu.dot_dimension_numbers<[1], [0], [0], [1], [0, 0, 1, 1], [], []>} : vector<2x64xf32>, vector<64x128xf32>, vector<2x128xf32> -> vector<2x128xf32>
    %383 = arith.addf %382, %14 : vector<2x128xf32>
    %384 = vector.extract_strided_slice %383 {offsets = [0, 0], sizes = [2, 32], strides = [1, 1]} : vector<2x128xf32> to vector<2x32xf32>
    %385 = arith.negf %384 : vector<2x32xf32>
    %386 = math.exp %385 : vector<2x32xf32>
    %cst_88 = arith.constant 1.000000e+00 : f32
    %387 = vector.broadcast %cst_88 : f32 to vector<2x32xf32>
    %388 = arith.addf %387, %386 : vector<2x32xf32>
    %389 = arith.divf %387, %388 : vector<2x32xf32>
    %390 = vector.extract_strided_slice %383 {offsets = [0, 32], sizes = [2, 32], strides = [1, 1]} : vector<2x128xf32> to vector<2x32xf32>
    %391 = arith.negf %390 : vector<2x32xf32>
    %392 = math.exp %391 : vector<2x32xf32>
    %cst_89 = arith.constant 1.000000e+00 : f32
    %393 = vector.broadcast %cst_89 : f32 to vector<2x32xf32>
    %394 = arith.addf %393, %392 : vector<2x32xf32>
    %395 = arith.divf %393, %394 : vector<2x32xf32>
    %396 = vector.extract_strided_slice %383 {offsets = [0, 64], sizes = [2, 32], strides = [1, 1]} : vector<2x128xf32> to vector<2x32xf32>
    %397 = vector.extract_strided_slice %383 {offsets = [0, 96], sizes = [2, 32], strides = [1, 1]} : vector<2x128xf32> to vector<2x32xf32>
    %398 = arith.mulf %389, %397 : vector<2x32xf32>
    %399 = arith.addf %396, %398 : vector<2x32xf32>
    %400 = math.tanh %399 : vector<2x32xf32>
    %cst_90 = arith.constant 1.000000e+00 : f32
    %401 = vector.broadcast %cst_90 : f32 to vector<2x32xf32>
    %402 = arith.subf %401, %395 : vector<2x32xf32>
    %403 = arith.mulf %402, %400 : vector<2x32xf32>
    %404 = arith.mulf %395, %369 : vector<2x32xf32>
    %405 = arith.addf %403, %404 : vector<2x32xf32>
    %cst_91 = arith.constant dense<0.000000e+00> : vector<2x128xf32>
    %406 = tpu.matmul %405, %9, %cst_91 {dimension_numbers = #tpu.dot_dimension_numbers<[1], [0], [0], [1], [0, 0, 1, 1], [], []>} : vector<2x32xf32>, vector<32x128xf32>, vector<2x128xf32> -> vector<2x128xf32>
    %407 = arith.addf %406, %17 : vector<2x128xf32>
    %408 = vector.extract_strided_slice %407 {offsets = [0, 0], sizes = [2, 32], strides = [1, 1]} : vector<2x128xf32> to vector<2x32xf32>
    %409 = vector.extract_strided_slice %407 {offsets = [0, 32], sizes = [2, 96], strides = [1, 1]} : vector<2x128xf32> to vector<2x96xf32>
    %410 = vector.shape_cast %408 : vector<2x32xf32> to vector<2x1x32xf32>
    %411 = vector.broadcast %410 : vector<2x1x32xf32> to vector<2x8x32xf32>
    %412 = arith.addf %4, %411 : vector<2x8x32xf32>
    %413 = math.tanh %412 : vector<2x8x32xf32>
    %414 = vector.shape_cast %11 : vector<1x32xf32> to vector<1x1x32xf32>
    %415 = vector.broadcast %414 : vector<1x1x32xf32> to vector<2x8x32xf32>
    %416 = arith.mulf %413, %415 : vector<2x8x32xf32>
    %cst_92 = arith.constant dense<0.000000e+00> : vector<2x8xf32>
    %417 = vector.multi_reduction <add>, %416, %cst_92 [2] : vector<2x8x32xf32> to vector<2x8xf32>
    %cst_93 = arith.constant dense<0xFF800000> : vector<2xf32>
    %418 = vector.multi_reduction <maximumf>, %417, %cst_93 [1] : vector<2x8xf32> to vector<2xf32>
    %419 = vector.shape_cast %418 : vector<2xf32> to vector<2x1xf32>
    %420 = vector.broadcast %419 : vector<2x1xf32> to vector<2x8xf32>
    %421 = arith.subf %417, %420 : vector<2x8xf32>
    %422 = math.exp %421 : vector<2x8xf32>
    %cst_94 = arith.constant dense<0.000000e+00> : vector<2xf32>
    %423 = vector.multi_reduction <add>, %422, %cst_94 [1] : vector<2x8xf32> to vector<2xf32>
    %424 = vector.shape_cast %423 : vector<2xf32> to vector<2x1xf32>
    %425 = vector.broadcast %424 : vector<2x1xf32> to vector<2x8xf32>
    %426 = arith.divf %422, %425 : vector<2x8xf32>
    %427 = vector.shape_cast %426 : vector<2x8xf32> to vector<2x8x1xf32>
    %428 = vector.broadcast %427 : vector<2x8x1xf32> to vector<2x8x96xf32>
    %429 = arith.mulf %428, %7 : vector<2x8x96xf32>
    %cst_95 = arith.constant dense<0.000000e+00> : vector<2x96xf32>
    %430 = vector.multi_reduction <add>, %429, %cst_95 [1] : vector<2x8x96xf32> to vector<2x96xf32>
    %431 = arith.addf %430, %23 : vector<2x96xf32>
    %432 = vector.extract_strided_slice %431 {offsets = [0, 0], sizes = [2, 32], strides = [1, 1]} : vector<2x96xf32> to vector<2x32xf32>
    %433 = vector.extract_strided_slice %409 {offsets = [0, 0], sizes = [2, 32], strides = [1, 1]} : vector<2x96xf32> to vector<2x32xf32>
    %434 = arith.addf %432, %433 : vector<2x32xf32>
    %435 = arith.negf %434 : vector<2x32xf32>
    %436 = math.exp %435 : vector<2x32xf32>
    %cst_96 = arith.constant 1.000000e+00 : f32
    %437 = vector.broadcast %cst_96 : f32 to vector<2x32xf32>
    %438 = arith.addf %437, %436 : vector<2x32xf32>
    %439 = arith.divf %437, %438 : vector<2x32xf32>
    %440 = vector.extract_strided_slice %431 {offsets = [0, 32], sizes = [2, 32], strides = [1, 1]} : vector<2x96xf32> to vector<2x32xf32>
    %441 = vector.extract_strided_slice %409 {offsets = [0, 32], sizes = [2, 32], strides = [1, 1]} : vector<2x96xf32> to vector<2x32xf32>
    %442 = arith.addf %440, %441 : vector<2x32xf32>
    %443 = arith.negf %442 : vector<2x32xf32>
    %444 = math.exp %443 : vector<2x32xf32>
    %cst_97 = arith.constant 1.000000e+00 : f32
    %445 = vector.broadcast %cst_97 : f32 to vector<2x32xf32>
    %446 = arith.addf %445, %444 : vector<2x32xf32>
    %447 = arith.divf %445, %446 : vector<2x32xf32>
    %448 = vector.extract_strided_slice %431 {offsets = [0, 64], sizes = [2, 32], strides = [1, 1]} : vector<2x96xf32> to vector<2x32xf32>
    %449 = vector.extract_strided_slice %409 {offsets = [0, 64], sizes = [2, 32], strides = [1, 1]} : vector<2x96xf32> to vector<2x32xf32>
    %450 = arith.mulf %439, %449 : vector<2x32xf32>
    %451 = arith.addf %448, %450 : vector<2x32xf32>
    %452 = math.tanh %451 : vector<2x32xf32>
    %cst_98 = arith.constant 1.000000e+00 : f32
    %453 = vector.broadcast %cst_98 : f32 to vector<2x32xf32>
    %454 = arith.subf %453, %447 : vector<2x32xf32>
    %455 = arith.mulf %454, %452 : vector<2x32xf32>
    %456 = arith.mulf %447, %405 : vector<2x32xf32>
    %457 = arith.addf %455, %456 : vector<2x32xf32>
    %cst_99 = arith.constant dense<0.000000e+00> : vector<2x48xf32>
    %458 = tpu.matmul %457, %10, %cst_99 {dimension_numbers = #tpu.dot_dimension_numbers<[1], [0], [0], [1], [0, 0, 1, 1], [], []>} : vector<2x32xf32>, vector<32x48xf32>, vector<2x48xf32> -> vector<2x48xf32>
    %459 = arith.addf %458, %20 : vector<2x48xf32>
    %460 = vector.extract_strided_slice %459 {offsets = [0, 0], sizes = [2, 32], strides = [1, 1]} : vector<2x48xf32> to vector<2x32xf32>
    %461 = math.tanh %460 : vector<2x32xf32>
    %462 = vector.extract_strided_slice %459 {offsets = [0, 32], sizes = [2, 16], strides = [1, 1]} : vector<2x48xf32> to vector<2x16xf32>
    %463 = arith.index_cast %c4_i32 : i32 to index
    %c0_100 = arith.constant 0 : index
    %c0_101 = arith.constant 0 : index
    %464 = vector.load %arg1[%463, %c0_100, %c0_101] : memref<8x2x16xf32, #tpu.memory_space<vmem>>, vector<1x2x16xf32>
    %465 = vector.shape_cast %464 : vector<1x2x16xf32> to vector<2x16xf32>
    %466 = arith.subf %462, %465 : vector<2x16xf32>
    %467 = arith.mulf %466, %466 : vector<2x16xf32>
    %468 = arith.addf %380, %467 : vector<2x16xf32>
    %c5_i32 = arith.constant 5 : i32
    %469 = tpu.concatenate %461, %457 in 1 : vector<2x32xf32>, vector<2x32xf32> -> vector<2x64xf32>
    %cst_102 = arith.constant dense<0.000000e+00> : vector<2x128xf32>
    %470 = tpu.matmul %469, %8, %cst_102 {dimension_numbers = #tpu.dot_dimension_numbers<[1], [0], [0], [1], [0, 0, 1, 1], [], []>} : vector<2x64xf32>, vector<64x128xf32>, vector<2x128xf32> -> vector<2x128xf32>
    %471 = arith.addf %470, %14 : vector<2x128xf32>
    %472 = vector.extract_strided_slice %471 {offsets = [0, 0], sizes = [2, 32], strides = [1, 1]} : vector<2x128xf32> to vector<2x32xf32>
    %473 = arith.negf %472 : vector<2x32xf32>
    %474 = math.exp %473 : vector<2x32xf32>
    %cst_103 = arith.constant 1.000000e+00 : f32
    %475 = vector.broadcast %cst_103 : f32 to vector<2x32xf32>
    %476 = arith.addf %475, %474 : vector<2x32xf32>
    %477 = arith.divf %475, %476 : vector<2x32xf32>
    %478 = vector.extract_strided_slice %471 {offsets = [0, 32], sizes = [2, 32], strides = [1, 1]} : vector<2x128xf32> to vector<2x32xf32>
    %479 = arith.negf %478 : vector<2x32xf32>
    %480 = math.exp %479 : vector<2x32xf32>
    %cst_104 = arith.constant 1.000000e+00 : f32
    %481 = vector.broadcast %cst_104 : f32 to vector<2x32xf32>
    %482 = arith.addf %481, %480 : vector<2x32xf32>
    %483 = arith.divf %481, %482 : vector<2x32xf32>
    %484 = vector.extract_strided_slice %471 {offsets = [0, 64], sizes = [2, 32], strides = [1, 1]} : vector<2x128xf32> to vector<2x32xf32>
    %485 = vector.extract_strided_slice %471 {offsets = [0, 96], sizes = [2, 32], strides = [1, 1]} : vector<2x128xf32> to vector<2x32xf32>
    %486 = arith.mulf %477, %485 : vector<2x32xf32>
    %487 = arith.addf %484, %486 : vector<2x32xf32>
    %488 = math.tanh %487 : vector<2x32xf32>
    %cst_105 = arith.constant 1.000000e+00 : f32
    %489 = vector.broadcast %cst_105 : f32 to vector<2x32xf32>
    %490 = arith.subf %489, %483 : vector<2x32xf32>
    %491 = arith.mulf %490, %488 : vector<2x32xf32>
    %492 = arith.mulf %483, %457 : vector<2x32xf32>
    %493 = arith.addf %491, %492 : vector<2x32xf32>
    %cst_106 = arith.constant dense<0.000000e+00> : vector<2x128xf32>
    %494 = tpu.matmul %493, %9, %cst_106 {dimension_numbers = #tpu.dot_dimension_numbers<[1], [0], [0], [1], [0, 0, 1, 1], [], []>} : vector<2x32xf32>, vector<32x128xf32>, vector<2x128xf32> -> vector<2x128xf32>
    %495 = arith.addf %494, %17 : vector<2x128xf32>
    %496 = vector.extract_strided_slice %495 {offsets = [0, 0], sizes = [2, 32], strides = [1, 1]} : vector<2x128xf32> to vector<2x32xf32>
    %497 = vector.extract_strided_slice %495 {offsets = [0, 32], sizes = [2, 96], strides = [1, 1]} : vector<2x128xf32> to vector<2x96xf32>
    %498 = vector.shape_cast %496 : vector<2x32xf32> to vector<2x1x32xf32>
    %499 = vector.broadcast %498 : vector<2x1x32xf32> to vector<2x8x32xf32>
    %500 = arith.addf %4, %499 : vector<2x8x32xf32>
    %501 = math.tanh %500 : vector<2x8x32xf32>
    %502 = vector.shape_cast %11 : vector<1x32xf32> to vector<1x1x32xf32>
    %503 = vector.broadcast %502 : vector<1x1x32xf32> to vector<2x8x32xf32>
    %504 = arith.mulf %501, %503 : vector<2x8x32xf32>
    %cst_107 = arith.constant dense<0.000000e+00> : vector<2x8xf32>
    %505 = vector.multi_reduction <add>, %504, %cst_107 [2] : vector<2x8x32xf32> to vector<2x8xf32>
    %cst_108 = arith.constant dense<0xFF800000> : vector<2xf32>
    %506 = vector.multi_reduction <maximumf>, %505, %cst_108 [1] : vector<2x8xf32> to vector<2xf32>
    %507 = vector.shape_cast %506 : vector<2xf32> to vector<2x1xf32>
    %508 = vector.broadcast %507 : vector<2x1xf32> to vector<2x8xf32>
    %509 = arith.subf %505, %508 : vector<2x8xf32>
    %510 = math.exp %509 : vector<2x8xf32>
    %cst_109 = arith.constant dense<0.000000e+00> : vector<2xf32>
    %511 = vector.multi_reduction <add>, %510, %cst_109 [1] : vector<2x8xf32> to vector<2xf32>
    %512 = vector.shape_cast %511 : vector<2xf32> to vector<2x1xf32>
    %513 = vector.broadcast %512 : vector<2x1xf32> to vector<2x8xf32>
    %514 = arith.divf %510, %513 : vector<2x8xf32>
    %515 = vector.shape_cast %514 : vector<2x8xf32> to vector<2x8x1xf32>
    %516 = vector.broadcast %515 : vector<2x8x1xf32> to vector<2x8x96xf32>
    %517 = arith.mulf %516, %7 : vector<2x8x96xf32>
    %cst_110 = arith.constant dense<0.000000e+00> : vector<2x96xf32>
    %518 = vector.multi_reduction <add>, %517, %cst_110 [1] : vector<2x8x96xf32> to vector<2x96xf32>
    %519 = arith.addf %518, %23 : vector<2x96xf32>
    %520 = vector.extract_strided_slice %519 {offsets = [0, 0], sizes = [2, 32], strides = [1, 1]} : vector<2x96xf32> to vector<2x32xf32>
    %521 = vector.extract_strided_slice %497 {offsets = [0, 0], sizes = [2, 32], strides = [1, 1]} : vector<2x96xf32> to vector<2x32xf32>
    %522 = arith.addf %520, %521 : vector<2x32xf32>
    %523 = arith.negf %522 : vector<2x32xf32>
    %524 = math.exp %523 : vector<2x32xf32>
    %cst_111 = arith.constant 1.000000e+00 : f32
    %525 = vector.broadcast %cst_111 : f32 to vector<2x32xf32>
    %526 = arith.addf %525, %524 : vector<2x32xf32>
    %527 = arith.divf %525, %526 : vector<2x32xf32>
    %528 = vector.extract_strided_slice %519 {offsets = [0, 32], sizes = [2, 32], strides = [1, 1]} : vector<2x96xf32> to vector<2x32xf32>
    %529 = vector.extract_strided_slice %497 {offsets = [0, 32], sizes = [2, 32], strides = [1, 1]} : vector<2x96xf32> to vector<2x32xf32>
    %530 = arith.addf %528, %529 : vector<2x32xf32>
    %531 = arith.negf %530 : vector<2x32xf32>
    %532 = math.exp %531 : vector<2x32xf32>
    %cst_112 = arith.constant 1.000000e+00 : f32
    %533 = vector.broadcast %cst_112 : f32 to vector<2x32xf32>
    %534 = arith.addf %533, %532 : vector<2x32xf32>
    %535 = arith.divf %533, %534 : vector<2x32xf32>
    %536 = vector.extract_strided_slice %519 {offsets = [0, 64], sizes = [2, 32], strides = [1, 1]} : vector<2x96xf32> to vector<2x32xf32>
    %537 = vector.extract_strided_slice %497 {offsets = [0, 64], sizes = [2, 32], strides = [1, 1]} : vector<2x96xf32> to vector<2x32xf32>
    %538 = arith.mulf %527, %537 : vector<2x32xf32>
    %539 = arith.addf %536, %538 : vector<2x32xf32>
    %540 = math.tanh %539 : vector<2x32xf32>
    %cst_113 = arith.constant 1.000000e+00 : f32
    %541 = vector.broadcast %cst_113 : f32 to vector<2x32xf32>
    %542 = arith.subf %541, %535 : vector<2x32xf32>
    %543 = arith.mulf %542, %540 : vector<2x32xf32>
    %544 = arith.mulf %535, %493 : vector<2x32xf32>
    %545 = arith.addf %543, %544 : vector<2x32xf32>
    %cst_114 = arith.constant dense<0.000000e+00> : vector<2x48xf32>
    %546 = tpu.matmul %545, %10, %cst_114 {dimension_numbers = #tpu.dot_dimension_numbers<[1], [0], [0], [1], [0, 0, 1, 1], [], []>} : vector<2x32xf32>, vector<32x48xf32>, vector<2x48xf32> -> vector<2x48xf32>
    %547 = arith.addf %546, %20 : vector<2x48xf32>
    %548 = vector.extract_strided_slice %547 {offsets = [0, 0], sizes = [2, 32], strides = [1, 1]} : vector<2x48xf32> to vector<2x32xf32>
    %549 = math.tanh %548 : vector<2x32xf32>
    %550 = vector.extract_strided_slice %547 {offsets = [0, 32], sizes = [2, 16], strides = [1, 1]} : vector<2x48xf32> to vector<2x16xf32>
    %551 = arith.index_cast %c5_i32 : i32 to index
    %c0_115 = arith.constant 0 : index
    %c0_116 = arith.constant 0 : index
    %552 = vector.load %arg1[%551, %c0_115, %c0_116] : memref<8x2x16xf32, #tpu.memory_space<vmem>>, vector<1x2x16xf32>
    %553 = vector.shape_cast %552 : vector<1x2x16xf32> to vector<2x16xf32>
    %554 = arith.subf %550, %553 : vector<2x16xf32>
    %555 = arith.mulf %554, %554 : vector<2x16xf32>
    %556 = arith.addf %468, %555 : vector<2x16xf32>
    %c6_i32 = arith.constant 6 : i32
    %557 = tpu.concatenate %549, %545 in 1 : vector<2x32xf32>, vector<2x32xf32> -> vector<2x64xf32>
    %cst_117 = arith.constant dense<0.000000e+00> : vector<2x128xf32>
    %558 = tpu.matmul %557, %8, %cst_117 {dimension_numbers = #tpu.dot_dimension_numbers<[1], [0], [0], [1], [0, 0, 1, 1], [], []>} : vector<2x64xf32>, vector<64x128xf32>, vector<2x128xf32> -> vector<2x128xf32>
    %559 = arith.addf %558, %14 : vector<2x128xf32>
    %560 = vector.extract_strided_slice %559 {offsets = [0, 0], sizes = [2, 32], strides = [1, 1]} : vector<2x128xf32> to vector<2x32xf32>
    %561 = arith.negf %560 : vector<2x32xf32>
    %562 = math.exp %561 : vector<2x32xf32>
    %cst_118 = arith.constant 1.000000e+00 : f32
    %563 = vector.broadcast %cst_118 : f32 to vector<2x32xf32>
    %564 = arith.addf %563, %562 : vector<2x32xf32>
    %565 = arith.divf %563, %564 : vector<2x32xf32>
    %566 = vector.extract_strided_slice %559 {offsets = [0, 32], sizes = [2, 32], strides = [1, 1]} : vector<2x128xf32> to vector<2x32xf32>
    %567 = arith.negf %566 : vector<2x32xf32>
    %568 = math.exp %567 : vector<2x32xf32>
    %cst_119 = arith.constant 1.000000e+00 : f32
    %569 = vector.broadcast %cst_119 : f32 to vector<2x32xf32>
    %570 = arith.addf %569, %568 : vector<2x32xf32>
    %571 = arith.divf %569, %570 : vector<2x32xf32>
    %572 = vector.extract_strided_slice %559 {offsets = [0, 64], sizes = [2, 32], strides = [1, 1]} : vector<2x128xf32> to vector<2x32xf32>
    %573 = vector.extract_strided_slice %559 {offsets = [0, 96], sizes = [2, 32], strides = [1, 1]} : vector<2x128xf32> to vector<2x32xf32>
    %574 = arith.mulf %565, %573 : vector<2x32xf32>
    %575 = arith.addf %572, %574 : vector<2x32xf32>
    %576 = math.tanh %575 : vector<2x32xf32>
    %cst_120 = arith.constant 1.000000e+00 : f32
    %577 = vector.broadcast %cst_120 : f32 to vector<2x32xf32>
    %578 = arith.subf %577, %571 : vector<2x32xf32>
    %579 = arith.mulf %578, %576 : vector<2x32xf32>
    %580 = arith.mulf %571, %545 : vector<2x32xf32>
    %581 = arith.addf %579, %580 : vector<2x32xf32>
    %cst_121 = arith.constant dense<0.000000e+00> : vector<2x128xf32>
    %582 = tpu.matmul %581, %9, %cst_121 {dimension_numbers = #tpu.dot_dimension_numbers<[1], [0], [0], [1], [0, 0, 1, 1], [], []>} : vector<2x32xf32>, vector<32x128xf32>, vector<2x128xf32> -> vector<2x128xf32>
    %583 = arith.addf %582, %17 : vector<2x128xf32>
    %584 = vector.extract_strided_slice %583 {offsets = [0, 0], sizes = [2, 32], strides = [1, 1]} : vector<2x128xf32> to vector<2x32xf32>
    %585 = vector.extract_strided_slice %583 {offsets = [0, 32], sizes = [2, 96], strides = [1, 1]} : vector<2x128xf32> to vector<2x96xf32>
    %586 = vector.shape_cast %584 : vector<2x32xf32> to vector<2x1x32xf32>
    %587 = vector.broadcast %586 : vector<2x1x32xf32> to vector<2x8x32xf32>
    %588 = arith.addf %4, %587 : vector<2x8x32xf32>
    %589 = math.tanh %588 : vector<2x8x32xf32>
    %590 = vector.shape_cast %11 : vector<1x32xf32> to vector<1x1x32xf32>
    %591 = vector.broadcast %590 : vector<1x1x32xf32> to vector<2x8x32xf32>
    %592 = arith.mulf %589, %591 : vector<2x8x32xf32>
    %cst_122 = arith.constant dense<0.000000e+00> : vector<2x8xf32>
    %593 = vector.multi_reduction <add>, %592, %cst_122 [2] : vector<2x8x32xf32> to vector<2x8xf32>
    %cst_123 = arith.constant dense<0xFF800000> : vector<2xf32>
    %594 = vector.multi_reduction <maximumf>, %593, %cst_123 [1] : vector<2x8xf32> to vector<2xf32>
    %595 = vector.shape_cast %594 : vector<2xf32> to vector<2x1xf32>
    %596 = vector.broadcast %595 : vector<2x1xf32> to vector<2x8xf32>
    %597 = arith.subf %593, %596 : vector<2x8xf32>
    %598 = math.exp %597 : vector<2x8xf32>
    %cst_124 = arith.constant dense<0.000000e+00> : vector<2xf32>
    %599 = vector.multi_reduction <add>, %598, %cst_124 [1] : vector<2x8xf32> to vector<2xf32>
    %600 = vector.shape_cast %599 : vector<2xf32> to vector<2x1xf32>
    %601 = vector.broadcast %600 : vector<2x1xf32> to vector<2x8xf32>
    %602 = arith.divf %598, %601 : vector<2x8xf32>
    %603 = vector.shape_cast %602 : vector<2x8xf32> to vector<2x8x1xf32>
    %604 = vector.broadcast %603 : vector<2x8x1xf32> to vector<2x8x96xf32>
    %605 = arith.mulf %604, %7 : vector<2x8x96xf32>
    %cst_125 = arith.constant dense<0.000000e+00> : vector<2x96xf32>
    %606 = vector.multi_reduction <add>, %605, %cst_125 [1] : vector<2x8x96xf32> to vector<2x96xf32>
    %607 = arith.addf %606, %23 : vector<2x96xf32>
    %608 = vector.extract_strided_slice %607 {offsets = [0, 0], sizes = [2, 32], strides = [1, 1]} : vector<2x96xf32> to vector<2x32xf32>
    %609 = vector.extract_strided_slice %585 {offsets = [0, 0], sizes = [2, 32], strides = [1, 1]} : vector<2x96xf32> to vector<2x32xf32>
    %610 = arith.addf %608, %609 : vector<2x32xf32>
    %611 = arith.negf %610 : vector<2x32xf32>
    %612 = math.exp %611 : vector<2x32xf32>
    %cst_126 = arith.constant 1.000000e+00 : f32
    %613 = vector.broadcast %cst_126 : f32 to vector<2x32xf32>
    %614 = arith.addf %613, %612 : vector<2x32xf32>
    %615 = arith.divf %613, %614 : vector<2x32xf32>
    %616 = vector.extract_strided_slice %607 {offsets = [0, 32], sizes = [2, 32], strides = [1, 1]} : vector<2x96xf32> to vector<2x32xf32>
    %617 = vector.extract_strided_slice %585 {offsets = [0, 32], sizes = [2, 32], strides = [1, 1]} : vector<2x96xf32> to vector<2x32xf32>
    %618 = arith.addf %616, %617 : vector<2x32xf32>
    %619 = arith.negf %618 : vector<2x32xf32>
    %620 = math.exp %619 : vector<2x32xf32>
    %cst_127 = arith.constant 1.000000e+00 : f32
    %621 = vector.broadcast %cst_127 : f32 to vector<2x32xf32>
    %622 = arith.addf %621, %620 : vector<2x32xf32>
    %623 = arith.divf %621, %622 : vector<2x32xf32>
    %624 = vector.extract_strided_slice %607 {offsets = [0, 64], sizes = [2, 32], strides = [1, 1]} : vector<2x96xf32> to vector<2x32xf32>
    %625 = vector.extract_strided_slice %585 {offsets = [0, 64], sizes = [2, 32], strides = [1, 1]} : vector<2x96xf32> to vector<2x32xf32>
    %626 = arith.mulf %615, %625 : vector<2x32xf32>
    %627 = arith.addf %624, %626 : vector<2x32xf32>
    %628 = math.tanh %627 : vector<2x32xf32>
    %cst_128 = arith.constant 1.000000e+00 : f32
    %629 = vector.broadcast %cst_128 : f32 to vector<2x32xf32>
    %630 = arith.subf %629, %623 : vector<2x32xf32>
    %631 = arith.mulf %630, %628 : vector<2x32xf32>
    %632 = arith.mulf %623, %581 : vector<2x32xf32>
    %633 = arith.addf %631, %632 : vector<2x32xf32>
    %cst_129 = arith.constant dense<0.000000e+00> : vector<2x48xf32>
    %634 = tpu.matmul %633, %10, %cst_129 {dimension_numbers = #tpu.dot_dimension_numbers<[1], [0], [0], [1], [0, 0, 1, 1], [], []>} : vector<2x32xf32>, vector<32x48xf32>, vector<2x48xf32> -> vector<2x48xf32>
    %635 = arith.addf %634, %20 : vector<2x48xf32>
    %636 = vector.extract_strided_slice %635 {offsets = [0, 0], sizes = [2, 32], strides = [1, 1]} : vector<2x48xf32> to vector<2x32xf32>
    %637 = math.tanh %636 : vector<2x32xf32>
    %638 = vector.extract_strided_slice %635 {offsets = [0, 32], sizes = [2, 16], strides = [1, 1]} : vector<2x48xf32> to vector<2x16xf32>
    %639 = arith.index_cast %c6_i32 : i32 to index
    %c0_130 = arith.constant 0 : index
    %c0_131 = arith.constant 0 : index
    %640 = vector.load %arg1[%639, %c0_130, %c0_131] : memref<8x2x16xf32, #tpu.memory_space<vmem>>, vector<1x2x16xf32>
    %641 = vector.shape_cast %640 : vector<1x2x16xf32> to vector<2x16xf32>
    %642 = arith.subf %638, %641 : vector<2x16xf32>
    %643 = arith.mulf %642, %642 : vector<2x16xf32>
    %644 = arith.addf %556, %643 : vector<2x16xf32>
    %c7_i32 = arith.constant 7 : i32
    %645 = tpu.concatenate %637, %633 in 1 : vector<2x32xf32>, vector<2x32xf32> -> vector<2x64xf32>
    %cst_132 = arith.constant dense<0.000000e+00> : vector<2x128xf32>
    %646 = tpu.matmul %645, %8, %cst_132 {dimension_numbers = #tpu.dot_dimension_numbers<[1], [0], [0], [1], [0, 0, 1, 1], [], []>} : vector<2x64xf32>, vector<64x128xf32>, vector<2x128xf32> -> vector<2x128xf32>
    %647 = arith.addf %646, %14 : vector<2x128xf32>
    %648 = vector.extract_strided_slice %647 {offsets = [0, 0], sizes = [2, 32], strides = [1, 1]} : vector<2x128xf32> to vector<2x32xf32>
    %649 = arith.negf %648 : vector<2x32xf32>
    %650 = math.exp %649 : vector<2x32xf32>
    %cst_133 = arith.constant 1.000000e+00 : f32
    %651 = vector.broadcast %cst_133 : f32 to vector<2x32xf32>
    %652 = arith.addf %651, %650 : vector<2x32xf32>
    %653 = arith.divf %651, %652 : vector<2x32xf32>
    %654 = vector.extract_strided_slice %647 {offsets = [0, 32], sizes = [2, 32], strides = [1, 1]} : vector<2x128xf32> to vector<2x32xf32>
    %655 = arith.negf %654 : vector<2x32xf32>
    %656 = math.exp %655 : vector<2x32xf32>
    %cst_134 = arith.constant 1.000000e+00 : f32
    %657 = vector.broadcast %cst_134 : f32 to vector<2x32xf32>
    %658 = arith.addf %657, %656 : vector<2x32xf32>
    %659 = arith.divf %657, %658 : vector<2x32xf32>
    %660 = vector.extract_strided_slice %647 {offsets = [0, 64], sizes = [2, 32], strides = [1, 1]} : vector<2x128xf32> to vector<2x32xf32>
    %661 = vector.extract_strided_slice %647 {offsets = [0, 96], sizes = [2, 32], strides = [1, 1]} : vector<2x128xf32> to vector<2x32xf32>
    %662 = arith.mulf %653, %661 : vector<2x32xf32>
    %663 = arith.addf %660, %662 : vector<2x32xf32>
    %664 = math.tanh %663 : vector<2x32xf32>
    %cst_135 = arith.constant 1.000000e+00 : f32
    %665 = vector.broadcast %cst_135 : f32 to vector<2x32xf32>
    %666 = arith.subf %665, %659 : vector<2x32xf32>
    %667 = arith.mulf %666, %664 : vector<2x32xf32>
    %668 = arith.mulf %659, %633 : vector<2x32xf32>
    %669 = arith.addf %667, %668 : vector<2x32xf32>
    %cst_136 = arith.constant dense<0.000000e+00> : vector<2x128xf32>
    %670 = tpu.matmul %669, %9, %cst_136 {dimension_numbers = #tpu.dot_dimension_numbers<[1], [0], [0], [1], [0, 0, 1, 1], [], []>} : vector<2x32xf32>, vector<32x128xf32>, vector<2x128xf32> -> vector<2x128xf32>
    %671 = arith.addf %670, %17 : vector<2x128xf32>
    %672 = vector.extract_strided_slice %671 {offsets = [0, 0], sizes = [2, 32], strides = [1, 1]} : vector<2x128xf32> to vector<2x32xf32>
    %673 = vector.extract_strided_slice %671 {offsets = [0, 32], sizes = [2, 96], strides = [1, 1]} : vector<2x128xf32> to vector<2x96xf32>
    %674 = vector.shape_cast %672 : vector<2x32xf32> to vector<2x1x32xf32>
    %675 = vector.broadcast %674 : vector<2x1x32xf32> to vector<2x8x32xf32>
    %676 = arith.addf %4, %675 : vector<2x8x32xf32>
    %677 = math.tanh %676 : vector<2x8x32xf32>
    %678 = vector.shape_cast %11 : vector<1x32xf32> to vector<1x1x32xf32>
    %679 = vector.broadcast %678 : vector<1x1x32xf32> to vector<2x8x32xf32>
    %680 = arith.mulf %677, %679 : vector<2x8x32xf32>
    %cst_137 = arith.constant dense<0.000000e+00> : vector<2x8xf32>
    %681 = vector.multi_reduction <add>, %680, %cst_137 [2] : vector<2x8x32xf32> to vector<2x8xf32>
    %cst_138 = arith.constant dense<0xFF800000> : vector<2xf32>
    %682 = vector.multi_reduction <maximumf>, %681, %cst_138 [1] : vector<2x8xf32> to vector<2xf32>
    %683 = vector.shape_cast %682 : vector<2xf32> to vector<2x1xf32>
    %684 = vector.broadcast %683 : vector<2x1xf32> to vector<2x8xf32>
    %685 = arith.subf %681, %684 : vector<2x8xf32>
    %686 = math.exp %685 : vector<2x8xf32>
    %cst_139 = arith.constant dense<0.000000e+00> : vector<2xf32>
    %687 = vector.multi_reduction <add>, %686, %cst_139 [1] : vector<2x8xf32> to vector<2xf32>
    %688 = vector.shape_cast %687 : vector<2xf32> to vector<2x1xf32>
    %689 = vector.broadcast %688 : vector<2x1xf32> to vector<2x8xf32>
    %690 = arith.divf %686, %689 : vector<2x8xf32>
    %691 = vector.shape_cast %690 : vector<2x8xf32> to vector<2x8x1xf32>
    %692 = vector.broadcast %691 : vector<2x8x1xf32> to vector<2x8x96xf32>
    %693 = arith.mulf %692, %7 : vector<2x8x96xf32>
    %cst_140 = arith.constant dense<0.000000e+00> : vector<2x96xf32>
    %694 = vector.multi_reduction <add>, %693, %cst_140 [1] : vector<2x8x96xf32> to vector<2x96xf32>
    %695 = arith.addf %694, %23 : vector<2x96xf32>
    %696 = vector.extract_strided_slice %695 {offsets = [0, 0], sizes = [2, 32], strides = [1, 1]} : vector<2x96xf32> to vector<2x32xf32>
    %697 = vector.extract_strided_slice %673 {offsets = [0, 0], sizes = [2, 32], strides = [1, 1]} : vector<2x96xf32> to vector<2x32xf32>
    %698 = arith.addf %696, %697 : vector<2x32xf32>
    %699 = arith.negf %698 : vector<2x32xf32>
    %700 = math.exp %699 : vector<2x32xf32>
    %cst_141 = arith.constant 1.000000e+00 : f32
    %701 = vector.broadcast %cst_141 : f32 to vector<2x32xf32>
    %702 = arith.addf %701, %700 : vector<2x32xf32>
    %703 = arith.divf %701, %702 : vector<2x32xf32>
    %704 = vector.extract_strided_slice %695 {offsets = [0, 32], sizes = [2, 32], strides = [1, 1]} : vector<2x96xf32> to vector<2x32xf32>
    %705 = vector.extract_strided_slice %673 {offsets = [0, 32], sizes = [2, 32], strides = [1, 1]} : vector<2x96xf32> to vector<2x32xf32>
    %706 = arith.addf %704, %705 : vector<2x32xf32>
    %707 = arith.negf %706 : vector<2x32xf32>
    %708 = math.exp %707 : vector<2x32xf32>
    %cst_142 = arith.constant 1.000000e+00 : f32
    %709 = vector.broadcast %cst_142 : f32 to vector<2x32xf32>
    %710 = arith.addf %709, %708 : vector<2x32xf32>
    %711 = arith.divf %709, %710 : vector<2x32xf32>
    %712 = vector.extract_strided_slice %695 {offsets = [0, 64], sizes = [2, 32], strides = [1, 1]} : vector<2x96xf32> to vector<2x32xf32>
    %713 = vector.extract_strided_slice %673 {offsets = [0, 64], sizes = [2, 32], strides = [1, 1]} : vector<2x96xf32> to vector<2x32xf32>
    %714 = arith.mulf %703, %713 : vector<2x32xf32>
    %715 = arith.addf %712, %714 : vector<2x32xf32>
    %716 = math.tanh %715 : vector<2x32xf32>
    %cst_143 = arith.constant 1.000000e+00 : f32
    %717 = vector.broadcast %cst_143 : f32 to vector<2x32xf32>
    %718 = arith.subf %717, %711 : vector<2x32xf32>
    %719 = arith.mulf %718, %716 : vector<2x32xf32>
    %720 = arith.mulf %711, %669 : vector<2x32xf32>
    %721 = arith.addf %719, %720 : vector<2x32xf32>
    %cst_144 = arith.constant dense<0.000000e+00> : vector<2x48xf32>
    %722 = tpu.matmul %721, %10, %cst_144 {dimension_numbers = #tpu.dot_dimension_numbers<[1], [0], [0], [1], [0, 0, 1, 1], [], []>} : vector<2x32xf32>, vector<32x48xf32>, vector<2x48xf32> -> vector<2x48xf32>
    %723 = arith.addf %722, %20 : vector<2x48xf32>
    %724 = vector.extract_strided_slice %723 {offsets = [0, 0], sizes = [2, 32], strides = [1, 1]} : vector<2x48xf32> to vector<2x32xf32>
    %725 = math.tanh %724 : vector<2x32xf32>
    %726 = vector.extract_strided_slice %723 {offsets = [0, 32], sizes = [2, 16], strides = [1, 1]} : vector<2x48xf32> to vector<2x16xf32>
    %727 = arith.index_cast %c7_i32 : i32 to index
    %c0_145 = arith.constant 0 : index
    %c0_146 = arith.constant 0 : index
    %728 = vector.load %arg1[%727, %c0_145, %c0_146] : memref<8x2x16xf32, #tpu.memory_space<vmem>>, vector<1x2x16xf32>
    %729 = vector.shape_cast %728 : vector<1x2x16xf32> to vector<2x16xf32>
    %730 = arith.subf %726, %729 : vector<2x16xf32>
    %731 = arith.mulf %730, %730 : vector<2x16xf32>
    %732 = arith.addf %644, %731 : vector<2x16xf32>
    %c8_i32 = arith.constant 8 : i32
    %733 = vector.shape_cast %732 : vector<2x16xf32> to vector<1x2x16xf32>
    %cst_147 = arith.constant dense<0.000000e+00> : vector<1xf32>
    %734 = vector.multi_reduction <add>, %733, %cst_147 [1, 2] : vector<1x2x16xf32> to vector<1xf32>
    %735 = vector.shape_cast %734 : vector<1xf32> to vector<1x1x1xf32>
    %736 = vector.extract %735[0, 0, 0] : f32 from vector<1x1x1xf32>
    %737 = vector.broadcast %736 : f32 to vector<1x1xf32>
    %c0_148 = arith.constant 0 : index
    %c0_149 = arith.constant 0 : index
    %738 = vector.load %arg13[%c0_148, %c0_149] : memref<1x1xf32, #tpu.memory_space<vmem>>, vector<1x1xf32>
    tpu.vector_store %arg13[%c0_148, %c0_149], %737 {strides = array<i32>} : memref<1x1xf32, #tpu.memory_space<vmem>>, vector<1x1xf32>,
    return
  }
}

</mosaic_0001>

<bundles_post_ra>
// kernel: reverse_video_decoder_loss.1
= control target key start
LH: loop header
LB: loop body
LE: loop exit
PB: predicated region body
PF: predicated region fallthrough
CT: control target
= control target key end

     0   :  { %s4214_s0 = inlined_call_operand.vmem [shape: f32[2,8,32], index: 0, kind: input, shape index: {}]   ;;  %s4215_s1 = inlined_call_operand.vmem [shape: f32[8,2,16], index: 1, kind: input, shape index: {}]   ;;  %s4216_s2 = inlined_call_operand.vmem [shape: f32[32,32], index: 2, kind: input, shape index: {}]   ;;  %s4217_s3 = inlined_call_operand.vmem [shape: f32[32,96], index: 3, kind: input, shape index: {}]   ;;  %s4218_s4 = inlined_call_operand.vmem [shape: f32[64,128], index: 4, kind: input, shape index: {}]   ;;  %s4219_s5 = inlined_call_operand.vmem [shape: f32[1,128], index: 5, kind: input, shape index: {}]   ;;  %s4220_s6 = inlined_call_operand.vmem [shape: f32[32,128], index: 6, kind: input, shape index: {}]   ;;  %s4221_s7 = inlined_call_operand.vmem [shape: f32[1,128], index: 7, kind: input, shape index: {}]   ;;  %s4222_s8 = inlined_call_operand.vmem [shape: f32[1,96], index: 8, kind: input, shape index: {}]   ;;  %s4223_s9 = inlined_call_operand.vmem [shape: f32[1,32], index: 9, kind: input, shape index: {}]   ;;  %s4224_s10 = inlined_call_operand.vmem [shape: f32[32,48], index: 10, kind: input, shape index: {}]   ;;  %s4225_s11 = inlined_call_operand.vmem [shape: f32[1,48], index: 11, kind: input, shape index: {}]   ;;  %s4226_s12 = inlined_call_operand.vmem [shape: f32[1,32], index: 12, kind: input, shape index: {}]   ;;  %s4227_s13 = inlined_call_operand.hbm [shape: f32[1,1], index: 13, kind: output, shape index: {}]  }
   0x1   :  { %v3268_v0 = vld [vmem:[%s4218_s4 + $0x38] sm:$0xff]  ;;  %v3273_v1 = vld [vmem:[%s4218_s4 + $0x30] sm:$0xff]  ;;  %v3279_v2 = vld [vmem:[%s4218_s4 + $0x28] sm:$0xff] }
   0x2   :  { %158 = vmatpush.msra.mxu2 %v3268_v0  ;;  %v3285_v3 = vld [vmem:[%s4218_s4 + $0x20] sm:$0xff] }
   0x4   :  { %159 = vmatpush.msra.mxu2 %v3273_v1 }
   0x6   :  { %160 = vmatpush.msra.mxu2 %v3279_v2 }
   0x7   :  { %18 = vsyncpa [#allocation3], 0  ;;  %v3291_v4 = vld [vmem:[%s4218_s4 + $0x18] sm:$0xff]  ;;  %v3297_v5 = vld [vmem:[%s4218_s4 + $0x10] sm:$0xff]  ;;  %vm51_vm0 = vcmask 261120   ;;  %vm146_vm1 = vcmask 523264  }
   0x8   :  { %161 = vmatpush.msra.mxu2 %v3285_v3  ;;  %v2870_v6 = vld [vmem:[%s4226_s12] ss:$0 sm:$0xff]  ;;  %v3306_v7 = vld [vmem:[%s4218_s4 + $0x8] sm:$0xff]  ;;  %s3190_s27 = smov 32   ;;  %s3191_s28 = smov 64   ;;  %v3330_v31 = vld [vmem:[%s4220_s6 + $0x18] sm:$0xff] }
   0x9   :  { %v3312_v8 = vld [vmem:[%s4218_s4] sm:$0xff]  ;;  %v145_v9 = vsel %vm51_vm0, %v2870_v6, 0.0  ;;  %s3192_s29 = smov 96   ;;  %v3335_v32 = vld [vmem:[%s4220_s6 + $0x10] sm:$0xff]  ;;  %v50_v33 = vld [vmem:[%s4216_s2 + $0x18] sm:$0xff]  ;;  %225 = vmatpush.msra.mxu3 %v3330_v31  ;;  %vm260_vm6 = vcmask 1041409  }
   0xa   :  { %162 = vmatpush.msra.mxu2 %v3291_v4  ;;  %v3321_v10 = vld [vmem:[%s4219_s5] ss:$0 sm:$0xff]  ;;  %70 = vmatpush.msra.mxu0 %v50_v33  ;;  %v3344_v34 = vld [vmem:[%s4220_s6 + $0x8] sm:$0xff]  ;;  %v49_v41 = vld [vmem:[%s4216_s2 + $0x10] sm:$0xff]  ;;  %vm263_vm7 = vcmask 58368  }
   0xb   :  { %226 = vmatpush.msra.mxu3 %v3335_v32  ;;  %v3350_v35 = vld [vmem:[%s4220_s6] sm:$0xff]  ;;  %v48_v42 = vld [vmem:[%s4216_s2 + $0x8] sm:$0xff] }
   0xc   :  { %163 = vmatpush.msra.mxu2 %v3297_v5  ;;  %71 = vmatpush.msra.mxu0 %v49_v41  ;;  %v47_v43 = vld [vmem:[%s4216_s2] sm:$0xff]  ;;  %v3379_v45 = vld [vmem:[%s4214_s0 + $0x8] sm:$0xff] }
   0xd   :  { %227 = vmatpush.msra.mxu3 %v3344_v34  ;;  %v3370_v44 = vld [vmem:[%s4214_s0] sm:$0xff]  ;;  %v82_v33 = vld [vmem:[%s4217_s3 + $0x8] sm:$0xff] }
   0xe   :  { %164 = vmatpush.msra.mxu2 %v3306_v7  ;;  %72 = vmatpush.msra.mxu0 %v48_v42  ;;  %v3399_v48 = vld [vmem:[%s4221_s7] ss:$0 sm:$0xff] }
   0xf   :  { %228 = vmatpush.msra.mxu3 %v3350_v35  ;;  %v3416_v57 = vld [vmem:[%s4223_s9] ss:$0 sm:$0xff] }
  0x10   :  { %165 = vmatpush.msra.mxu2 %v3312_v8  ;;  %73 = vmatpush.msra.mxu0 %v47_v43 }
  0x11   :  { %2805 = vmatmul.msk.f32.vlgmr.msra.gmra.mxu2 %vm146_vm1, %v145_v9  ;;  %2801 = vmatmul.msk.f32.vlgmr.msra.gmra.mxu0 %vm51_vm0, %v3370_v44  ;;  %v256_v9 = vlaneseq }
  0x12   :  { %492 = vmatpush.msrb.mxu0 %v3268_v0 }
  0x14   :  { %493 = vmatpush.msrb.mxu0 %v3273_v1 }
  0x16   :  { %494 = vmatpush.msrb.mxu0 %v3279_v2 }
  0x18   :  { %495 = vmatpush.msrb.mxu0 %v3285_v3 }
  0x19   :  { %2802 = vmatmul.msk.f32.gmra.mxu0 %vm51_vm0, %v3379_v45 }
  0x1a   :  { %496 = vmatpush.msrb.mxu0 %v3291_v4 }
  0x1c   :  { %497 = vmatpush.msrb.mxu0 %v3297_v5 }
  0x1e   :  { %498 = vmatpush.msrb.mxu0 %v3306_v7 }
  0x20   :  { %499 = vmatpush.msrb.mxu0 %v3312_v8 }
  0x22   :  { %886 = vmatpush.msra.mxu0 %v3330_v31 }
  0x24   :  { %887 = vmatpush.msra.mxu0 %v3335_v32 }
  0x26   :  { %888 = vmatpush.msra.mxu0 %v3344_v34 }
  0x28   :  { %889 = vmatpush.msra.mxu0 %v3350_v35 }
  0x8e   :  { %v3394_v47 = vpop.f32.mrf.mxu0 }
  0x94   :  { %v167_v11 = vpop.f32.mrf.mxu2 }
  0x95   :  { %v168_v12 = vadd.f32 %v3321_v10, %v167_v11  ;;  %v3422_v11 = vand.u32 127, %v256_v9 }
  0x96   :  { %v3408_v53 = vpop.f32.mrf.mxu0 }
  0x97   :  { %190 = vrot.lane.b32.xlu0 %v168_v12, %s3190_s27  ;;  %v2806_v13 = vmul.f32 -1.442695, %v168_v12 }
  0x99   :  { %2876 = vpow2.f32 %v2806_v13 }
  0x9f   :  { %v2877_v14 = vpop.eup %2876 }
  0xa0   :  { %v173_v15 = vadd.f32 1.0, %v2877_v14 }
  0xa2   :  { %2878 = vrcp.f32 %v173_v15  ;;  %v185_v21 = vand.u32 2147483648, %v173_v15  ;;  %vm179_vm3 = vweird.f32 %v173_v15  ;;  %v183_v22 = vand.u32 2147483647, %v173_v15 }
  0xa4   :  { %v186_v24 = vor.u32 1.1754944e-38, %v185_v21  ;;  %vm184_vm5 = vcmp.eq.f32.partialorder %v183_v22, 8.507059e+37 }
  0xa8   :  { %v2879_v16 = vpop.eup %2878 }
  0xa9   :  { %v175_v17 = vmul.f32 %v2879_v16, %v173_v15  ;;  %vm180_vm2 = vweird.f32 %v2879_v16 }
  0xaa   :  { %vm181_vm4 = vmor %vm179_vm3, %vm180_vm2  ;;  %vm340_vm2 = vcmask 785408  }
  0xab   :  { %v176_v18 = vsub.f32 1.0, %v175_v17  ;;  %v3193_v17 = vmov 0  }
  0xac   :  { %2868 = vset.pattern.permute.xlu2 %v3193_v17  ;;  %2867 = vset.pattern.permute.xlu1 %v3193_v17 }
  0xad   :  { %v177_v19 = vmul.f32 %v2879_v16, %v176_v18  ;;  %2869 = vset.pattern.permute.xlu0 %v3193_v17 }
  0xaf   :  { %v178_v20 = vadd.f32 %v2879_v16, %v177_v19 }
  0xb1   :  { %v182_v23 = vsel %vm181_vm4, %v2879_v16, %v178_v20 }
  0xb2   :  { %v187_v26 = vsel %vm184_vm5, %v186_v24, %v182_v23 }
  0xb3   :  { %v200_v36 = vsub.f32 1.0, %v187_v26  ;;  %v206_v38 = vmul.f32 0.0, %v187_v26 }
 0x109   :  { %v191_v25 = vpop.permute.xlu0 %190 }
 0x10a   :  { %v193_v27 = vmul.f32 %v191_v25, %v187_v26 }
 0x10c   :  { %195 = vrot.lane.b32.xlu0 %v193_v27, %s3191_s28 }
 0x17e   :  { %v196_v28 = vpop.permute.xlu0 %195 }
 0x17f   :  { %v198_v29 = vadd.f32 %v196_v28, %v168_v12  ;;  %v84_v28 = vld [vmem:[%s4217_s3 + $0x18] sm:$0xff] }
 0x180   :  { %97 = vmatpush.msra.mxu1 %v84_v28 }
 0x181   :  { %2880 = vtanh.f32 %v198_v29  ;;  %v83_v29 = vld [vmem:[%s4217_s3 + $0x10] sm:$0xff] }
 0x182   :  { %98 = vmatpush.msra.mxu1 %v83_v29 }
 0x184   :  { %99 = vmatpush.msra.mxu1 %v82_v33 }
 0x187   :  { %v2881_v30 = vpop.eup %2880 }
 0x188   :  { %202 = vrot.lane.b32.xlu1 %v2881_v30, %s3192_s29 }
 0x1fa   :  { %v203_v37 = vpop.permute.xlu1 %202 }
 0x1fb   :  { %v205_v39 = vmul.f32 %v203_v37, %v200_v36 }
 0x1fd   :  { %v3354_v40 = vadd.f32 %v206_v38, %v205_v39  ;;  %v81_v38 = vld [vmem:[%s4217_s3] sm:$0xff] }
 0x1fe   :  { %100 = vmatpush.msra.mxu1 %v81_v38 }
 0x1ff   :  { %209 = vrot.lane.b32.xlu1 %v3354_v40, %s3192_s29  ;;  %2803 = vmatmul.msk.f32.vlgmr.msra.gmra.mxu1 %vm51_vm0, %v3370_v44 }
 0x200   :  { %559 = vmatpush.msrb.mxu1 %v3330_v31 }
 0x202   :  { %560 = vmatpush.msrb.mxu1 %v3335_v32 }
 0x204   :  { %561 = vmatpush.msrb.mxu1 %v3344_v34 }
 0x206   :  { %562 = vmatpush.msrb.mxu1 %v3350_v35 }
 0x207   :  { %2804 = vmatmul.msk.f32.gmra.mxu1 %vm51_vm0, %v3379_v45 }
 0x271   :  { %v210_v46 = vpop.permute.xlu1 %209 }
 0x272   :  { %2807 = vmatmul.msk.f32.vlgmr.msra.gmra.mxu3 %vm51_vm0, %v210_v46 }
 0x2f5   :  { %v230_v49 = vpop.f32.mrf.mxu3 }
 0x2f6   :  { %v3402_v50 = vadd.f32 %v3399_v48, %v230_v49 }
 0x2f8   :  { %v3405_v51 = vrot.slane %v3402_v50, 1  ;;  %v235_v52 = vperm.slane %v3402_v50, 0 }
 0x2fa   :  { %v239_v54 = vadd.f32 %v235_v52, %v3394_v47  ;;  %v236_v55 = vperm.slane %v3405_v51, 0 }
 0x2fc   :  { %2882 = vtanh.f32 %v239_v54  ;;  %v240_v56 = vadd.f32 %v236_v55, %v3408_v53 }
 0x2fe   :  { %2884 = vtanh.f32 %v240_v56 }
 0x302   :  { %v2883_v58 = vpop.eup %2882 }
 0x303   :  { %v246_v59 = vmul.f32 %v2883_v58, %v3416_v57 }
 0x304   :  { %v2885_v61 = vpop.eup %2884 }
 0x305   :  { %v248_v60 = vsel %vm51_vm0, %v246_v59, 0.0  ;;  %v247_v62 = vmul.f32 %v2885_v61, %v3416_v57 }
 0x306   :  { %249 = vadd.xlane.f32.xlu2 %v248_v60 }
 0x307   :  { %v251_v63 = vsel %vm51_vm0, %v247_v62, 0.0 }
 0x30e   :  { %252 = vadd.xlane.f32.xlu2 %v251_v63 }
 0x379   :  { %v250_v6 = vpop.xlane.xlu2 %249 }
 0x37a   :  { %v258_v13 = vperm.slane %v250_v6, %v3422_v11 }
 0x381   :  { %v253_v12 = vpop.xlane.xlu2 %252 }
 0x382   :  { %v259_v14 = vperm.slane %v253_v12, %v3422_v11 }
 0x384   :  { %v261_v15 = vsel %vm260_vm6, %v259_v14, %v258_v13 }
 0x385   :  { %v264_v16 = vsel %vm263_vm7, %v261_v15, -inf }
 0x386   :  { %265 = vmax.xlane.f32.xlu0 %v264_v16 }
 0x39a   :  { %357 = vrot.lane.b32.xlu0 %v3402_v50, %s3192_s29 }
 0x3f9   :  { %v266_v18 = vpop.xlane.xlu0 %265 }
 0x3fa   :  { %v268_v19 = vperm.slane %v266_v18, 0  ;;  %v269_v20 = vperm.slane %v266_v18, 1  ;;  %v3460_v18 = vpop.f32.mrf.mxu1 }
 0x3fc   :  { %v272_v21 = vsub.f32 %v250_v6, %v268_v19  ;;  %v273_v22 = vsub.f32 %v253_v12, %v269_v20 }
 0x3fe   :  { %v274_v23 = vmul.f32 1.442695, %v272_v21  ;;  %v276_v24 = vmul.f32 1.442695, %v273_v22 }
 0x400   :  { %2886 = vpow2.f32 %v274_v23 }
 0x401   :  { %2888 = vpow2.f32 %v276_v24 }
 0x402   :  { %v3462_v19 = vpop.f32.mrf.mxu1 }
 0x406   :  { %v2887_v25 = vpop.eup %2886 }
 0x407   :  { %v2889_v26 = vpop.eup %2888  ;;  %281 = vperm.xlu1 %2867, %v2887_v25  }
 0x408   :  { %284 = vperm.xlu2 %2868, %v2889_v26  }
 0x462   :  { %v285_v27 = vpop.permute.xlu2 %284 }
 0x463   :  { %v287_v36 = vperm.slane %v285_v27, %v3422_v11 }
 0x479   :  { %v282_v30 = vpop.permute.xlu1 %281 }
 0x47a   :  { %v286_v37 = vperm.slane %v282_v30, %v3422_v11 }
 0x47c   :  { %v288_v39 = vsel %vm260_vm6, %v287_v36, %v286_v37 }
 0x47d   :  { %v290_v41 = vsel %vm263_vm7, %v288_v39, 0.0 }
 0x47e   :  { %291 = vadd.xlane.f32.xlu1 %v290_v41 }
 0x497   :  { %403 = vrot.lane.b32.xlu1 %v3402_v50, %s3190_s27 }
 0x4f1   :  { %v292_v42 = vpop.xlane.xlu1 %291 }
 0x4f2   :  { %v294_v43 = vperm.slane %v292_v42, 0  ;;  %v295_v46 = vperm.slane %v292_v42, 1 }
 0x4f4   :  { %2890 = vrcp.f32 %v294_v43  ;;  %v324_v58 = vand.u32 2147483648, %v295_v46  ;;  %v322_v60 = vand.u32 2147483647, %v295_v46  ;;  %vm318_vm9 = vweird.f32 %v295_v46 }
 0x4f5   :  { %2892 = vrcp.f32 %v295_v46  ;;  %v309_v9 = vand.u32 2147483648, %v294_v43  ;;  %vm303_vm13 = vweird.f32 %v294_v43  ;;  %v307_v13 = vand.u32 2147483647, %v294_v43 }
 0x4f6   :  { %v325_v50 = vor.u32 1.1754944e-38, %v324_v58  ;;  %vm323_vm11 = vcmp.eq.f32.partialorder %v322_v60, 8.507059e+37 }
 0x4f7   :  { %v310_v15 = vor.u32 1.1754944e-38, %v309_v9  ;;  %vm308_vm15 = vcmp.eq.f32.partialorder %v307_v13, 8.507059e+37 }
 0x4fa   :  { %v2891_v44 = vpop.eup %2890 }
 0x4fb   :  { %v2893_v49 = vpop.eup %2892  ;;  %v299_v52 = vmul.f32 %v2891_v44, %v294_v43  ;;  %vm304_vm12 = vweird.f32 %v2891_v44 }
 0x4fc   :  { %v314_v54 = vmul.f32 %v2893_v49, %v295_v46  ;;  %vm319_vm8 = vweird.f32 %v2893_v49  ;;  %vm305_vm14 = vmor %vm303_vm13, %vm304_vm12 }
 0x4fd   :  { %v300_v55 = vsub.f32 1.0, %v299_v52  ;;  %vm320_vm10 = vmor %vm318_vm9, %vm319_vm8 }
 0x4fe   :  { %v315_v56 = vsub.f32 1.0, %v314_v54  ;;  %v358_v54 = vpop.permute.xlu0 %357 }
 0x4ff   :  { %v301_v61 = vmul.f32 %v2891_v44, %v300_v55 }
 0x500   :  { %v316_v59 = vmul.f32 %v2893_v49, %v315_v56 }
 0x501   :  { %v302_v63 = vadd.f32 %v2891_v44, %v301_v61 }
 0x502   :  { %v317_v45 = vadd.f32 %v2893_v49, %v316_v59 }
 0x503   :  { %v306_v14 = vsel %vm305_vm14, %v2891_v44, %v302_v63 }
 0x504   :  { %v321_v62 = vsel %vm320_vm10, %v2893_v49, %v317_v45  ;;  %v311_v16 = vsel %vm308_vm15, %v310_v15, %v306_v14 }
 0x505   :  { %v326_v6 = vsel %vm323_vm11, %v325_v50, %v321_v62  ;;  %v312_v17 = vmul.f32 %v2887_v25, %v311_v16 }
 0x506   :  { %v327_v12 = vmul.f32 %v2889_v26, %v326_v6 }
 0x508   :  { %335 = vperm.xlu2 %2868, %v327_v12  }
 0x510   :  { %330 = vperm.xlu2 %2868, %v312_v17  }
 0x518   :  { %359 = vrot.lane.b32.xlu2 %v3405_v51, %s3192_s29 }
 0x520   :  { %405 = vrot.lane.b32.xlu2 %v3405_v51, %s3190_s27  ;;  %v3471_v51 = vld [vmem:[%s4222_s8] ss:$0 sm:$0xff] }
 0x562   :  { %v336_v20 = vpop.permute.xlu2 %335 }
 0x563   :  { %v339_v21 = vmul.f32 %v336_v20, %v3462_v19 }
 0x565   :  { %v348_v22 = vsel %vm340_vm2, %v339_v21, 0.0 }
 0x566   :  { %v349_v23 = vrot.slane %v348_v22, 4 }
 0x568   :  { %v350_v24 = vadd.f32 %v349_v23, %v348_v22 }
 0x56a   :  { %v351_v25 = vrot.slane %v350_v24, 2  ;;  %v331_v26 = vpop.permute.xlu2 %330 }
 0x56b   :  { %v338_v27 = vmul.f32 %v331_v26, %v3460_v18 }
 0x56c   :  { %v352_v28 = vadd.f32 %v351_v25, %v350_v24 }
 0x56d   :  { %v341_v29 = vsel %vm340_vm2, %v338_v27, 0.0 }
 0x56e   :  { %v342_v30 = vrot.slane %v341_v29, 4  ;;  %v353_v33 = vrot.slane %v352_v28, 1 }
 0x570   :  { %v343_v36 = vadd.f32 %v342_v30, %v341_v29  ;;  %v354_v37 = vadd.f32 %v353_v33, %v352_v28  ;;  %v404_v29 = vpop.permute.xlu1 %403 }
 0x572   :  { %v344_v38 = vrot.slane %v343_v36, 2  ;;  %v356_v39 = vadd.f32 %v3471_v51, %v354_v37  ;;  %v360_v41 = vpop.permute.xlu2 %359 }
 0x574   :  { %v345_v42 = vadd.f32 %v344_v38, %v343_v36  ;;  %v364_v43 = vadd.f32 %v360_v41, %v356_v39 }
 0x576   :  { %v346_v46 = vrot.slane %v345_v42, 1  ;;  %v2809_v44 = vmul.f32 -1.442695, %v364_v43 }
 0x578   :  { %v347_v49 = vadd.f32 %v346_v46, %v345_v42  ;;  %2894 = vpow2.f32 %v2809_v44  ;;  %v3485_v46 = vld [vmem:[%s4224_s10 + $0x18] sm:$0xff]  ;;  %v3490_v44 = vld [vmem:[%s4224_s10 + $0x10] sm:$0xff] }
 0x579   :  { %462 = vmatpush.msrb.mxu3 %v3485_v46  ;;  %788 = vmatpush.msrb.mxu2 %v3485_v46 }
 0x57a   :  { %v355_v52 = vadd.f32 %v3471_v51, %v347_v49  ;;  %v406_v20 = vpop.permute.xlu2 %405  ;;  %1115 = vmatpush.msra.mxu1 %v3485_v46  ;;  %v3505_v49 = vld [vmem:[%s4224_s10] sm:$0xff] }
 0x57b   :  { %463 = vmatpush.msrb.mxu3 %v3490_v44  ;;  %789 = vmatpush.msrb.mxu2 %v3490_v44 }
 0x57c   :  { %v363_v55 = vadd.f32 %v358_v54, %v355_v52  ;;  %1116 = vmatpush.msra.mxu1 %v3490_v44 }
 0x57e   :  { %v2895_v56 = vpop.eup %2894  ;;  %v2808_v58 = vmul.f32 -1.442695, %v363_v55  ;;  %v435_v55 = vrot.slane %v3354_v40, 1 }
 0x57f   :  { %v372_v59 = vadd.f32 1.0, %v2895_v56 }
 0x580   :  { %2896 = vpow2.f32 %v2808_v58 }
 0x581   :  { %2898 = vrcp.f32 %v372_v59  ;;  %v399_v63 = vand.u32 2147483648, %v372_v59  ;;  %v397_v9 = vand.u32 2147483647, %v372_v59  ;;  %vm393_vm4 = vweird.f32 %v372_v59 }
 0x583   :  { %v400_v14 = vor.u32 1.1754944e-38, %v399_v63  ;;  %vm398_vm8 = vcmp.eq.f32.partialorder %v397_v9, 8.507059e+37 }
 0x586   :  { %v2897_v60 = vpop.eup %2896 }
 0x587   :  { %v2899_v61 = vpop.eup %2898  ;;  %v371_v45 = vadd.f32 1.0, %v2897_v60 }
 0x588   :  { %v389_v50 = vmul.f32 %v2899_v61, %v372_v59  ;;  %vm394_vm3 = vweird.f32 %v2899_v61 }
 0x589   :  { %2900 = vrcp.f32 %v371_v45  ;;  %vm395_vm5 = vmor %vm393_vm4, %vm394_vm3  ;;  %v384_v23 = vand.u32 2147483648, %v371_v45  ;;  %v382_v25 = vand.u32 2147483647, %v371_v45  ;;  %vm378_vm10 = vweird.f32 %v371_v45 }
 0x58a   :  { %v390_v62 = vsub.f32 1.0, %v389_v50 }
 0x58b   :  { %v385_v27 = vor.u32 1.1754944e-38, %v384_v23  ;;  %vm383_vm12 = vcmp.eq.f32.partialorder %v382_v25, 8.507059e+37 }
 0x58c   :  { %v391_v6 = vmul.f32 %v2899_v61, %v390_v62 }
 0x58e   :  { %v392_v12 = vadd.f32 %v2899_v61, %v391_v6 }
 0x58f   :  { %v2901_v13 = vpop.eup %2900 }
 0x590   :  { %v396_v15 = vsel %vm395_vm5, %v2899_v61, %v392_v12  ;;  %v374_v16 = vmul.f32 %v2901_v13, %v371_v45  ;;  %vm379_vm9 = vweird.f32 %v2901_v13 }
 0x591   :  { %v3475_v17 = vsel %vm398_vm8, %v400_v14, %v396_v15  ;;  %vm380_vm11 = vmor %vm378_vm10, %vm379_vm9 }
 0x592   :  { %v410_v21 = vmul.f32 %v406_v20, %v3475_v17  ;;  %v375_v22 = vsub.f32 1.0, %v374_v16  ;;  %v424_v54 = vsub.f32 1.0, %v3475_v17  ;;  %v439_v58 = vmul.f32 %v435_v55, %v3475_v17 }
 0x594   :  { %415 = vrot.lane.b32.xlu2 %v410_v21, %s3191_s28  ;;  %v376_v24 = vmul.f32 %v2901_v13, %v375_v22 }
 0x596   :  { %v377_v26 = vadd.f32 %v2901_v13, %v376_v24 }
 0x598   :  { %v381_v28 = vsel %vm380_vm11, %v2901_v13, %v377_v26 }
 0x599   :  { %v386_v30 = vsel %vm383_vm12, %v385_v27, %v381_v28 }
 0x59a   :  { %v409_v33 = vmul.f32 %v404_v29, %v386_v30  ;;  %v423_v60 = vsub.f32 1.0, %v386_v30  ;;  %v438_v45 = vmul.f32 %v386_v30, %v3354_v40  ;;  %v3548_v40 = vld [vmem:[%s4225_s11] ss:$0 sm:$0xff] }
 0x59c   :  { %413 = vrot.lane.b32.xlu0 %v409_v33, %s3191_s28 }
 0x5ee   :  { %v416_v36 = vpop.permute.xlu2 %415 }
 0x5ef   :  { %v420_v37 = vadd.f32 %v416_v36, %v356_v39  ;;  %v3497_v39 = vld [vmem:[%s4224_s10 + $0x8] sm:$0xff] }
 0x5f0   :  { %464 = vmatpush.msrb.mxu3 %v3497_v39  ;;  %790 = vmatpush.msrb.mxu2 %v3497_v39 }
 0x5f1   :  { %2902 = vtanh.f32 %v420_v37  ;;  %1117 = vmatpush.msra.mxu1 %v3497_v39 }
 0x5f2   :  { %465 = vmatpush.msrb.mxu3 %v3505_v49  ;;  %791 = vmatpush.msrb.mxu2 %v3505_v49 }
 0x5f3   :  { %1118 = vmatpush.msra.mxu1 %v3505_v49 }
 0x5f4   :  { %819 = vmatpush.msra.mxu3 %v3268_v0  ;;  %1146 = vmatpush.msra.mxu2 %v3268_v0 }
 0x5f6   :  { %820 = vmatpush.msra.mxu3 %v3273_v1  ;;  %1147 = vmatpush.msra.mxu2 %v3273_v1 }
 0x5f7   :  { %v2903_v38 = vpop.eup %2902 }
 0x5f8   :  { %429 = vrot.lane.b32.xlu2 %v2903_v38, %s3192_s29  ;;  %821 = vmatpush.msra.mxu3 %v3279_v2 }
 0x5f9   :  { %1148 = vmatpush.msra.mxu2 %v3279_v2 }
 0x5fa   :  { %822 = vmatpush.msra.mxu3 %v3285_v3 }
 0x5fb   :  { %1149 = vmatpush.msra.mxu2 %v3285_v3 }
 0x5fc   :  { %823 = vmatpush.msra.mxu3 %v3291_v4 }
 0x5fd   :  { %1150 = vmatpush.msra.mxu2 %v3291_v4 }
 0x5fe   :  { %824 = vmatpush.msra.mxu3 %v3297_v5 }
 0x5ff   :  { %1151 = vmatpush.msra.mxu2 %v3297_v5 }
 0x600   :  { %825 = vmatpush.msra.mxu3 %v3306_v7 }
 0x601   :  { %1152 = vmatpush.msra.mxu2 %v3306_v7 }
 0x602   :  { %826 = vmatpush.msra.mxu3 %v3312_v8 }
 0x603   :  { %1153 = vmatpush.msra.mxu2 %v3312_v8 }
 0x60e   :  { %v414_v41 = vpop.permute.xlu0 %413 }
 0x60f   :  { %v419_v42 = vadd.f32 %v414_v41, %v355_v52 }
 0x611   :  { %2904 = vtanh.f32 %v419_v42 }
 0x617   :  { %v2905_v43 = vpop.eup %2904 }
 0x618   :  { %427 = vrot.lane.b32.xlu0 %v2905_v43, %s3192_s29 }
 0x652   :  { %v430_v52 = vpop.permute.xlu2 %429 }
 0x653   :  { %v434_v56 = vmul.f32 %v430_v52, %v424_v54 }
 0x655   :  { %v441_v59 = vadd.f32 %v439_v58, %v434_v56 }
 0x657   :  { %v444_v62 = vrot.slane %v441_v59, 7 }
 0x68a   :  { %v428_v61 = vpop.permute.xlu0 %427 }
 0x68b   :  { %v433_v50 = vmul.f32 %v428_v61, %v423_v60 }
 0x68d   :  { %v440_v63 = vadd.f32 %v438_v45, %v433_v50 }
 0x68f   :  { %v445_v6 = vsel %vm260_vm6, %v444_v62, %v440_v63 }
 0x690   :  { %446 = vrot.lane.b32.xlu2 %v445_v6, %s3192_s29 }
 0x6ea   :  { %v447_v9 = vpop.permute.xlu2 %446 }
 0x6eb   :  { %2810 = vmatmul.msk.f32.vlgmr.msrb.gmra.mxu3 %vm51_vm0, %v447_v9 }
 0x6ec   :  { %1473 = vmatpush.msrb.mxu3 %v3268_v0 }
 0x6ee   :  { %1474 = vmatpush.msrb.mxu3 %v3273_v1 }
 0x6f0   :  { %1475 = vmatpush.msrb.mxu3 %v3279_v2 }
 0x6f2   :  { %1476 = vmatpush.msrb.mxu3 %v3285_v3 }
 0x6f4   :  { %1477 = vmatpush.msrb.mxu3 %v3291_v4 }
 0x6f6   :  { %1478 = vmatpush.msrb.mxu3 %v3297_v5 }
 0x6f8   :  { %1479 = vmatpush.msrb.mxu3 %v3306_v7 }
 0x6fa   :  { %1480 = vmatpush.msrb.mxu3 %v3312_v8 }
 0x76e   :  { %v467_v0 = vpop.f32.mrf.mxu3 }
 0x76f   :  { %v3551_v1 = vadd.f32 %v3548_v40, %v467_v0 }
 0x771   :  { %2906 = vtanh.f32 %v3551_v1 }
 0x777   :  { %v2907_v2 = vpop.eup %2906 }
 0x778   :  { %v480_v3 = vsel %vm51_vm0, %v2907_v2, %v445_v6 }
 0x779   :  { %2811 = vmatmul.msk.f32.vlgmr.msrb.gmra.mxu0 %vm146_vm1, %v480_v3 }
 0x77a   :  { %1213 = vmatpush.msrb.mxu0 %v3330_v31 }
 0x77c   :  { %1214 = vmatpush.msrb.mxu0 %v3335_v32 }
 0x77e   :  { %1215 = vmatpush.msrb.mxu0 %v3344_v34 }
 0x780   :  { %1216 = vmatpush.msrb.mxu0 %v3350_v35 }
 0x7f6   :  { %v501_v4 = vpop.f32.mrf.mxu0 }
 0x7f7   :  { %v502_v5 = vadd.f32 %v3321_v10, %v501_v4 }
 0x7f9   :  { %524 = vrot.lane.b32.xlu1 %v502_v5, %s3190_s27  ;;  %v2812_v7 = vmul.f32 -1.442695, %v502_v5 }
 0x7fb   :  { %2908 = vpow2.f32 %v2812_v7 }
 0x801   :  { %v2909_v8 = vpop.eup %2908 }
 0x802   :  { %v507_v12 = vadd.f32 1.0, %v2909_v8 }
 0x804   :  { %2910 = vrcp.f32 %v507_v12  ;;  %v519_v32 = vand.u32 2147483648, %v507_v12  ;;  %vm513_vm14 = vweird.f32 %v507_v12  ;;  %v517_v34 = vand.u32 2147483647, %v507_v12 }
 0x806   :  { %v520_v17 = vor.u32 1.1754944e-38, %v519_v32  ;;  %vm518_vm3 = vcmp.eq.f32.partialorder %v517_v34, 8.507059e+37 }
 0x80a   :  { %v2911_v13 = vpop.eup %2910 }
 0x80b   :  { %v509_v14 = vmul.f32 %v2911_v13, %v507_v12  ;;  %vm514_vm13 = vweird.f32 %v2911_v13 }
 0x80c   :  { %vm515_vm15 = vmor %vm513_vm14, %vm514_vm13 }
 0x80d   :  { %v510_v15 = vsub.f32 1.0, %v509_v14 }
 0x80f   :  { %v511_v31 = vmul.f32 %v2911_v13, %v510_v15 }
 0x811   :  { %v512_v16 = vadd.f32 %v2911_v13, %v511_v31 }
 0x813   :  { %v516_v35 = vsel %vm515_vm15, %v2911_v13, %v512_v16 }
 0x814   :  { %v521_v20 = vsel %vm518_vm3, %v520_v17, %v516_v35 }
 0x815   :  { %v534_v25 = vsub.f32 1.0, %v521_v20  ;;  %v540_v27 = vmul.f32 %v521_v20, %v445_v6 }
 0x86b   :  { %v525_v10 = vpop.permute.xlu1 %524 }
 0x86c   :  { %v527_v21 = vmul.f32 %v525_v10, %v521_v20 }
 0x86e   :  { %529 = vrot.lane.b32.xlu0 %v527_v21, %s3191_s28 }
 0x8e0   :  { %v530_v22 = vpop.permute.xlu0 %529 }
 0x8e1   :  { %v532_v23 = vadd.f32 %v530_v22, %v502_v5 }
 0x8e3   :  { %2912 = vtanh.f32 %v532_v23 }
 0x8e9   :  { %v2913_v24 = vpop.eup %2912 }
 0x8ea   :  { %536 = vrot.lane.b32.xlu2 %v2913_v24, %s3192_s29 }
 0x944   :  { %v537_v26 = vpop.permute.xlu2 %536 }
 0x945   :  { %v539_v28 = vmul.f32 %v537_v26, %v534_v25 }
 0x947   :  { %v3564_v29 = vadd.f32 %v540_v27, %v539_v28 }
 0x949   :  { %543 = vrot.lane.b32.xlu1 %v3564_v29, %s3192_s29 }
 0x9bb   :  { %v544_v30 = vpop.permute.xlu1 %543 }
 0x9bc   :  { %2813 = vmatmul.msk.f32.vlgmr.msrb.gmra.mxu1 %vm51_vm0, %v544_v30 }
 0x9bd   :  { %1442 = vmatpush.msrb.mxu1 %v3485_v46 }
 0x9bf   :  { %1443 = vmatpush.msrb.mxu1 %v3490_v44 }
 0x9c1   :  { %1444 = vmatpush.msrb.mxu1 %v3497_v39 }
 0x9c3   :  { %1445 = vmatpush.msrb.mxu1 %v3505_v49 }
 0xa39   :  { %v564_v33 = vpop.f32.mrf.mxu1 }
 0xa3a   :  { %v3574_v36 = vadd.f32 %v3399_v48, %v564_v33 }
 0xa3c   :  { %v3577_v37 = vrot.slane %v3574_v36, 1  ;;  %v569_v38 = vperm.slane %v3574_v36, 0 }
 0xa3e   :  { %v573_v41 = vadd.f32 %v569_v38, %v3394_v47  ;;  %v570_v42 = vperm.slane %v3577_v37, 0 }
 0xa40   :  { %2914 = vtanh.f32 %v573_v41  ;;  %v574_v43 = vadd.f32 %v570_v42, %v3408_v53 }
 0xa42   :  { %2916 = vtanh.f32 %v574_v43 }
 0xa46   :  { %v2915_v46 = vpop.eup %2914 }
 0xa47   :  { %v577_v44 = vmul.f32 %v2915_v46, %v3416_v57 }
 0xa48   :  { %v2917_v39 = vpop.eup %2916 }
 0xa49   :  { %v579_v48 = vsel %vm51_vm0, %v577_v44, 0.0  ;;  %v578_v49 = vmul.f32 %v2917_v39, %v3416_v57 }
 0xa4a   :  { %580 = vadd.xlane.f32.xlu0 %v579_v48 }
 0xa4b   :  { %v582_v52 = vsel %vm51_vm0, %v578_v49, 0.0 }
 0xa4c   :  { %583 = vadd.xlane.f32.xlu2 %v582_v52 }
 0xabd   :  { %v581_v54 = vpop.xlane.xlu0 %580 }
 0xabe   :  { %v587_v56 = vperm.slane %v581_v54, %v3422_v11 }
 0xabf   :  { %v584_v55 = vpop.xlane.xlu2 %583 }
 0xac0   :  { %v588_v58 = vperm.slane %v584_v55, %v3422_v11 }
 0xac2   :  { %v589_v59 = vsel %vm260_vm6, %v588_v58, %v587_v56 }
 0xac3   :  { %v591_v60 = vsel %vm263_vm7, %v589_v59, -inf }
 0xac4   :  { %592 = vmax.xlane.f32.xlu1 %v591_v60 }
 0xb37   :  { %v593_v61 = vpop.xlane.xlu1 %592 }
 0xb38   :  { %v595_v45 = vperm.slane %v593_v61, 0  ;;  %v596_v50 = vperm.slane %v593_v61, 1 }
 0xb3a   :  { %v599_v62 = vsub.f32 %v581_v54, %v595_v45  ;;  %v600_v57 = vsub.f32 %v584_v55, %v596_v50 }
 0xb3c   :  { %v601_v63 = vmul.f32 1.442695, %v599_v62  ;;  %v603_v6 = vmul.f32 1.442695, %v600_v57 }
 0xb3e   :  { %2918 = vpow2.f32 %v601_v63 }
 0xb3f   :  { %2920 = vpow2.f32 %v603_v6 }
 0xb44   :  { %v2919_v9 = vpop.eup %2918 }
 0xb45   :  { %v2921_v0 = vpop.eup %2920  ;;  %608 = vperm.xlu0 %2869, %v2919_v9  }
 0xb46   :  { %611 = vperm.xlu2 %2868, %v2921_v0  }
 0xb4d   :  { %731 = vrot.lane.b32.xlu0 %v3577_v37, %s3190_s27 }
 0xba0   :  { %v612_v2 = vpop.permute.xlu2 %611 }
 0xba1   :  { %v614_v4 = vperm.slane %v612_v2, %v3422_v11 }
 0xbb7   :  { %v609_v3 = vpop.permute.xlu0 %608 }
 0xbb8   :  { %v613_v5 = vperm.slane %v609_v3, %v3422_v11 }
 0xbba   :  { %v615_v7 = vsel %vm260_vm6, %v614_v4, %v613_v5 }
 0xbbb   :  { %v617_v8 = vsel %vm263_vm7, %v615_v7, 0.0 }
 0xbbc   :  { %618 = vadd.xlane.f32.xlu1 %v617_v8 }
 0xc2f   :  { %v619_v12 = vpop.xlane.xlu1 %618 }
 0xc30   :  { %v621_v13 = vperm.slane %v619_v12, 0  ;;  %v622_v14 = vperm.slane %v619_v12, 1 }
 0xc32   :  { %2922 = vrcp.f32 %v621_v13  ;;  %v636_v17 = vand.u32 2147483648, %v621_v13  ;;  %v651_v10 = vand.u32 2147483648, %v622_v14  ;;  %v634_v21 = vand.u32 2147483647, %v621_v13 }
 0xc33   :  { %2924 = vrcp.f32 %v622_v14  ;;  %v649_v23 = vand.u32 2147483647, %v622_v14  ;;  %vm630_vm8 = vweird.f32 %v621_v13  ;;  %vm645_vm9 = vweird.f32 %v622_v14 }
 0xc34   :  { %v637_v26 = vor.u32 1.1754944e-38, %v636_v17  ;;  %v652_v27 = vor.u32 1.1754944e-38, %v651_v10  ;;  %vm635_vm12 = vcmp.eq.f32.partialorder %v634_v21, 8.507059e+37 }
 0xc35   :  { %vm650_vm13 = vcmp.eq.f32.partialorder %v649_v23, 8.507059e+37 }
 0xc38   :  { %v2923_v15 = vpop.eup %2922 }
 0xc39   :  { %v2925_v31 = vpop.eup %2924  ;;  %v626_v16 = vmul.f32 %v2923_v15, %v621_v13  ;;  %vm631_vm4 = vweird.f32 %v2923_v15 }
 0xc3a   :  { %v641_v32 = vmul.f32 %v2925_v31, %v622_v14  ;;  %vm646_vm5 = vweird.f32 %v2925_v31  ;;  %vm632_vm10 = vmor %vm630_vm8, %vm631_vm4 }
 0xc3b   :  { %v627_v34 = vsub.f32 1.0, %v626_v16  ;;  %vm647_vm11 = vmor %vm645_vm9, %vm646_vm5 }
 0xc3c   :  { %v642_v35 = vsub.f32 1.0, %v641_v32 }
 0xc3d   :  { %v628_v20 = vmul.f32 %v2923_v15, %v627_v34 }
 0xc3e   :  { %v643_v22 = vmul.f32 %v2925_v31, %v642_v35 }
 0xc3f   :  { %v629_v24 = vadd.f32 %v2923_v15, %v628_v20 }
 0xc40   :  { %v644_v25 = vadd.f32 %v2925_v31, %v643_v22 }
 0xc41   :  { %v633_v28 = vsel %vm632_vm10, %v2923_v15, %v629_v24 }
 0xc42   :  { %v648_v30 = vsel %vm647_vm11, %v2925_v31, %v644_v25  ;;  %v638_v33 = vsel %vm635_vm12, %v637_v26, %v633_v28 }
 0xc43   :  { %v653_v38 = vsel %vm650_vm13, %v652_v27, %v648_v30  ;;  %v639_v41 = vmul.f32 %v2919_v9, %v638_v33  ;;  %v732_v30 = vpop.permute.xlu0 %731 }
 0xc44   :  { %v654_v42 = vmul.f32 %v2921_v0, %v653_v38 }
 0xc45   :  { %657 = vperm.xlu2 %2868, %v639_v41  }
 0xc46   :  { %662 = vperm.xlu1 %2867, %v654_v42  }
 0xc4d   :  { %685 = vrot.lane.b32.xlu2 %v3577_v37, %s3192_s29 }
 0xc4e   :  { %683 = vrot.lane.b32.xlu1 %v3574_v36, %s3192_s29 }
 0xc55   :  { %729 = vrot.lane.b32.xlu2 %v3574_v36, %s3190_s27 }
 0xc9f   :  { %v658_v43 = vpop.permute.xlu2 %657 }
 0xca0   :  { %v665_v46 = vmul.f32 %v658_v43, %v3460_v18 }
 0xca2   :  { %v667_v44 = vsel %vm340_vm2, %v665_v46, 0.0 }
 0xca3   :  { %v668_v39 = vrot.slane %v667_v44, 4 }
 0xca5   :  { %v669_v48 = vadd.f32 %v668_v39, %v667_v44 }
 0xca7   :  { %v670_v49 = vrot.slane %v669_v48, 2  ;;  %v686_v0 = vpop.permute.xlu2 %685 }
 0xca9   :  { %v671_v52 = vadd.f32 %v670_v49, %v669_v48 }
 0xcab   :  { %v672_v54 = vrot.slane %v671_v52, 1 }
 0xcad   :  { %v673_v58 = vadd.f32 %v672_v54, %v671_v52  ;;  %v761_v54 = vrot.slane %v3564_v29, 1 }
 0xcaf   :  { %v681_v36 = vadd.f32 %v3471_v51, %v673_v58  ;;  %v730_v10 = vpop.permute.xlu2 %729 }
 0xcb8   :  { %v663_v55 = vpop.permute.xlu1 %662 }
 0xcb9   :  { %v666_v56 = vmul.f32 %v663_v55, %v3462_v19 }
 0xcbb   :  { %v674_v37 = vsel %vm340_vm2, %v666_v56, 0.0 }
 0xcbc   :  { %v675_v59 = vrot.slane %v674_v37, 4 }
 0xcbe   :  { %v676_v60 = vadd.f32 %v675_v59, %v674_v37 }
 0xcc0   :  { %v677_v61 = vrot.slane %v676_v60, 2  ;;  %v684_v45 = vpop.permute.xlu1 %683 }
 0xcc1   :  { %v689_v50 = vadd.f32 %v684_v45, %v681_v36 }
 0xcc2   :  { %v678_v62 = vadd.f32 %v677_v61, %v676_v60 }
 0xcc3   :  { %v2814_v57 = vmul.f32 -1.442695, %v689_v50 }
 0xcc4   :  { %v679_v63 = vrot.slane %v678_v62, 1 }
 0xcc5   :  { %2926 = vpow2.f32 %v2814_v57  ;;  %v3636_v57 = vld [vmem:[%s4218_s4 + $0x28] sm:$0xff] }
 0xcc6   :  { %v680_v6 = vadd.f32 %v679_v63, %v678_v62  ;;  %v3624_v62 = vld [vmem:[%s4218_s4 + $0x38] sm:$0xff]  ;;  %v3642_v63 = vld [vmem:[%s4218_s4 + $0x20] sm:$0xff] }
 0xcc8   :  { %v682_v9 = vadd.f32 %v3471_v51, %v680_v6  ;;  %v3648_v6 = vld [vmem:[%s4218_s4 + $0x18] sm:$0xff] }
 0xcca   :  { %v690_v2 = vadd.f32 %v686_v0, %v682_v9  ;;  %v3660_v0 = vld [vmem:[%s4218_s4 + $0x8] sm:$0xff] }
 0xccb   :  { %v2927_v3 = vpop.eup %2926 }
 0xccc   :  { %v2815_v4 = vmul.f32 -1.442695, %v690_v2  ;;  %v697_v5 = vadd.f32 1.0, %v2927_v3  ;;  %v3666_v2 = vld [vmem:[%s4218_s4] sm:$0xff] }
 0xcce   :  { %2928 = vpow2.f32 %v2815_v4  ;;  %v710_v15 = vand.u32 2147483648, %v697_v5  ;;  %v708_v16 = vand.u32 2147483647, %v697_v5  ;;  %vm704_vm15 = vweird.f32 %v697_v5 }
 0xccf   :  { %2930 = vrcp.f32 %v697_v5 }
 0xcd0   :  { %v711_v34 = vor.u32 1.1754944e-38, %v710_v15  ;;  %vm709_vm4 = vcmp.eq.f32.partialorder %v708_v16, 8.507059e+37 }
 0xcd4   :  { %v2929_v7 = vpop.eup %2928 }
 0xcd5   :  { %v2931_v8 = vpop.eup %2930  ;;  %v698_v12 = vadd.f32 1.0, %v2929_v7 }
 0xcd6   :  { %v700_v13 = vmul.f32 %v2931_v8, %v697_v5  ;;  %vm705_vm14 = vweird.f32 %v2931_v8 }
 0xcd7   :  { %2932 = vrcp.f32 %v698_v12  ;;  %vm706_vm3 = vmor %vm704_vm15, %vm705_vm14  ;;  %v725_v23 = vand.u32 2147483648, %v698_v12  ;;  %v723_v25 = vand.u32 2147483647, %v698_v12  ;;  %vm719_vm8 = vweird.f32 %v698_v12 }
 0xcd8   :  { %v701_v14 = vsub.f32 1.0, %v700_v13 }
 0xcd9   :  { %v726_v27 = vor.u32 1.1754944e-38, %v725_v23  ;;  %vm724_vm10 = vcmp.eq.f32.partialorder %v723_v25, 8.507059e+37 }
 0xcda   :  { %v702_v31 = vmul.f32 %v2931_v8, %v701_v14 }
 0xcdc   :  { %v703_v32 = vadd.f32 %v2931_v8, %v702_v31 }
 0xcdd   :  { %v2933_v51 = vpop.eup %2932 }
 0xcde   :  { %v707_v35 = vsel %vm706_vm3, %v2931_v8, %v703_v32  ;;  %v715_v17 = vmul.f32 %v2933_v51, %v698_v12  ;;  %vm720_vm5 = vweird.f32 %v2933_v51  ;;  %v3687_v12 = vld [vmem:[%s4219_s5] ss:$0 sm:$0xff] }
 0xcdf   :  { %v712_v20 = vsel %vm709_vm4, %v711_v34, %v707_v35  ;;  %vm721_vm9 = vmor %vm719_vm8, %vm720_vm5 }
 0xce0   :  { %v735_v21 = vmul.f32 %v730_v10, %v712_v20  ;;  %v716_v22 = vsub.f32 1.0, %v715_v17  ;;  %v749_v37 = vsub.f32 1.0, %v712_v20  ;;  %v764_v59 = vmul.f32 %v712_v20, %v3564_v29  ;;  %v3630_v29 = vld [vmem:[%s4218_s4 + $0x30] sm:$0xff] }
 0xce2   :  { %739 = vrot.lane.b32.xlu0 %v735_v21, %s3191_s28  ;;  %v717_v24 = vmul.f32 %v2933_v51, %v716_v22 }
 0xce4   :  { %v718_v26 = vadd.f32 %v2933_v51, %v717_v24 }
 0xce6   :  { %v722_v28 = vsel %vm721_vm9, %v2933_v51, %v718_v26 }
 0xce7   :  { %v727_v33 = vsel %vm724_vm10, %v726_v27, %v722_v28 }
 0xce8   :  { %v736_v38 = vmul.f32 %v732_v30, %v727_v33  ;;  %v750_v49 = vsub.f32 1.0, %v727_v33  ;;  %v765_v55 = vmul.f32 %v761_v54, %v727_v33 }
 0xcea   :  { %741 = vrot.lane.b32.xlu1 %v736_v38, %s3191_s28 }
 0xd54   :  { %v740_v41 = vpop.permute.xlu0 %739 }
 0xd55   :  { %v745_v42 = vadd.f32 %v740_v41, %v681_v36 }
 0xd57   :  { %2934 = vtanh.f32 %v745_v42 }
 0xd5c   :  { %v742_v43 = vpop.permute.xlu1 %741 }
 0xd5d   :  { %v2935_v46 = vpop.eup %2934  ;;  %v746_v44 = vadd.f32 %v742_v43, %v682_v9  ;;  %v3654_v9 = vld [vmem:[%s4218_s4 + $0x10] sm:$0xff]  ;;  %v3702_v43 = vld [vmem:[%s4220_s6 + $0x18] sm:$0xff]  ;;  %s2792_s4 = sshll.u32 %s4227_s13, 4  ;;  %s2793_s4 = int_to_ptr.hbm [resolvable:$true] %s2792_s4 }
 0xd5e   :  { %753 = vrot.lane.b32.xlu1 %v2935_v46, %s3192_s29  ;;  %v3708_v46 = vld [vmem:[%s4220_s6 + $0x10] sm:$0xff] }
 0xd5f   :  { %2936 = vtanh.f32 %v746_v44  ;;  %v3714_v44 = vld [vmem:[%s4220_s6 + $0x8] sm:$0xff] }
 0xd65   :  { %v2937_v39 = vpop.eup %2936 }
 0xd66   :  { %755 = vrot.lane.b32.xlu2 %v2937_v39, %s3192_s29  ;;  %v3720_v39 = vld [vmem:[%s4220_s6] sm:$0xff] }
 0xdc0   :  { %v756_v48 = vpop.permute.xlu2 %755 }
 0xdc1   :  { %v760_v52 = vmul.f32 %v756_v48, %v750_v49  ;;  %v3726_v49 = vld [vmem:[%s4221_s7] ss:$0 sm:$0xff] }
 0xdc3   :  { %v767_v56 = vadd.f32 %v765_v55, %v760_v52 }
 0xdc5   :  { %v770_v36 = vrot.slane %v767_v56, 7 }
 0xdd0   :  { %v754_v58 = vpop.permute.xlu1 %753 }
 0xdd1   :  { %v759_v60 = vmul.f32 %v754_v58, %v749_v37 }
 0xdd3   :  { %v766_v61 = vadd.f32 %v764_v59, %v759_v60  ;;  %v3738_v60 = vld [vmem:[%s4223_s9] ss:$0 sm:$0xff] }
 0xdd5   :  { %v3616_v45 = vsel %vm260_vm6, %v770_v36, %v766_v61 }
 0xdd6   :  { %772 = vrot.lane.b32.xlu0 %v3616_v45, %s3192_s29 }
 0xe48   :  { %v773_v50 = vpop.permute.xlu0 %772 }
 0xe49   :  { %2816 = vmatmul.msk.f32.vlgmr.msrb.gmra.mxu2 %vm51_vm0, %v773_v50 }
 0xe4a   :  { %1800 = vmatpush.msrb.mxu2 %v3624_v62 }
 0xe4c   :  { %1801 = vmatpush.msrb.mxu2 %v3630_v29 }
 0xe4e   :  { %1802 = vmatpush.msrb.mxu2 %v3636_v57 }
 0xe50   :  { %1803 = vmatpush.msrb.mxu2 %v3642_v63 }
 0xe52   :  { %1804 = vmatpush.msrb.mxu2 %v3648_v6 }
 0xe54   :  { %1805 = vmatpush.msrb.mxu2 %v3654_v9 }
 0xe56   :  { %1806 = vmatpush.msrb.mxu2 %v3660_v0 }
 0xe58   :  { %1807 = vmatpush.msrb.mxu2 %v3666_v2 }
 0xecc   :  { %v793_v3 = vpop.f32.mrf.mxu2 }
 0xecd   :  { %v3670_v4 = vadd.f32 %v3548_v40, %v793_v3 }
 0xecf   :  { %2938 = vtanh.f32 %v3670_v4 }
 0xed5   :  { %v2939_v5 = vpop.eup %2938 }
 0xed6   :  { %v807_v7 = vsel %vm51_vm0, %v2939_v5, %v3616_v45 }
 0xed7   :  { %2818 = vmatmul.msk.f32.vlgmr.msra.gmra.mxu3 %vm146_vm1, %v807_v7 }
 0xed8   :  { %2127 = vmatpush.msra.mxu3 %v3624_v62 }
 0xeda   :  { %2128 = vmatpush.msra.mxu3 %v3630_v29 }
 0xedc   :  { %2129 = vmatpush.msra.mxu3 %v3636_v57 }
 0xede   :  { %2130 = vmatpush.msra.mxu3 %v3642_v63 }
 0xee0   :  { %2131 = vmatpush.msra.mxu3 %v3648_v6 }
 0xee2   :  { %2132 = vmatpush.msra.mxu3 %v3654_v9 }
 0xee4   :  { %2133 = vmatpush.msra.mxu3 %v3660_v0 }
 0xee6   :  { %2134 = vmatpush.msra.mxu3 %v3666_v2 }
 0xf5a   :  { %v828_v8 = vpop.f32.mrf.mxu3 }
 0xf5b   :  { %v829_v13 = vadd.f32 %v3687_v12, %v828_v8 }
 0xf5d   :  { %851 = vrot.lane.b32.xlu2 %v829_v13, %s3190_s27  ;;  %v2819_v14 = vmul.f32 -1.442695, %v829_v13 }
 0xf5f   :  { %2940 = vpow2.f32 %v2819_v14 }
 0xf65   :  { %v2941_v15 = vpop.eup %2940 }
 0xf66   :  { %v834_v31 = vadd.f32 1.0, %v2941_v15 }
 0xf68   :  { %2942 = vrcp.f32 %v834_v31  ;;  %v846_v17 = vand.u32 2147483648, %v834_v31  ;;  %vm840_vm12 = vweird.f32 %v834_v31  ;;  %v844_v10 = vand.u32 2147483647, %v834_v31 }
 0xf6a   :  { %v847_v21 = vor.u32 1.1754944e-38, %v846_v17  ;;  %vm845_vm14 = vcmp.eq.f32.partialorder %v844_v10, 8.507059e+37 }
 0xf6e   :  { %v2943_v16 = vpop.eup %2942 }
 0xf6f   :  { %v836_v32 = vmul.f32 %v2943_v16, %v834_v31  ;;  %vm841_vm11 = vweird.f32 %v2943_v16 }
 0xf70   :  { %vm842_vm13 = vmor %vm840_vm12, %vm841_vm11 }
 0xf71   :  { %v837_v51 = vsub.f32 1.0, %v836_v32 }
 0xf73   :  { %v838_v34 = vmul.f32 %v2943_v16, %v837_v51 }
 0xf75   :  { %v839_v35 = vadd.f32 %v2943_v16, %v838_v34 }
 0xf77   :  { %v843_v20 = vsel %vm842_vm13, %v2943_v16, %v839_v35 }
 0xf78   :  { %v848_v23 = vsel %vm845_vm14, %v847_v21, %v843_v20 }
 0xf79   :  { %v861_v28 = vsub.f32 1.0, %v848_v23  ;;  %v867_v33 = vmul.f32 %v848_v23, %v3616_v45 }
 0xfb7   :  { %v852_v22 = vpop.permute.xlu2 %851 }
 0xfb8   :  { %v854_v24 = vmul.f32 %v852_v22, %v848_v23 }
 0xfba   :  { %856 = vrot.lane.b32.xlu1 %v854_v24, %s3191_s28 }
0x102c   :  { %v857_v25 = vpop.permute.xlu1 %856 }
0x102d   :  { %v859_v26 = vadd.f32 %v857_v25, %v829_v13 }
0x102f   :  { %2944 = vtanh.f32 %v859_v26 }
0x1035   :  { %v2945_v27 = vpop.eup %2944 }
0x1036   :  { %863 = vrot.lane.b32.xlu0 %v2945_v27, %s3192_s29 }
0x10a8   :  { %v864_v30 = vpop.permute.xlu0 %863 }
0x10a9   :  { %v866_v38 = vmul.f32 %v864_v30, %v861_v28 }
0x10ab   :  { %v3694_v41 = vadd.f32 %v867_v33, %v866_v38 }
0x10ad   :  { %870 = vrot.lane.b32.xlu2 %v3694_v41, %s3192_s29 }
0x1107   :  { %v871_v42 = vpop.permute.xlu2 %870 }
0x1108   :  { %2820 = vmatmul.msk.f32.vlgmr.msra.gmra.mxu0 %vm51_vm0, %v871_v42 }
0x1109   :  { %1540 = vmatpush.msra.mxu0 %v3702_v43 }
0x110b   :  { %1541 = vmatpush.msra.mxu0 %v3708_v46 }
0x110d   :  { %1542 = vmatpush.msra.mxu0 %v3714_v44 }
0x110f   :  { %1543 = vmatpush.msra.mxu0 %v3720_v39 }
0x1185   :  { %v891_v48 = vpop.f32.mrf.mxu0 }
0x1186   :  { %v3729_v52 = vadd.f32 %v3726_v49, %v891_v48 }
0x1188   :  { %v895_v54 = vrot.slane %v3729_v52, 1  ;;  %v896_v55 = vperm.slane %v3729_v52, 0 }
0x118a   :  { %v900_v56 = vadd.f32 %v896_v55, %v3394_v47  ;;  %v897_v37 = vperm.slane %v895_v54, 0 }
0x118c   :  { %2946 = vtanh.f32 %v900_v56  ;;  %v901_v58 = vadd.f32 %v897_v37, %v3408_v53 }
0x118e   :  { %2948 = vtanh.f32 %v901_v58 }
0x1192   :  { %v2947_v59 = vpop.eup %2946 }
0x1193   :  { %v904_v36 = vmul.f32 %v3738_v60, %v2947_v59 }
0x1194   :  { %v2949_v61 = vpop.eup %2948 }
0x1195   :  { %v906_v45 = vsel %vm51_vm0, %v904_v36, 0.0  ;;  %v905_v50 = vmul.f32 %v3738_v60, %v2949_v61 }
0x1196   :  { %907 = vadd.xlane.f32.xlu1 %v906_v45 }
0x1197   :  { %v909_v3 = vsel %vm51_vm0, %v905_v50, 0.0 }
0x1198   :  { %910 = vadd.xlane.f32.xlu0 %v909_v3 }
0x1209   :  { %v908_v5 = vpop.xlane.xlu1 %907 }
0x120a   :  { %v914_v8 = vperm.slane %v908_v5, %v3422_v11 }
0x120b   :  { %v911_v7 = vpop.xlane.xlu0 %910 }
0x120c   :  { %v915_v13 = vperm.slane %v911_v7, %v3422_v11 }
0x120e   :  { %v916_v14 = vsel %vm260_vm6, %v915_v13, %v914_v8 }
0x120f   :  { %v918_v15 = vsel %vm263_vm7, %v916_v14, -inf }
0x1210   :  { %919 = vmax.xlane.f32.xlu2 %v918_v15 }
0x1283   :  { %v920_v31 = vpop.xlane.xlu2 %919 }
0x1284   :  { %v922_v16 = vperm.slane %v920_v31, 0  ;;  %v923_v32 = vperm.slane %v920_v31, 1 }
0x1286   :  { %v926_v51 = vsub.f32 %v908_v5, %v922_v16  ;;  %v927_v34 = vsub.f32 %v911_v7, %v923_v32 }
0x1288   :  { %v928_v35 = vmul.f32 1.442695, %v926_v51  ;;  %v930_v17 = vmul.f32 1.442695, %v927_v34 }
0x128a   :  { %2950 = vpow2.f32 %v928_v35 }
0x128b   :  { %2952 = vpow2.f32 %v930_v17 }
0x1290   :  { %v2951_v10 = vpop.eup %2950 }
0x1291   :  { %v2953_v20 = vpop.eup %2952  ;;  %935 = vperm.xlu1 %2867, %v2951_v10  }
0x1292   :  { %938 = vperm.xlu0 %2869, %v2953_v20  }
0x1299   :  { %1012 = vrot.lane.b32.xlu1 %v895_v54, %s3192_s29 }
0x12a1   :  { %1058 = vrot.lane.b32.xlu1 %v895_v54, %s3190_s27 }
0x1303   :  { %v936_v21 = vpop.permute.xlu1 %935 }
0x1304   :  { %v939_v22 = vpop.permute.xlu0 %938  ;;  %v940_v23 = vperm.slane %v936_v21, %v3422_v11 }
0x1305   :  { %v941_v24 = vperm.slane %v939_v22, %v3422_v11 }
0x1307   :  { %v942_v25 = vsel %vm260_vm6, %v941_v24, %v940_v23 }
0x1308   :  { %v944_v26 = vsel %vm263_vm7, %v942_v25, 0.0 }
0x1309   :  { %945 = vadd.xlane.f32.xlu2 %v944_v26 }
0x130b   :  { %v1013_v24 = vpop.permute.xlu1 %1012 }
0x137c   :  { %v946_v27 = vpop.xlane.xlu2 %945 }
0x137d   :  { %v948_v28 = vperm.slane %v946_v27, 0  ;;  %v949_v30 = vperm.slane %v946_v27, 1 }
0x137f   :  { %2954 = vrcp.f32 %v948_v28  ;;  %v963_v56 = vand.u32 2147483648, %v948_v28  ;;  %v978_v37 = vand.u32 2147483648, %v949_v30  ;;  %v961_v59 = vand.u32 2147483647, %v948_v28 }
0x1380   :  { %2956 = vrcp.f32 %v949_v30  ;;  %v976_v61 = vand.u32 2147483647, %v949_v30  ;;  %vm957_vm4 = vweird.f32 %v948_v28  ;;  %vm972_vm5 = vweird.f32 %v949_v30 }
0x1381   :  { %v964_v3 = vor.u32 1.1754944e-38, %v963_v56  ;;  %v979_v5 = vor.u32 1.1754944e-38, %v978_v37  ;;  %vm962_vm10 = vcmp.eq.f32.partialorder %v961_v59, 8.507059e+37 }
0x1382   :  { %vm977_vm11 = vcmp.eq.f32.partialorder %v976_v61, 8.507059e+37 }
0x1385   :  { %v2955_v33 = vpop.eup %2954 }
0x1386   :  { %v2957_v38 = vpop.eup %2956  ;;  %v953_v42 = vmul.f32 %v2955_v33, %v948_v28  ;;  %vm958_vm15 = vweird.f32 %v2955_v33 }
0x1387   :  { %v968_v48 = vmul.f32 %v2957_v38, %v949_v30  ;;  %vm973_vm3 = vweird.f32 %v2957_v38  ;;  %vm959_vm8 = vmor %vm957_vm4, %vm958_vm15 }
0x1388   :  { %v954_v54 = vsub.f32 1.0, %v953_v42  ;;  %vm974_vm9 = vmor %vm972_vm5, %vm973_vm3 }
0x1389   :  { %v969_v55 = vsub.f32 1.0, %v968_v48 }
0x138a   :  { %v955_v58 = vmul.f32 %v2955_v33, %v954_v54 }
0x138b   :  { %v970_v36 = vmul.f32 %v2957_v38, %v969_v55 }
0x138c   :  { %v956_v45 = vadd.f32 %v2955_v33, %v955_v58 }
0x138d   :  { %v971_v50 = vadd.f32 %v2957_v38, %v970_v36 }
0x138e   :  { %v960_v7 = vsel %vm959_vm8, %v2955_v33, %v956_v45 }
0x138f   :  { %v975_v8 = vsel %vm974_vm9, %v2957_v38, %v971_v50  ;;  %v965_v13 = vsel %vm962_vm10, %v964_v3, %v960_v7 }
0x1390   :  { %v980_v14 = vsel %vm977_vm11, %v979_v5, %v975_v8  ;;  %v966_v15 = vmul.f32 %v2951_v10, %v965_v13 }
0x1391   :  { %v981_v31 = vmul.f32 %v2953_v20, %v980_v14  ;;  %v3763_v20 = vld [vmem:[%s4222_s8] ss:$0 sm:$0xff] }
0x1392   :  { %984 = vperm.xlu0 %2869, %v966_v15   ;;  %v1059_v15 = vpop.permute.xlu1 %1058 }
0x1393   :  { %989 = vperm.xlu2 %2868, %v981_v31  }
0x139a   :  { %1010 = vrot.lane.b32.xlu0 %v3729_v52, %s3192_s29 }
0x139b   :  { %1056 = vrot.lane.b32.xlu2 %v3729_v52, %s3190_s27 }
0x13ed   :  { %v990_v16 = vpop.permute.xlu2 %989 }
0x13ee   :  { %v993_v32 = vmul.f32 %v990_v16, %v3462_v19 }
0x13f0   :  { %v1001_v51 = vsel %vm340_vm2, %v993_v32, 0.0 }
0x13f1   :  { %v1002_v34 = vrot.slane %v1001_v51, 4 }
0x13f3   :  { %v1003_v35 = vadd.f32 %v1002_v34, %v1001_v51 }
0x13f5   :  { %v1004_v17 = vrot.slane %v1003_v35, 2 }
0x13f7   :  { %v1005_v21 = vadd.f32 %v1004_v17, %v1003_v35 }
0x13f9   :  { %v1006_v22 = vrot.slane %v1005_v21, 1 }
0x13fb   :  { %v1007_v10 = vadd.f32 %v1006_v22, %v1005_v21 }
0x13fd   :  { %v1009_v23 = vadd.f32 %v3763_v20, %v1007_v10 }
0x13ff   :  { %v1017_v52 = vadd.f32 %v1013_v24, %v1009_v23 }
0x1401   :  { %v2822_v25 = vmul.f32 -1.442695, %v1017_v52 }
0x1403   :  { %2958 = vpow2.f32 %v2822_v25 }
0x1404   :  { %v985_v26 = vpop.permute.xlu0 %984 }
0x1405   :  { %v992_v27 = vmul.f32 %v985_v26, %v3460_v18  ;;  %v1057_v26 = vpop.permute.xlu2 %1056 }
0x1407   :  { %v994_v28 = vsel %vm340_vm2, %v992_v27, 0.0 }
0x1408   :  { %v995_v30 = vrot.slane %v994_v28, 4 }
0x1409   :  { %v2959_v33 = vpop.eup %2958 }
0x140a   :  { %v1025_v38 = vadd.f32 1.0, %v2959_v33  ;;  %v996_v42 = vadd.f32 %v995_v30, %v994_v28 }
0x140c   :  { %2960 = vrcp.f32 %v1025_v38  ;;  %v997_v48 = vrot.slane %v996_v42, 2  ;;  %v1011_v36 = vpop.permute.xlu0 %1010  ;;  %v1052_v50 = vand.u32 2147483648, %v1025_v38  ;;  %v1050_v5 = vand.u32 2147483647, %v1025_v38 }
0x140d   :  { %vm1046_vm13 = vweird.f32 %v1025_v38 }
0x140e   :  { %v998_v54 = vadd.f32 %v997_v48, %v996_v42  ;;  %v1053_v13 = vor.u32 1.1754944e-38, %v1052_v50  ;;  %vm1051_vm15 = vcmp.eq.f32.partialorder %v1050_v5, 8.507059e+37 }
0x1410   :  { %v999_v55 = vrot.slane %v998_v54, 1 }
0x1412   :  { %v2961_v56 = vpop.eup %2960  ;;  %v1000_v37 = vadd.f32 %v999_v55, %v998_v54 }
0x1413   :  { %v1042_v58 = vmul.f32 %v2961_v56, %v1025_v38  ;;  %vm1047_vm12 = vweird.f32 %v2961_v56 }
0x1414   :  { %v1008_v59 = vadd.f32 %v3763_v20, %v1000_v37  ;;  %vm1048_vm14 = vmor %vm1046_vm13, %vm1047_vm12 }
0x1415   :  { %v1043_v61 = vsub.f32 1.0, %v1042_v58  ;;  %v1088_v58 = vrot.slane %v3694_v41, 1 }
0x1416   :  { %v1016_v45 = vadd.f32 %v1011_v36, %v1008_v59 }
0x1417   :  { %v1044_v3 = vmul.f32 %v2961_v56, %v1043_v61 }
0x1418   :  { %v2821_v7 = vmul.f32 -1.442695, %v1016_v45 }
0x1419   :  { %v1045_v8 = vadd.f32 %v2961_v56, %v1044_v3 }
0x141a   :  { %2962 = vpow2.f32 %v2821_v7 }
0x141b   :  { %v1049_v14 = vsel %vm1048_vm14, %v2961_v56, %v1045_v8 }
0x141c   :  { %v1054_v31 = vsel %vm1051_vm15, %v1053_v13, %v1049_v14  ;;  %v3781_v13 = vld [vmem:[%s4224_s10 + $0x18] sm:$0xff]  ;;  %v3793_v14 = vld [vmem:[%s4224_s10 + $0x8] sm:$0xff] }
0x141d   :  { %v1063_v16 = vmul.f32 %v1059_v15, %v1054_v31  ;;  %v1077_v56 = vsub.f32 1.0, %v1054_v31  ;;  %v1092_v36 = vmul.f32 %v1088_v58, %v1054_v31  ;;  %v3799_v15 = vld [vmem:[%s4224_s10] sm:$0xff] }
0x141f   :  { %1068 = vrot.lane.b32.xlu0 %v1063_v16, %s3191_s28 }
0x1420   :  { %v2963_v32 = vpop.eup %2962 }
0x1421   :  { %v1024_v51 = vadd.f32 1.0, %v2963_v32 }
0x1423   :  { %2964 = vrcp.f32 %v1024_v51  ;;  %v1037_v21 = vand.u32 2147483648, %v1024_v51  ;;  %v1035_v10 = vand.u32 2147483647, %v1024_v51  ;;  %vm1031_vm4 = vweird.f32 %v1024_v51 }
0x1425   :  { %v1038_v52 = vor.u32 1.1754944e-38, %v1037_v21  ;;  %vm1036_vm8 = vcmp.eq.f32.partialorder %v1035_v10, 8.507059e+37 }
0x1429   :  { %v2965_v34 = vpop.eup %2964 }
0x142a   :  { %v1027_v35 = vmul.f32 %v2965_v34, %v1024_v51  ;;  %vm1032_vm3 = vweird.f32 %v2965_v34 }
0x142b   :  { %vm1033_vm5 = vmor %vm1031_vm4, %vm1032_vm3 }
0x142c   :  { %v1028_v17 = vsub.f32 1.0, %v1027_v35 }
0x142e   :  { %v1029_v22 = vmul.f32 %v2965_v34, %v1028_v17 }
0x1430   :  { %v1030_v24 = vadd.f32 %v2965_v34, %v1029_v22 }
0x1432   :  { %v1034_v25 = vsel %vm1033_vm5, %v2965_v34, %v1030_v24 }
0x1433   :  { %v1039_v27 = vsel %vm1036_vm8, %v1038_v52, %v1034_v25 }
0x1434   :  { %v1062_v28 = vmul.f32 %v1057_v26, %v1039_v27  ;;  %v1076_v45 = vsub.f32 1.0, %v1039_v27 }
0x1436   :  { %1066 = vrot.lane.b32.xlu1 %v1062_v28, %s3191_s28 }
0x1491   :  { %v1069_v30 = vpop.permute.xlu0 %1068 }
0x1492   :  { %v1073_v33 = vadd.f32 %v1069_v30, %v1009_v23  ;;  %v1091_v23 = vmul.f32 %v1039_v27, %v3694_v41  ;;  %v3787_v41 = vld [vmem:[%s4224_s10 + $0x10] sm:$0xff] }
0x1494   :  { %2966 = vtanh.f32 %v1073_v33 }
0x149a   :  { %v2967_v38 = vpop.eup %2966 }
0x149b   :  { %1082 = vrot.lane.b32.xlu2 %v2967_v38, %s3192_s29 }
0x14a8   :  { %v1067_v42 = vpop.permute.xlu1 %1066 }
0x14a9   :  { %v1072_v48 = vadd.f32 %v1067_v42, %v1008_v59 }
0x14ab   :  { %2968 = vtanh.f32 %v1072_v48 }
0x14b1   :  { %v2969_v54 = vpop.eup %2968 }
0x14b2   :  { %1080 = vrot.lane.b32.xlu0 %v2969_v54, %s3192_s29 }
0x14f5   :  { %v1083_v55 = vpop.permute.xlu2 %1082 }
0x14f6   :  { %v1087_v37 = vmul.f32 %v1083_v55, %v1077_v56 }
0x14f8   :  { %v1094_v61 = vadd.f32 %v1092_v36, %v1087_v37 }
0x14fa   :  { %v1097_v5 = vrot.slane %v1094_v61, 7 }
0x1524   :  { %v1081_v50 = vpop.permute.xlu0 %1080 }
0x1525   :  { %v1086_v3 = vmul.f32 %v1081_v50, %v1076_v45 }
0x1527   :  { %v1093_v7 = vadd.f32 %v1091_v23, %v1086_v3 }
0x1529   :  { %v1098_v59 = vsel %vm260_vm6, %v1097_v5, %v1093_v7 }
0x152a   :  { %1099 = vrot.lane.b32.xlu1 %v1098_v59, %s3192_s29 }
0x159c   :  { %v1100_v8 = vpop.permute.xlu1 %1099 }
0x159d   :  { %2823 = vmatmul.msk.f32.vlgmr.msra.gmra.mxu1 %vm51_vm0, %v1100_v8 }
0x159e   :  { %1769 = vmatpush.msra.mxu1 %v3781_v13 }
0x15a0   :  { %1770 = vmatpush.msra.mxu1 %v3787_v41 }
0x15a2   :  { %1771 = vmatpush.msra.mxu1 %v3793_v14 }
0x15a4   :  { %1772 = vmatpush.msra.mxu1 %v3799_v15 }
0x161a   :  { %v1120_v31 = vpop.f32.mrf.mxu1 }
0x161b   :  { %v3803_v16 = vadd.f32 %v3548_v40, %v1120_v31 }
0x161d   :  { %2970 = vtanh.f32 %v3803_v16 }
0x1623   :  { %v2971_v32 = vpop.eup %2970 }
0x1624   :  { %v1134_v51 = vsel %vm51_vm0, %v2971_v32, %v1098_v59 }
0x1625   :  { %2825 = vmatmul.msk.f32.vlgmr.msra.gmra.mxu2 %vm146_vm1, %v1134_v51 }
0x1626   :  { %2454 = vmatpush.msra.mxu2 %v3624_v62 }
0x1628   :  { %2455 = vmatpush.msra.mxu2 %v3630_v29 }
0x162a   :  { %2456 = vmatpush.msra.mxu2 %v3636_v57 }
0x162c   :  { %2457 = vmatpush.msra.mxu2 %v3642_v63 }
0x162e   :  { %2458 = vmatpush.msra.mxu2 %v3648_v6 }
0x1630   :  { %2459 = vmatpush.msra.mxu2 %v3654_v9 }
0x1632   :  { %2460 = vmatpush.msra.mxu2 %v3660_v0 }
0x1634   :  { %2461 = vmatpush.msra.mxu2 %v3666_v2 }
0x16a8   :  { %v1155_v40 = vpop.f32.mrf.mxu2 }
0x16a9   :  { %v1156_v34 = vadd.f32 %v3687_v12, %v1155_v40 }
0x16ab   :  { %1178 = vrot.lane.b32.xlu2 %v1156_v34, %s3190_s27  ;;  %v2826_v62 = vmul.f32 -1.442695, %v1156_v34 }
0x16ad   :  { %2972 = vpow2.f32 %v2826_v62 }
0x16b3   :  { %v2973_v29 = vpop.eup %2972 }
0x16b4   :  { %v1161_v35 = vadd.f32 1.0, %v2973_v29 }
0x16b6   :  { %2974 = vrcp.f32 %v1161_v35  ;;  %v1173_v9 = vand.u32 2147483648, %v1161_v35  ;;  %vm1167_vm10 = vweird.f32 %v1161_v35  ;;  %v1171_v0 = vand.u32 2147483647, %v1161_v35 }
0x16b8   :  { %v1174_v22 = vor.u32 1.1754944e-38, %v1173_v9  ;;  %vm1172_vm12 = vcmp.eq.f32.partialorder %v1171_v0, 8.507059e+37 }
0x16bc   :  { %v2975_v57 = vpop.eup %2974 }
0x16bd   :  { %v1163_v63 = vmul.f32 %v2975_v57, %v1161_v35  ;;  %vm1168_vm9 = vweird.f32 %v2975_v57 }
0x16be   :  { %vm1169_vm11 = vmor %vm1167_vm10, %vm1168_vm9 }
0x16bf   :  { %v1164_v17 = vsub.f32 1.0, %v1163_v63 }
0x16c1   :  { %v1165_v6 = vmul.f32 %v2975_v57, %v1164_v17 }
0x16c3   :  { %v1166_v21 = vadd.f32 %v2975_v57, %v1165_v6 }
0x16c5   :  { %v1170_v2 = vsel %vm1169_vm11, %v2975_v57, %v1166_v21 }
0x16c6   :  { %v1175_v24 = vsel %vm1172_vm12, %v1174_v22, %v1170_v2 }
0x16c7   :  { %v1188_v28 = vsub.f32 1.0, %v1175_v24  ;;  %v1194_v33 = vmul.f32 %v1175_v24, %v1098_v59 }
0x1705   :  { %v1179_v10 = vpop.permute.xlu2 %1178 }
0x1706   :  { %v1181_v52 = vmul.f32 %v1179_v10, %v1175_v24 }
0x1708   :  { %1183 = vrot.lane.b32.xlu0 %v1181_v52, %s3191_s28 }
0x177a   :  { %v1184_v25 = vpop.permute.xlu0 %1183 }
0x177b   :  { %v1186_v26 = vadd.f32 %v1184_v25, %v1156_v34 }
0x177d   :  { %2976 = vtanh.f32 %v1186_v26 }
0x1783   :  { %v2977_v27 = vpop.eup %2976 }
0x1784   :  { %1190 = vrot.lane.b32.xlu1 %v2977_v27, %s3192_s29 }
0x17f6   :  { %v1191_v30 = vpop.permute.xlu1 %1190 }
0x17f7   :  { %v1193_v38 = vmul.f32 %v1191_v30, %v1188_v28 }
0x17f9   :  { %v3820_v42 = vadd.f32 %v1194_v33, %v1193_v38 }
0x17fb   :  { %1197 = vrot.lane.b32.xlu2 %v3820_v42, %s3192_s29 }
0x1855   :  { %v1198_v48 = vpop.permute.xlu2 %1197 }
0x1856   :  { %2827 = vmatmul.msk.f32.vlgmr.msrb.gmra.mxu0 %vm51_vm0, %v1198_v48 }
0x1857   :  { %1867 = vmatpush.msrb.mxu0 %v3702_v43 }
0x1859   :  { %1868 = vmatpush.msrb.mxu0 %v3708_v46 }
0x185b   :  { %1869 = vmatpush.msrb.mxu0 %v3714_v44 }
0x185d   :  { %1870 = vmatpush.msrb.mxu0 %v3720_v39 }
0x18d3   :  { %v1218_v54 = vpop.f32.mrf.mxu0 }
0x18d4   :  { %v3830_v55 = vadd.f32 %v3726_v49, %v1218_v54 }
0x18d6   :  { %v3833_v56 = vrot.slane %v3830_v55, 1  ;;  %v1223_v37 = vperm.slane %v3830_v55, 0 }
0x18d8   :  { %v1227_v58 = vadd.f32 %v1223_v37, %v3394_v47  ;;  %v1224_v36 = vperm.slane %v3833_v56, 0 }
0x18da   :  { %2978 = vtanh.f32 %v1227_v58  ;;  %v1228_v61 = vadd.f32 %v1224_v36, %v3408_v53 }
0x18dc   :  { %2980 = vtanh.f32 %v1228_v61 }
0x18e0   :  { %v2979_v45 = vpop.eup %2978 }
0x18e1   :  { %v1231_v50 = vmul.f32 %v3738_v60, %v2979_v45 }
0x18e2   :  { %v2981_v23 = vpop.eup %2980 }
0x18e3   :  { %v1233_v3 = vsel %vm51_vm0, %v1231_v50, 0.0  ;;  %v1232_v5 = vmul.f32 %v3738_v60, %v2981_v23 }
0x18e4   :  { %1234 = vadd.xlane.f32.xlu0 %v1233_v3 }
0x18e5   :  { %v1236_v7 = vsel %vm51_vm0, %v1232_v5, 0.0 }
0x18e6   :  { %1237 = vadd.xlane.f32.xlu1 %v1236_v7 }
0x1957   :  { %v1235_v59 = vpop.xlane.xlu0 %1234 }
0x1958   :  { %v1241_v31 = vperm.slane %v1235_v59, %v3422_v11 }
0x1959   :  { %v1238_v8 = vpop.xlane.xlu1 %1237 }
0x195a   :  { %v1242_v32 = vperm.slane %v1238_v8, %v3422_v11 }
0x195c   :  { %v1243_v51 = vsel %vm260_vm6, %v1242_v32, %v1241_v31 }
0x195d   :  { %v1245_v40 = vsel %vm263_vm7, %v1243_v51, -inf }
0x195e   :  { %1246 = vmax.xlane.f32.xlu2 %v1245_v40 }
0x19d1   :  { %v1247_v34 = vpop.xlane.xlu2 %1246 }
0x19d2   :  { %v1249_v62 = vperm.slane %v1247_v34, 0  ;;  %v1250_v29 = vperm.slane %v1247_v34, 1 }
0x19d4   :  { %v1253_v35 = vsub.f32 %v1235_v59, %v1249_v62  ;;  %v1254_v57 = vsub.f32 %v1238_v8, %v1250_v29 }
0x19d6   :  { %v1255_v63 = vmul.f32 1.442695, %v1253_v35  ;;  %v1257_v17 = vmul.f32 1.442695, %v1254_v57 }
0x19d8   :  { %2982 = vpow2.f32 %v1255_v63 }
0x19d9   :  { %2984 = vpow2.f32 %v1257_v17 }
0x19de   :  { %v2983_v6 = vpop.eup %2982 }
0x19df   :  { %v2985_v21 = vpop.eup %2984  ;;  %1262 = vperm.xlu0 %2869, %v2983_v6  }
0x19e0   :  { %1265 = vperm.xlu1 %2867, %v2985_v21  }
0x19e8   :  { %1337 = vrot.lane.b32.xlu1 %v3830_v55, %s3192_s29 }
0x1a51   :  { %v1263_v9 = vpop.permute.xlu0 %1262 }
0x1a52   :  { %v1266_v0 = vpop.permute.xlu1 %1265  ;;  %v1267_v2 = vperm.slane %v1263_v9, %v3422_v11 }
0x1a53   :  { %v1268_v22 = vperm.slane %v1266_v0, %v3422_v11 }
0x1a55   :  { %v1269_v10 = vsel %vm260_vm6, %v1268_v22, %v1267_v2 }
0x1a56   :  { %v1271_v24 = vsel %vm263_vm7, %v1269_v10, 0.0 }
0x1a57   :  { %1272 = vadd.xlane.f32.xlu2 %v1271_v24 }
0x1aca   :  { %v1273_v52 = vpop.xlane.xlu2 %1272 }
0x1acb   :  { %v1275_v25 = vperm.slane %v1273_v52, 0  ;;  %v1276_v26 = vperm.slane %v1273_v52, 1 }
0x1acd   :  { %2986 = vrcp.f32 %v1275_v25  ;;  %v1290_v54 = vand.u32 2147483648, %v1275_v25  ;;  %v1305_v37 = vand.u32 2147483648, %v1276_v26  ;;  %v1288_v36 = vand.u32 2147483647, %v1275_v25 }
0x1ace   :  { %2988 = vrcp.f32 %v1276_v26  ;;  %v1303_v45 = vand.u32 2147483647, %v1276_v26  ;;  %vm1284_vm15 = vweird.f32 %v1275_v25  ;;  %vm1299_vm3 = vweird.f32 %v1276_v26 }
0x1acf   :  { %v1291_v3 = vor.u32 1.1754944e-38, %v1290_v54  ;;  %v1306_v5 = vor.u32 1.1754944e-38, %v1305_v37  ;;  %vm1289_vm8 = vcmp.eq.f32.partialorder %v1288_v36, 8.507059e+37 }
0x1ad0   :  { %vm1304_vm9 = vcmp.eq.f32.partialorder %v1303_v45, 8.507059e+37 }
0x1ad3   :  { %v2987_v27 = vpop.eup %2986 }
0x1ad4   :  { %v2989_v28 = vpop.eup %2988  ;;  %v1280_v30 = vmul.f32 %v2987_v27, %v1275_v25  ;;  %vm1285_vm13 = vweird.f32 %v2987_v27 }
0x1ad5   :  { %v1295_v33 = vmul.f32 %v2989_v28, %v1276_v26  ;;  %vm1300_vm14 = vweird.f32 %v2989_v28  ;;  %vm1286_vm4 = vmor %vm1284_vm15, %vm1285_vm13 }
0x1ad6   :  { %v1281_v38 = vsub.f32 1.0, %v1280_v30  ;;  %vm1301_vm5 = vmor %vm1299_vm3, %vm1300_vm14  ;;  %v1338_v30 = vpop.permute.xlu1 %1337 }
0x1ad7   :  { %v1296_v48 = vsub.f32 1.0, %v1295_v33 }
0x1ad8   :  { %v1282_v58 = vmul.f32 %v2987_v27, %v1281_v38 }
0x1ad9   :  { %v1297_v61 = vmul.f32 %v2989_v28, %v1296_v48 }
0x1ada   :  { %v1283_v50 = vadd.f32 %v2987_v27, %v1282_v58 }
0x1adb   :  { %v1298_v23 = vadd.f32 %v2989_v28, %v1297_v61 }
0x1adc   :  { %v1287_v7 = vsel %vm1286_vm4, %v2987_v27, %v1283_v50 }
0x1add   :  { %v1302_v59 = vsel %vm1301_vm5, %v2989_v28, %v1298_v23  ;;  %v1292_v8 = vsel %vm1289_vm8, %v1291_v3, %v1287_v7 }
0x1ade   :  { %v1307_v31 = vsel %vm1304_vm9, %v1306_v5, %v1302_v59  ;;  %v1293_v32 = vmul.f32 %v2983_v6, %v1292_v8 }
0x1adf   :  { %v1308_v51 = vmul.f32 %v2985_v21, %v1307_v31 }
0x1ae0   :  { %1311 = vperm.xlu0 %2869, %v1293_v32  }
0x1ae1   :  { %1316 = vperm.xlu2 %2868, %v1308_v51  }
0x1ae8   :  { %1339 = vrot.lane.b32.xlu0 %v3833_v56, %s3192_s29 }
0x1ae9   :  { %1385 = vrot.lane.b32.xlu2 %v3833_v56, %s3190_s27 }
0x1af0   :  { %1383 = vrot.lane.b32.xlu0 %v3830_v55, %s3190_s27 }
0x1b3b   :  { %v1317_v40 = vpop.permute.xlu2 %1316 }
0x1b3c   :  { %v1320_v34 = vmul.f32 %v1317_v40, %v3462_v19 }
0x1b3e   :  { %v1328_v62 = vsel %vm340_vm2, %v1320_v34, 0.0 }
0x1b3f   :  { %v1329_v29 = vrot.slane %v1328_v62, 4 }
0x1b41   :  { %v1330_v35 = vadd.f32 %v1329_v29, %v1328_v62 }
0x1b43   :  { %v1331_v57 = vrot.slane %v1330_v35, 2  ;;  %v1386_v32 = vpop.permute.xlu2 %1385 }
0x1b45   :  { %v1332_v63 = vadd.f32 %v1331_v57, %v1330_v35 }
0x1b47   :  { %v1333_v17 = vrot.slane %v1332_v63, 1 }
0x1b49   :  { %v1334_v0 = vadd.f32 %v1333_v17, %v1332_v63 }
0x1b4b   :  { %v1336_v55 = vadd.f32 %v3763_v20, %v1334_v0 }
0x1b52   :  { %v1312_v6 = vpop.permute.xlu0 %1311 }
0x1b53   :  { %v1319_v21 = vmul.f32 %v1312_v6, %v3460_v18 }
0x1b55   :  { %v1321_v9 = vsel %vm340_vm2, %v1319_v21, 0.0 }
0x1b56   :  { %v1322_v56 = vrot.slane %v1321_v9, 4 }
0x1b58   :  { %v1323_v2 = vadd.f32 %v1322_v56, %v1321_v9 }
0x1b5a   :  { %v1324_v22 = vrot.slane %v1323_v2, 2  ;;  %v1340_v10 = vpop.permute.xlu0 %1339 }
0x1b5b   :  { %v1344_v24 = vadd.f32 %v1340_v10, %v1336_v55 }
0x1b5c   :  { %v1325_v52 = vadd.f32 %v1324_v22, %v1323_v2 }
0x1b5d   :  { %v2829_v25 = vmul.f32 -1.442695, %v1344_v24 }
0x1b5e   :  { %v1326_v26 = vrot.slane %v1325_v52, 1 }
0x1b5f   :  { %2990 = vpow2.f32 %v2829_v25 }
0x1b60   :  { %v1327_v27 = vadd.f32 %v1326_v26, %v1325_v52 }
0x1b62   :  { %v1335_v28 = vadd.f32 %v3763_v20, %v1327_v27  ;;  %v1384_v21 = vpop.permute.xlu0 %1383  ;;  %v1415_v27 = vrot.slane %v3820_v42, 1 }
0x1b64   :  { %v1343_v33 = vadd.f32 %v1338_v30, %v1335_v28 }
0x1b65   :  { %v2991_v38 = vpop.eup %2990 }
0x1b66   :  { %v2828_v48 = vmul.f32 -1.442695, %v1343_v33  ;;  %v1352_v54 = vadd.f32 1.0, %v2991_v38 }
0x1b68   :  { %2992 = vpow2.f32 %v2828_v48  ;;  %v1379_v50 = vand.u32 2147483648, %v1352_v54  ;;  %v1377_v3 = vand.u32 2147483647, %v1352_v54  ;;  %vm1373_vm11 = vweird.f32 %v1352_v54 }
0x1b69   :  { %2994 = vrcp.f32 %v1352_v54 }
0x1b6a   :  { %v1380_v59 = vor.u32 1.1754944e-38, %v1379_v50  ;;  %vm1378_vm13 = vcmp.eq.f32.partialorder %v1377_v3, 8.507059e+37 }
0x1b6e   :  { %v2993_v37 = vpop.eup %2992 }
0x1b6f   :  { %v2995_v58 = vpop.eup %2994  ;;  %v1351_v36 = vadd.f32 1.0, %v2993_v37 }
0x1b70   :  { %v1369_v61 = vmul.f32 %v2995_v58, %v1352_v54  ;;  %vm1374_vm10 = vweird.f32 %v2995_v58 }
0x1b71   :  { %2996 = vrcp.f32 %v1351_v36  ;;  %vm1375_vm12 = vmor %vm1373_vm11, %vm1374_vm10  ;;  %v1364_v62 = vand.u32 2147483648, %v1351_v36  ;;  %v1362_v35 = vand.u32 2147483647, %v1351_v36  ;;  %vm1358_vm15 = vweird.f32 %v1351_v36 }
0x1b72   :  { %v1370_v45 = vsub.f32 1.0, %v1369_v61 }
0x1b73   :  { %v1365_v63 = vor.u32 1.1754944e-38, %v1364_v62  ;;  %vm1363_vm4 = vcmp.eq.f32.partialorder %v1362_v35, 8.507059e+37 }
0x1b74   :  { %v1371_v23 = vmul.f32 %v2995_v58, %v1370_v45 }
0x1b76   :  { %v1372_v5 = vadd.f32 %v2995_v58, %v1371_v23 }
0x1b77   :  { %v2997_v7 = vpop.eup %2996 }
0x1b78   :  { %v1354_v8 = vmul.f32 %v2997_v7, %v1351_v36  ;;  %v1376_v31 = vsel %vm1375_vm12, %v2995_v58, %v1372_v5  ;;  %vm1359_vm14 = vweird.f32 %v2997_v7 }
0x1b79   :  { %v1381_v51 = vsel %vm1378_vm13, %v1380_v59, %v1376_v31  ;;  %vm1360_vm3 = vmor %vm1358_vm15, %vm1359_vm14 }
0x1b7a   :  { %v1355_v40 = vsub.f32 1.0, %v1354_v8  ;;  %v1390_v34 = vmul.f32 %v1386_v32, %v1381_v51  ;;  %v1404_v26 = vsub.f32 1.0, %v1381_v51  ;;  %v1419_v48 = vmul.f32 %v1415_v27, %v1381_v51 }
0x1b7c   :  { %v1356_v29 = vmul.f32 %v2997_v7, %v1355_v40  ;;  %1395 = vrot.lane.b32.xlu1 %v1390_v34, %s3191_s28 }
0x1b7e   :  { %v1357_v57 = vadd.f32 %v2997_v7, %v1356_v29 }
0x1b80   :  { %v1361_v17 = vsel %vm1360_vm3, %v2997_v7, %v1357_v57 }
0x1b81   :  { %v1366_v6 = vsel %vm1363_vm4, %v1365_v63, %v1361_v17 }
0x1b82   :  { %v1389_v9 = vmul.f32 %v1384_v21, %v1366_v6  ;;  %v1403_v25 = vsub.f32 1.0, %v1366_v6 }
0x1b84   :  { %1393 = vrot.lane.b32.xlu2 %v1389_v9, %s3191_s28 }
0x1bde   :  { %v1394_v0 = vpop.permute.xlu2 %1393 }
0x1bdf   :  { %v1399_v56 = vadd.f32 %v1394_v0, %v1335_v28  ;;  %v1418_v28 = vmul.f32 %v1366_v6, %v3820_v42  ;;  %v3881_v42 = vld [vmem:[%s4225_s11] ss:$0 sm:$0xff] }
0x1be1   :  { %2998 = vtanh.f32 %v1399_v56 }
0x1be7   :  { %v2999_v2 = vpop.eup %2998 }
0x1be8   :  { %1407 = vrot.lane.b32.xlu1 %v2999_v2, %s3192_s29 }
0x1bee   :  { %v1396_v22 = vpop.permute.xlu1 %1395 }
0x1bef   :  { %v1400_v10 = vadd.f32 %v1396_v22, %v1336_v55 }
0x1bf1   :  { %3000 = vtanh.f32 %v1400_v10 }
0x1bf7   :  { %v3001_v24 = vpop.eup %3000 }
0x1bf8   :  { %1409 = vrot.lane.b32.xlu0 %v3001_v24, %s3192_s29 }
0x1c5a   :  { %v1408_v52 = vpop.permute.xlu1 %1407 }
0x1c5b   :  { %v1413_v33 = vmul.f32 %v1408_v52, %v1403_v25 }
0x1c5d   :  { %v1420_v37 = vadd.f32 %v1418_v28, %v1413_v33 }
0x1c6a   :  { %v1410_v30 = vpop.permute.xlu0 %1409 }
0x1c6b   :  { %v1414_v38 = vmul.f32 %v1410_v30, %v1404_v26 }
0x1c6d   :  { %v1421_v54 = vadd.f32 %v1419_v48, %v1414_v38 }
0x1c6f   :  { %v1424_v58 = vrot.slane %v1421_v54, 7 }
0x1c71   :  { %v1425_v55 = vsel %vm260_vm6, %v1424_v58, %v1420_v37 }
0x1c72   :  { %1426 = vrot.lane.b32.xlu2 %v1425_v55, %s3192_s29 }
0x1ccc   :  { %v1427_v36 = vpop.permute.xlu2 %1426 }
0x1ccd   :  { %2830 = vmatmul.msk.f32.vlgmr.msrb.gmra.mxu1 %vm51_vm0, %v1427_v36 }
0x1cce   :  { %2096 = vmatpush.msrb.mxu1 %v3781_v13 }
0x1cd0   :  { %2097 = vmatpush.msrb.mxu1 %v3787_v41 }
0x1cd2   :  { %2098 = vmatpush.msrb.mxu1 %v3793_v14 }
0x1cd4   :  { %2099 = vmatpush.msrb.mxu1 %v3799_v15 }
0x1d4a   :  { %v1447_v61 = vpop.f32.mrf.mxu1 }
0x1d4b   :  { %v3884_v45 = vadd.f32 %v3881_v42, %v1447_v61 }
0x1d4d   :  { %3002 = vtanh.f32 %v3884_v45 }
0x1d53   :  { %v3003_v50 = vpop.eup %3002 }
0x1d54   :  { %v1461_v23 = vsel %vm51_vm0, %v3003_v50, %v1425_v55 }
0x1d55   :  { %2832 = vmatmul.msk.f32.vlgmr.msrb.gmra.mxu3 %vm146_vm1, %v1461_v23 }
0x1dd8   :  { %v1482_v3 = vpop.f32.mrf.mxu3 }
0x1dd9   :  { %v1483_v5 = vadd.f32 %v3687_v12, %v1482_v3 }
0x1ddb   :  { %1505 = vrot.lane.b32.xlu0 %v1483_v5, %s3190_s27  ;;  %v2833_v7 = vmul.f32 -1.442695, %v1483_v5 }
0x1ddd   :  { %3004 = vpow2.f32 %v2833_v7 }
0x1de3   :  { %v3005_v59 = vpop.eup %3004 }
0x1de4   :  { %v1488_v8 = vadd.f32 1.0, %v3005_v59 }
0x1de6   :  { %3006 = vrcp.f32 %v1488_v8  ;;  %v1500_v62 = vand.u32 2147483648, %v1488_v8  ;;  %vm1494_vm8 = vweird.f32 %v1488_v8  ;;  %v1498_v29 = vand.u32 2147483647, %v1488_v8 }
0x1de8   :  { %v1501_v57 = vor.u32 1.1754944e-38, %v1500_v62  ;;  %vm1499_vm10 = vcmp.eq.f32.partialorder %v1498_v29, 8.507059e+37 }
0x1dec   :  { %v3007_v31 = vpop.eup %3006 }
0x1ded   :  { %v1490_v32 = vmul.f32 %v3007_v31, %v1488_v8  ;;  %vm1495_vm5 = vweird.f32 %v3007_v31 }
0x1dee   :  { %vm1496_vm9 = vmor %vm1494_vm8, %vm1495_vm5 }
0x1def   :  { %v1491_v51 = vsub.f32 1.0, %v1490_v32 }
0x1df1   :  { %v1492_v40 = vmul.f32 %v3007_v31, %v1491_v51 }
0x1df3   :  { %v1493_v34 = vadd.f32 %v3007_v31, %v1492_v40 }
0x1df5   :  { %v1497_v35 = vsel %vm1496_vm9, %v3007_v31, %v1493_v34 }
0x1df6   :  { %v1502_v63 = vsel %vm1499_vm10, %v1501_v57, %v1497_v35 }
0x1df7   :  { %v1515_v0 = vsub.f32 1.0, %v1502_v63  ;;  %v1521_v2 = vmul.f32 %v1502_v63, %v1425_v55 }
0x1e4d   :  { %v1506_v12 = vpop.permute.xlu0 %1505 }
0x1e4e   :  { %v1508_v17 = vmul.f32 %v1506_v12, %v1502_v63 }
0x1e50   :  { %1510 = vrot.lane.b32.xlu1 %v1508_v17, %s3191_s28 }
0x1ec2   :  { %v1511_v6 = vpop.permute.xlu1 %1510 }
0x1ec3   :  { %v1513_v21 = vadd.f32 %v1511_v6, %v1483_v5 }
0x1ec5   :  { %3008 = vtanh.f32 %v1513_v21 }
0x1ecb   :  { %v3009_v9 = vpop.eup %3008 }
0x1ecc   :  { %1517 = vrot.lane.b32.xlu2 %v3009_v9, %s3192_s29 }
0x1f26   :  { %v1518_v56 = vpop.permute.xlu2 %1517 }
0x1f27   :  { %v1520_v22 = vmul.f32 %v1518_v56, %v1515_v0 }
0x1f29   :  { %v3893_v10 = vadd.f32 %v1521_v2, %v1520_v22 }
0x1f2b   :  { %1524 = vrot.lane.b32.xlu0 %v3893_v10, %s3192_s29 }
0x1f9d   :  { %v1525_v24 = vpop.permute.xlu0 %1524 }
0x1f9e   :  { %2834 = vmatmul.msk.f32.vlgmr.msra.gmra.mxu0 %vm51_vm0, %v1525_v24 }
0x1f9f   :  { %2194 = vmatpush.msra.mxu0 %v3702_v43 }
0x1fa1   :  { %2195 = vmatpush.msra.mxu0 %v3708_v46 }
0x1fa3   :  { %2196 = vmatpush.msra.mxu0 %v3714_v44 }
0x1fa5   :  { %2197 = vmatpush.msra.mxu0 %v3720_v39 }
0x201b   :  { %v1545_v52 = vpop.f32.mrf.mxu0 }
0x201c   :  { %v3903_v25 = vadd.f32 %v3726_v49, %v1545_v52 }
0x201e   :  { %v3906_v26 = vrot.slane %v3903_v25, 1  ;;  %v1550_v27 = vperm.slane %v3903_v25, 0 }
0x2020   :  { %v1554_v30 = vadd.f32 %v1550_v27, %v3394_v47  ;;  %v1551_v33 = vperm.slane %v3906_v26, 0 }
0x2022   :  { %3010 = vtanh.f32 %v1554_v30  ;;  %v1555_v43 = vadd.f32 %v1551_v33, %v3408_v53 }
0x2024   :  { %3012 = vtanh.f32 %v1555_v43 }
0x2028   :  { %v3011_v46 = vpop.eup %3010 }
0x2029   :  { %v1558_v44 = vmul.f32 %v3738_v60, %v3011_v46 }
0x202a   :  { %v3013_v39 = vpop.eup %3012 }
0x202b   :  { %v1560_v49 = vsel %vm51_vm0, %v1558_v44, 0.0  ;;  %v1559_v38 = vmul.f32 %v3738_v60, %v3013_v39 }
0x202c   :  { %1561 = vadd.xlane.f32.xlu1 %v1560_v49 }
0x202d   :  { %v1563_v48 = vsel %vm51_vm0, %v1559_v38, 0.0 }
0x202e   :  { %1564 = vadd.xlane.f32.xlu2 %v1563_v48 }
0x209f   :  { %v1562_v28 = vpop.xlane.xlu1 %1561 }
0x20a0   :  { %v1568_v37 = vperm.slane %v1562_v28, %v3422_v11 }
0x20a1   :  { %v1565_v54 = vpop.xlane.xlu2 %1564 }
0x20a2   :  { %v1569_v58 = vperm.slane %v1565_v54, %v3422_v11 }
0x20a4   :  { %v1570_v55 = vsel %vm260_vm6, %v1569_v58, %v1568_v37 }
0x20a5   :  { %v1572_v36 = vsel %vm263_vm7, %v1570_v55, -inf }
0x20a6   :  { %1573 = vmax.xlane.f32.xlu0 %v1572_v36 }
0x2119   :  { %v1574_v61 = vpop.xlane.xlu0 %1573 }
0x211a   :  { %v1576_v50 = vperm.slane %v1574_v61, 0  ;;  %v1577_v23 = vperm.slane %v1574_v61, 1 }
0x211c   :  { %v1580_v3 = vsub.f32 %v1562_v28, %v1576_v50  ;;  %v1581_v60 = vsub.f32 %v1565_v54, %v1577_v23 }
0x211e   :  { %v1582_v5 = vmul.f32 1.442695, %v1580_v3  ;;  %v1584_v7 = vmul.f32 1.442695, %v1581_v60 }
0x2120   :  { %3014 = vpow2.f32 %v1582_v5 }
0x2121   :  { %3016 = vpow2.f32 %v1584_v7 }
0x2126   :  { %v3015_v59 = vpop.eup %3014 }
0x2127   :  { %v3017_v8 = vpop.eup %3016  ;;  %1589 = vperm.xlu1 %2867, %v3015_v59  }
0x2128   :  { %1592 = vperm.xlu2 %2868, %v3017_v8  }
0x2130   :  { %1666 = vrot.lane.b32.xlu2 %v3906_v26, %s3192_s29 }
0x2138   :  { %1710 = vrot.lane.b32.xlu2 %v3903_v25, %s3190_s27 }
0x2182   :  { %v1593_v31 = vpop.permute.xlu2 %1592 }
0x2183   :  { %v1595_v51 = vperm.slane %v1593_v31, %v3422_v11 }
0x2199   :  { %v1590_v32 = vpop.permute.xlu1 %1589 }
0x219a   :  { %v1594_v40 = vperm.slane %v1590_v32, %v3422_v11 }
0x219c   :  { %v1596_v34 = vsel %vm260_vm6, %v1595_v51, %v1594_v40 }
0x219d   :  { %v1598_v62 = vsel %vm263_vm7, %v1596_v34, 0.0  ;;  %v1667_v34 = vpop.permute.xlu2 %1666 }
0x219e   :  { %1599 = vadd.xlane.f32.xlu0 %v1598_v62 }
0x2211   :  { %v1600_v29 = vpop.xlane.xlu0 %1599 }
0x2212   :  { %v1602_v35 = vperm.slane %v1600_v29, 0  ;;  %v1603_v57 = vperm.slane %v1600_v29, 1 }
0x2214   :  { %3018 = vrcp.f32 %v1602_v35  ;;  %v1617_v0 = vand.u32 2147483648, %v1602_v35  ;;  %v1632_v56 = vand.u32 2147483648, %v1603_v57  ;;  %v1615_v22 = vand.u32 2147483647, %v1602_v35 }
0x2215   :  { %3020 = vrcp.f32 %v1603_v57  ;;  %v1630_v52 = vand.u32 2147483647, %v1603_v57  ;;  %vm1611_vm13 = vweird.f32 %v1602_v35  ;;  %vm1626_vm14 = vweird.f32 %v1603_v57 }
0x2216   :  { %v1618_v33 = vor.u32 1.1754944e-38, %v1617_v0  ;;  %v1633_v43 = vor.u32 1.1754944e-38, %v1632_v56  ;;  %vm1616_vm4 = vcmp.eq.f32.partialorder %v1615_v22, 8.507059e+37 }
0x2217   :  { %vm1631_vm5 = vcmp.eq.f32.partialorder %v1630_v52, 8.507059e+37 }
0x221a   :  { %v3019_v12 = vpop.eup %3018 }
0x221b   :  { %v3021_v63 = vpop.eup %3020  ;;  %v1607_v17 = vmul.f32 %v3019_v12, %v1602_v35  ;;  %vm1612_vm11 = vweird.f32 %v3019_v12 }
0x221c   :  { %v1622_v6 = vmul.f32 %v3021_v63, %v1603_v57  ;;  %vm1627_vm12 = vweird.f32 %v3021_v63  ;;  %vm1613_vm15 = vmor %vm1611_vm13, %vm1612_vm11 }
0x221d   :  { %v1608_v21 = vsub.f32 1.0, %v1607_v17  ;;  %vm1628_vm3 = vmor %vm1626_vm14, %vm1627_vm12 }
0x221e   :  { %v1623_v9 = vsub.f32 1.0, %v1622_v6 }
0x221f   :  { %v1609_v2 = vmul.f32 %v3019_v12, %v1608_v21 }
0x2220   :  { %v1624_v24 = vmul.f32 %v3021_v63, %v1623_v9 }
0x2221   :  { %v1610_v27 = vadd.f32 %v3019_v12, %v1609_v2 }
0x2222   :  { %v1625_v30 = vadd.f32 %v3021_v63, %v1624_v24 }
0x2223   :  { %v1614_v46 = vsel %vm1613_vm15, %v3019_v12, %v1610_v27 }
0x2224   :  { %v1629_v44 = vsel %vm1628_vm3, %v3021_v63, %v1625_v30  ;;  %v1619_v39 = vsel %vm1616_vm4, %v1618_v33, %v1614_v46 }
0x2225   :  { %v1634_v49 = vsel %vm1631_vm5, %v1633_v43, %v1629_v44  ;;  %v1620_v38 = vmul.f32 %v3015_v59, %v1619_v39 }
0x2226   :  { %v1635_v48 = vmul.f32 %v3017_v8, %v1634_v49 }
0x2227   :  { %1638 = vperm.xlu1 %2867, %v1620_v38   ;;  %v1711_v38 = vpop.permute.xlu2 %1710 }
0x2228   :  { %1643 = vperm.xlu0 %2869, %v1635_v48  }
0x222f   :  { %1664 = vrot.lane.b32.xlu1 %v3903_v25, %s3192_s29 }
0x2230   :  { %1712 = vrot.lane.b32.xlu0 %v3906_v26, %s3190_s27 }
0x2299   :  { %v1639_v28 = vpop.permute.xlu1 %1638 }
0x229a   :  { %v1644_v54 = vpop.permute.xlu0 %1643  ;;  %v1646_v37 = vmul.f32 %v1639_v28, %v3460_v18 }
0x229b   :  { %v1647_v58 = vmul.f32 %v1644_v54, %v3462_v19 }
0x229c   :  { %v1648_v55 = vsel %vm340_vm2, %v1646_v37, 0.0 }
0x229d   :  { %v1655_v36 = vsel %vm340_vm2, %v1647_v58, 0.0  ;;  %v1649_v61 = vrot.slane %v1648_v55, 4 }
0x229e   :  { %v1656_v50 = vrot.slane %v1655_v36, 4 }
0x229f   :  { %v1650_v23 = vadd.f32 %v1649_v61, %v1648_v55 }
0x22a0   :  { %v1657_v3 = vadd.f32 %v1656_v50, %v1655_v36 }
0x22a1   :  { %v1651_v60 = vrot.slane %v1650_v23, 2  ;;  %v1665_v40 = vpop.permute.xlu1 %1664 }
0x22a2   :  { %v1658_v5 = vrot.slane %v1657_v3, 2  ;;  %v1713_v37 = vpop.permute.xlu0 %1712 }
0x22a3   :  { %v1652_v25 = vadd.f32 %v1651_v60, %v1650_v23 }
0x22a4   :  { %v1659_v7 = vadd.f32 %v1658_v5, %v1657_v3 }
0x22a5   :  { %v1653_v59 = vrot.slane %v1652_v25, 1 }
0x22a6   :  { %v1660_v26 = vrot.slane %v1659_v7, 1 }
0x22a7   :  { %v1654_v8 = vadd.f32 %v1653_v59, %v1652_v25  ;;  %v1742_v59 = vrot.slane %v3893_v10, 1 }
0x22a8   :  { %v1661_v31 = vadd.f32 %v1660_v26, %v1659_v7 }
0x22a9   :  { %v1662_v32 = vadd.f32 %v3763_v20, %v1654_v8 }
0x22aa   :  { %v1663_v51 = vadd.f32 %v3763_v20, %v1661_v31 }
0x22ab   :  { %v1670_v62 = vadd.f32 %v1665_v40, %v1662_v32 }
0x22ac   :  { %v1671_v29 = vadd.f32 %v1667_v34, %v1663_v51 }
0x22ad   :  { %v2835_v35 = vmul.f32 -1.442695, %v1670_v62 }
0x22ae   :  { %v2836_v57 = vmul.f32 -1.442695, %v1671_v29 }
0x22af   :  { %3022 = vpow2.f32 %v2835_v35 }
0x22b0   :  { %3024 = vpow2.f32 %v2836_v57 }
0x22b5   :  { %v3023_v12 = vpop.eup %3022 }
0x22b6   :  { %v3025_v63 = vpop.eup %3024  ;;  %v1678_v17 = vadd.f32 1.0, %v3023_v12 }
0x22b7   :  { %v1679_v6 = vadd.f32 1.0, %v3025_v63 }
0x22b8   :  { %3026 = vrcp.f32 %v1678_v17  ;;  %v1691_v22 = vand.u32 2147483648, %v1678_v17  ;;  %v1689_v27 = vand.u32 2147483647, %v1678_v17  ;;  %vm1685_vm10 = vweird.f32 %v1678_v17 }
0x22b9   :  { %3028 = vrcp.f32 %v1679_v6  ;;  %v1706_v24 = vand.u32 2147483648, %v1679_v6  ;;  %v1704_v33 = vand.u32 2147483647, %v1679_v6  ;;  %vm1700_vm11 = vweird.f32 %v1679_v6 }
0x22ba   :  { %v1692_v44 = vor.u32 1.1754944e-38, %v1691_v22  ;;  %vm1690_vm14 = vcmp.eq.f32.partialorder %v1689_v27, 8.507059e+37 }
0x22bb   :  { %v1707_v39 = vor.u32 1.1754944e-38, %v1706_v24  ;;  %vm1705_vm15 = vcmp.eq.f32.partialorder %v1704_v33, 8.507059e+37 }
0x22be   :  { %v3027_v21 = vpop.eup %3026 }
0x22bf   :  { %v3029_v9 = vpop.eup %3028  ;;  %v1681_v0 = vmul.f32 %v3027_v21, %v1678_v17  ;;  %vm1686_vm8 = vweird.f32 %v3027_v21 }
0x22c0   :  { %v1696_v56 = vmul.f32 %v3029_v9, %v1679_v6  ;;  %vm1701_vm9 = vweird.f32 %v3029_v9  ;;  %vm1687_vm12 = vmor %vm1685_vm10, %vm1686_vm8 }
0x22c1   :  { %v1682_v2 = vsub.f32 1.0, %v1681_v0  ;;  %vm1702_vm13 = vmor %vm1700_vm11, %vm1701_vm9 }
0x22c2   :  { %v1697_v20 = vsub.f32 1.0, %v1696_v56 }
0x22c3   :  { %v1683_v52 = vmul.f32 %v3027_v21, %v1682_v2 }
0x22c4   :  { %v1698_v30 = vmul.f32 %v3029_v9, %v1697_v20 }
0x22c5   :  { %v1684_v43 = vadd.f32 %v3027_v21, %v1683_v52 }
0x22c6   :  { %v1699_v46 = vadd.f32 %v3029_v9, %v1698_v30 }
0x22c7   :  { %v1688_v49 = vsel %vm1687_vm12, %v3027_v21, %v1684_v43 }
0x22c8   :  { %v1703_v48 = vsel %vm1702_vm13, %v3029_v9, %v1699_v46  ;;  %v1693_v28 = vsel %vm1690_vm14, %v1692_v44, %v1688_v49 }
0x22c9   :  { %v1708_v54 = vsel %vm1705_vm15, %v1707_v39, %v1703_v48  ;;  %v1716_v58 = vmul.f32 %v1711_v38, %v1693_v28  ;;  %v1730_v31 = vsub.f32 1.0, %v1693_v28 }
0x22ca   :  { %v1717_v55 = vmul.f32 %v1713_v37, %v1708_v54  ;;  %v1731_v25 = vsub.f32 1.0, %v1708_v54  ;;  %v1746_v26 = vmul.f32 %v1742_v59, %v1708_v54  ;;  %v3152_v37 = vld [vmem:[%s4220_s6 + $0x18] sm:$0xff] }
0x22cb   :  { %1720 = vrot.lane.b32.xlu0 %v1716_v58, %s3191_s28  ;;  %v3153_v58 = vld [vmem:[%s4220_s6 + $0x10] sm:$0xff] }
0x22cc   :  { %1722 = vrot.lane.b32.xlu1 %v1717_v55, %s3191_s28  ;;  %v3154_v55 = vld [vmem:[%s4220_s6 + $0x8] sm:$0xff] }
0x233d   :  { %v1721_v36 = vpop.permute.xlu0 %1720 }
0x233e   :  { %v1726_v61 = vadd.f32 %v1721_v36, %v1662_v32  ;;  %v1723_v50 = vpop.permute.xlu1 %1722  ;;  %v1745_v32 = vmul.f32 %v1693_v28, %v3893_v10  ;;  %v3155_v36 = vld [vmem:[%s4220_s6] sm:$0xff] }
0x233f   :  { %v1727_v23 = vadd.f32 %v1723_v50, %v1663_v51  ;;  %v3986_v50 = vld [vmem:[%s4221_s7] ss:$0 sm:$0xff] }
0x2340   :  { %3030 = vtanh.f32 %v1726_v61 }
0x2341   :  { %3032 = vtanh.f32 %v1727_v23 }
0x2346   :  { %v3031_v3 = vpop.eup %3030 }
0x2347   :  { %v3033_v60 = vpop.eup %3032  ;;  %1734 = vrot.lane.b32.xlu1 %v3031_v3, %s3192_s29 }
0x2348   :  { %1736 = vrot.lane.b32.xlu2 %v3033_v60, %s3192_s29 }
0x23a2   :  { %v1737_v5 = vpop.permute.xlu2 %1736 }
0x23a3   :  { %v1741_v7 = vmul.f32 %v1737_v5, %v1731_v25 }
0x23a5   :  { %v1748_v8 = vadd.f32 %v1746_v26, %v1741_v7  ;;  %v3998_v26 = vld [vmem:[%s4223_s9] ss:$0 sm:$0xff] }
0x23a7   :  { %v1751_v34 = vrot.slane %v1748_v8, 7 }
0x23b9   :  { %v1735_v40 = vpop.permute.xlu1 %1734 }
0x23ba   :  { %v1740_v51 = vmul.f32 %v1735_v40, %v1730_v31 }
0x23bc   :  { %v1747_v62 = vadd.f32 %v1745_v32, %v1740_v51 }
0x23be   :  { %v1752_v29 = vsel %vm260_vm6, %v1751_v34, %v1747_v62 }
0x23bf   :  { %1753 = vrot.lane.b32.xlu0 %v1752_v29, %s3192_s29 }
0x2431   :  { %v1754_v35 = vpop.permute.xlu0 %1753 }
0x2432   :  { %2837 = vmatmul.msk.f32.vlgmr.msra.gmra.mxu1 %vm51_vm0, %v1754_v35 }
0x2433   :  { %2423 = vmatpush.msra.mxu1 %v3781_v13  ;;  %v3960_v13 = vld [vmem:[%s4219_s5] ss:$0 sm:$0xff] }
0x2435   :  { %2424 = vmatpush.msra.mxu1 %v3787_v41 }
0x2437   :  { %2425 = vmatpush.msra.mxu1 %v3793_v14 }
0x2439   :  { %2426 = vmatpush.msra.mxu1 %v3799_v15 }
0x24af   :  { %v1774_v57 = vpop.f32.mrf.mxu1 }
0x24b0   :  { %v3952_v10 = vadd.f32 %v3881_v42, %v1774_v57 }
0x24b2   :  { %3034 = vtanh.f32 %v3952_v10 }
0x24b8   :  { %v3035_v12 = vpop.eup %3034 }
0x24b9   :  { %v1788_v63 = vsel %vm51_vm0, %v3035_v12, %v1752_v29 }
0x24ba   :  { %2839 = vmatmul.msk.f32.vlgmr.msrb.gmra.mxu2 %vm146_vm1, %v1788_v63 }
0x253d   :  { %v1809_v17 = vpop.f32.mrf.mxu2 }
0x253e   :  { %v1810_v41 = vadd.f32 %v3960_v13, %v1809_v17 }
0x2540   :  { %1832 = vrot.lane.b32.xlu2 %v1810_v41, %s3190_s27  ;;  %v2840_v14 = vmul.f32 -1.442695, %v1810_v41 }
0x2542   :  { %3036 = vpow2.f32 %v2840_v14 }
0x2548   :  { %v3037_v15 = vpop.eup %3036 }
0x2549   :  { %v1815_v6 = vadd.f32 1.0, %v3037_v15 }
0x254b   :  { %3038 = vrcp.f32 %v1815_v6  ;;  %v1827_v20 = vand.u32 2147483648, %v1815_v6  ;;  %vm1821_vm4 = vweird.f32 %v1815_v6  ;;  %v1825_v22 = vand.u32 2147483647, %v1815_v6 }
0x254d   :  { %v1828_v52 = vor.u32 1.1754944e-38, %v1827_v20  ;;  %vm1826_vm8 = vcmp.eq.f32.partialorder %v1825_v22, 8.507059e+37 }
0x2551   :  { %v3039_v21 = vpop.eup %3038 }
0x2552   :  { %v1817_v9 = vmul.f32 %v3039_v21, %v1815_v6  ;;  %vm1822_vm3 = vweird.f32 %v3039_v21 }
0x2553   :  { %vm1823_vm5 = vmor %vm1821_vm4, %vm1822_vm3 }
0x2554   :  { %v1818_v0 = vsub.f32 1.0, %v1817_v9 }
0x2556   :  { %v1819_v56 = vmul.f32 %v3039_v21, %v1818_v0 }
0x2558   :  { %v1820_v2 = vadd.f32 %v3039_v21, %v1819_v56 }
0x255a   :  { %v1824_v24 = vsel %vm1823_vm5, %v3039_v21, %v1820_v2 }
0x255b   :  { %v1829_v30 = vsel %vm1826_vm8, %v1828_v52, %v1824_v24 }
0x255c   :  { %v1842_v39 = vsub.f32 1.0, %v1829_v30  ;;  %v1848_v38 = vmul.f32 %v1829_v30, %v1752_v29 }
0x259a   :  { %v1833_v27 = vpop.permute.xlu2 %1832 }
0x259b   :  { %v1835_v33 = vmul.f32 %v1833_v27, %v1829_v30 }
0x259d   :  { %1837 = vrot.lane.b32.xlu1 %v1835_v33, %s3191_s28 }
0x260f   :  { %v1838_v43 = vpop.permute.xlu1 %1837 }
0x2610   :  { %v1840_v46 = vadd.f32 %v1838_v43, %v1810_v41 }
0x2612   :  { %3040 = vtanh.f32 %v1840_v46 }
0x2618   :  { %v3041_v44 = vpop.eup %3040 }
0x2619   :  { %1844 = vrot.lane.b32.xlu0 %v3041_v44, %s3192_s29 }
0x268b   :  { %v1845_v49 = vpop.permute.xlu0 %1844 }
0x268c   :  { %v1847_v48 = vmul.f32 %v1845_v49, %v1842_v39 }
0x268e   :  { %v3966_v28 = vadd.f32 %v1848_v38, %v1847_v48 }
0x2690   :  { %1851 = vrot.lane.b32.xlu2 %v3966_v28, %s3192_s29 }
0x26ea   :  { %v1852_v54 = vpop.permute.xlu2 %1851 }
0x26eb   :  { %2841 = vmatmul.msk.f32.vlgmr.msrb.gmra.mxu0 %vm51_vm0, %v1852_v54 }
0x26ec   :  { %2521 = vmatpush.msrb.mxu0 %v3152_v37 }
0x26ee   :  { %2522 = vmatpush.msrb.mxu0 %v3153_v58 }
0x26f0   :  { %2523 = vmatpush.msrb.mxu0 %v3154_v55 }
0x26f2   :  { %2524 = vmatpush.msrb.mxu0 %v3155_v36 }
0x2768   :  { %v1872_v61 = vpop.f32.mrf.mxu0 }
0x2769   :  { %v3989_v23 = vadd.f32 %v3986_v50, %v1872_v61 }
0x276b   :  { %v1876_v3 = vrot.slane %v3989_v23, 1  ;;  %v1877_v60 = vperm.slane %v3989_v23, 0 }
0x276d   :  { %v1881_v5 = vadd.f32 %v1877_v60, %v3394_v47  ;;  %v1878_v25 = vperm.slane %v1876_v3, 0 }
0x276f   :  { %3042 = vtanh.f32 %v1881_v5  ;;  %v1882_v7 = vadd.f32 %v1878_v25, %v3408_v53 }
0x2771   :  { %3044 = vtanh.f32 %v1882_v7 }
0x2775   :  { %v3043_v59 = vpop.eup %3042 }
0x2776   :  { %v1885_v8 = vmul.f32 %v3998_v26, %v3043_v59 }
0x2777   :  { %v3045_v31 = vpop.eup %3044 }
0x2778   :  { %v1887_v40 = vsel %vm51_vm0, %v1885_v8, 0.0  ;;  %v1886_v32 = vmul.f32 %v3998_v26, %v3045_v31 }
0x2779   :  { %1888 = vadd.xlane.f32.xlu1 %v1887_v40 }
0x277a   :  { %v1890_v51 = vsel %vm51_vm0, %v1886_v32, 0.0 }
0x277b   :  { %1891 = vadd.xlane.f32.xlu0 %v1890_v51 }
0x27ec   :  { %v1889_v34 = vpop.xlane.xlu1 %1888 }
0x27ed   :  { %v1895_v29 = vperm.slane %v1889_v34, %v3422_v11 }
0x27ee   :  { %v1892_v62 = vpop.xlane.xlu0 %1891 }
0x27ef   :  { %v1896_v35 = vperm.slane %v1892_v62, %v3422_v11 }
0x27f1   :  { %v1897_v57 = vsel %vm260_vm6, %v1896_v35, %v1895_v29 }
0x27f2   :  { %v1899_v12 = vsel %vm263_vm7, %v1897_v57, -inf }
0x27f3   :  { %1900 = vmax.xlane.f32.xlu2 %v1899_v12 }
0x2866   :  { %v1901_v63 = vpop.xlane.xlu2 %1900 }
0x2867   :  { %v1903_v17 = vperm.slane %v1901_v63, 0  ;;  %v1904_v41 = vperm.slane %v1901_v63, 1 }
0x2869   :  { %v1907_v14 = vsub.f32 %v1889_v34, %v1903_v17  ;;  %v1908_v15 = vsub.f32 %v1892_v62, %v1904_v41  ;;  %v4023_v17 = vld [vmem:[%s4222_s8] ss:$0 sm:$0xff] }
0x286b   :  { %v1909_v6 = vmul.f32 1.442695, %v1907_v14  ;;  %v1911_v21 = vmul.f32 1.442695, %v1908_v15 }
0x286d   :  { %3046 = vpow2.f32 %v1909_v6 }
0x286e   :  { %3048 = vpow2.f32 %v1911_v21 }
0x2873   :  { %v3047_v9 = vpop.eup %3046 }
0x2874   :  { %v3049_v0 = vpop.eup %3048  ;;  %1916 = vperm.xlu1 %2867, %v3047_v9  }
0x2875   :  { %1919 = vperm.xlu0 %2869, %v3049_v0  }
0x287c   :  { %1993 = vrot.lane.b32.xlu1 %v1876_v3, %s3192_s29 }
0x2884   :  { %2039 = vrot.lane.b32.xlu1 %v1876_v3, %s3190_s27 }
0x28e6   :  { %v1917_v56 = vpop.permute.xlu1 %1916 }
0x28e7   :  { %v1920_v2 = vpop.permute.xlu0 %1919  ;;  %v1921_v20 = vperm.slane %v1917_v56, %v3422_v11 }
0x28e8   :  { %v1922_v22 = vperm.slane %v1920_v2, %v3422_v11 }
0x28ea   :  { %v1923_v24 = vsel %vm260_vm6, %v1922_v22, %v1921_v20 }
0x28eb   :  { %v1925_v52 = vsel %vm263_vm7, %v1923_v24, 0.0 }
0x28ec   :  { %1926 = vadd.xlane.f32.xlu2 %v1925_v52 }
0x28ee   :  { %v1994_v14 = vpop.permute.xlu1 %1993 }
0x295f   :  { %v1927_v27 = vpop.xlane.xlu2 %1926 }
0x2960   :  { %v1929_v30 = vperm.slane %v1927_v27, 0  ;;  %v1930_v33 = vperm.slane %v1927_v27, 1 }
0x2962   :  { %3050 = vrcp.f32 %v1929_v30  ;;  %v1944_v48 = vand.u32 2147483648, %v1929_v30  ;;  %v1959_v54 = vand.u32 2147483648, %v1930_v33  ;;  %v1942_v58 = vand.u32 2147483647, %v1929_v30 }
0x2963   :  { %3052 = vrcp.f32 %v1930_v33  ;;  %v1957_v36 = vand.u32 2147483647, %v1930_v33  ;;  %vm1938_vm11 = vweird.f32 %v1929_v30  ;;  %vm1953_vm12 = vweird.f32 %v1930_v33 }
0x2964   :  { %v1945_v60 = vor.u32 1.1754944e-38, %v1944_v48  ;;  %v1960_v5 = vor.u32 1.1754944e-38, %v1959_v54  ;;  %vm1943_vm15 = vcmp.eq.f32.partialorder %v1942_v58, 8.507059e+37 }
0x2965   :  { %vm1958_vm3 = vcmp.eq.f32.partialorder %v1957_v36, 8.507059e+37  ;;  %v2040_v36 = vpop.permute.xlu1 %2039 }
0x2968   :  { %v3051_v43 = vpop.eup %3050 }
0x2969   :  { %v3053_v46 = vpop.eup %3052  ;;  %v1934_v44 = vmul.f32 %v3051_v43, %v1929_v30  ;;  %vm1939_vm9 = vweird.f32 %v3051_v43 }
0x296a   :  { %v1949_v39 = vmul.f32 %v3053_v46, %v1930_v33  ;;  %vm1954_vm10 = vweird.f32 %v3053_v46  ;;  %vm1940_vm13 = vmor %vm1938_vm11, %vm1939_vm9 }
0x296b   :  { %v1935_v49 = vsub.f32 1.0, %v1934_v44  ;;  %vm1955_vm14 = vmor %vm1953_vm12, %vm1954_vm10 }
0x296c   :  { %v1950_v38 = vsub.f32 1.0, %v1949_v39 }
0x296d   :  { %v1936_v37 = vmul.f32 %v3051_v43, %v1935_v49 }
0x296e   :  { %v1951_v55 = vmul.f32 %v3053_v46, %v1950_v38 }
0x296f   :  { %v1937_v61 = vadd.f32 %v3051_v43, %v1936_v37 }
0x2970   :  { %v1952_v3 = vadd.f32 %v3053_v46, %v1951_v55 }
0x2971   :  { %v1941_v25 = vsel %vm1940_vm13, %v3051_v43, %v1937_v61 }
0x2972   :  { %v1956_v7 = vsel %vm1955_vm14, %v3053_v46, %v1952_v3  ;;  %v1946_v59 = vsel %vm1943_vm15, %v1945_v60, %v1941_v25 }
0x2973   :  { %v1961_v8 = vsel %vm1958_vm3, %v1960_v5, %v1956_v7  ;;  %v1947_v31 = vmul.f32 %v3047_v9, %v1946_v59 }
0x2974   :  { %v1962_v40 = vmul.f32 %v3049_v0, %v1961_v8 }
0x2975   :  { %1965 = vperm.xlu0 %2869, %v1947_v31  }
0x2976   :  { %1970 = vperm.xlu2 %2868, %v1962_v40  }
0x297d   :  { %1991 = vrot.lane.b32.xlu0 %v3989_v23, %s3192_s29 }
0x297e   :  { %2037 = vrot.lane.b32.xlu2 %v3989_v23, %s3190_s27 }
0x29d0   :  { %v1971_v32 = vpop.permute.xlu2 %1970 }
0x29d1   :  { %v1974_v51 = vmul.f32 %v1971_v32, %v3462_v19 }
0x29d3   :  { %v1982_v34 = vsel %vm340_vm2, %v1974_v51, 0.0 }
0x29d4   :  { %v1983_v62 = vrot.slane %v1982_v34, 4 }
0x29d6   :  { %v1984_v29 = vadd.f32 %v1983_v62, %v1982_v34 }
0x29d8   :  { %v1985_v35 = vrot.slane %v1984_v29, 2  ;;  %v2038_v62 = vpop.permute.xlu2 %2037 }
0x29da   :  { %v1986_v57 = vadd.f32 %v1985_v35, %v1984_v29 }
0x29dc   :  { %v1987_v12 = vrot.slane %v1986_v57, 1 }
0x29de   :  { %v1988_v63 = vadd.f32 %v1987_v12, %v1986_v57 }
0x29e0   :  { %v1990_v41 = vadd.f32 %v4023_v17, %v1988_v63 }
0x29e2   :  { %v1998_v23 = vadd.f32 %v1994_v14, %v1990_v41 }
0x29e4   :  { %v2843_v15 = vmul.f32 -1.442695, %v1998_v23 }
0x29e6   :  { %3054 = vpow2.f32 %v2843_v15 }
0x29e7   :  { %v1966_v6 = vpop.permute.xlu0 %1965 }
0x29e8   :  { %v1973_v21 = vmul.f32 %v1966_v6, %v3460_v18 }
0x29ea   :  { %v1975_v9 = vsel %vm340_vm2, %v1973_v21, 0.0 }
0x29eb   :  { %v1976_v0 = vrot.slane %v1975_v9, 4 }
0x29ec   :  { %v3055_v56 = vpop.eup %3054 }
0x29ed   :  { %v2006_v2 = vadd.f32 1.0, %v3055_v56  ;;  %v1977_v20 = vadd.f32 %v1976_v0, %v1975_v9  ;;  %v2069_v0 = vrot.slane %v3966_v28, 1 }
0x29ef   :  { %3056 = vrcp.f32 %v2006_v2  ;;  %v1978_v22 = vrot.slane %v1977_v20, 2  ;;  %v1992_v46 = vpop.permute.xlu0 %1991  ;;  %v2033_v49 = vand.u32 2147483648, %v2006_v2  ;;  %v2031_v48 = vand.u32 2147483647, %v2006_v2 }
0x29f0   :  { %vm2027_vm5 = vweird.f32 %v2006_v2 }
0x29f1   :  { %v1979_v24 = vadd.f32 %v1978_v22, %v1977_v20  ;;  %v2034_v58 = vor.u32 1.1754944e-38, %v2033_v49  ;;  %vm2032_vm9 = vcmp.eq.f32.partialorder %v2031_v48, 8.507059e+37 }
0x29f3   :  { %v1980_v52 = vrot.slane %v1979_v24, 1 }
0x29f5   :  { %v3057_v27 = vpop.eup %3056  ;;  %v1981_v30 = vadd.f32 %v1980_v52, %v1979_v24 }
0x29f6   :  { %v2023_v33 = vmul.f32 %v3057_v27, %v2006_v2  ;;  %vm2028_vm4 = vweird.f32 %v3057_v27 }
0x29f7   :  { %v1989_v43 = vadd.f32 %v4023_v17, %v1981_v30  ;;  %vm2029_vm8 = vmor %vm2027_vm5, %vm2028_vm4 }
0x29f8   :  { %v2024_v44 = vsub.f32 1.0, %v2023_v33 }
0x29f9   :  { %v1997_v39 = vadd.f32 %v1992_v46, %v1989_v43  ;;  %v3160_v46 = vld [vmem:[%s4224_s10 + $0x10] sm:$0xff] }
0x29fa   :  { %v2025_v38 = vmul.f32 %v3057_v27, %v2024_v44  ;;  %v3162_v44 = vld [vmem:[%s4224_s10] sm:$0xff] }
0x29fb   :  { %v2842_v54 = vmul.f32 -1.442695, %v1997_v39 }
0x29fc   :  { %v2026_v37 = vadd.f32 %v3057_v27, %v2025_v38 }
0x29fd   :  { %3058 = vpow2.f32 %v2842_v54 }
0x29fe   :  { %v2030_v55 = vsel %vm2029_vm8, %v3057_v27, %v2026_v37 }
0x29ff   :  { %v2035_v61 = vsel %vm2032_vm9, %v2034_v58, %v2030_v55 }
0x2a00   :  { %v2044_v3 = vmul.f32 %v2040_v36, %v2035_v61  ;;  %v2058_v21 = vsub.f32 1.0, %v2035_v61  ;;  %v2073_v56 = vmul.f32 %v2069_v0, %v2035_v61 }
0x2a02   :  { %2049 = vrot.lane.b32.xlu0 %v2044_v3, %s3191_s28 }
0x2a03   :  { %v3059_v60 = vpop.eup %3058 }
0x2a04   :  { %v2005_v5 = vadd.f32 1.0, %v3059_v60 }
0x2a06   :  { %3060 = vrcp.f32 %v2005_v5  ;;  %v2018_v8 = vand.u32 2147483648, %v2005_v5  ;;  %v2016_v40 = vand.u32 2147483647, %v2005_v5  ;;  %vm2012_vm11 = vweird.f32 %v2005_v5 }
0x2a08   :  { %v2019_v51 = vor.u32 1.1754944e-38, %v2018_v8  ;;  %vm2017_vm13 = vcmp.eq.f32.partialorder %v2016_v40, 8.507059e+37 }
0x2a0c   :  { %v3061_v25 = vpop.eup %3060 }
0x2a0d   :  { %v2008_v7 = vmul.f32 %v3061_v25, %v2005_v5  ;;  %vm2013_vm10 = vweird.f32 %v3061_v25 }
0x2a0e   :  { %vm2014_vm12 = vmor %vm2012_vm11, %vm2013_vm10 }
0x2a0f   :  { %v2009_v59 = vsub.f32 1.0, %v2008_v7 }
0x2a11   :  { %v2010_v31 = vmul.f32 %v3061_v25, %v2009_v59 }
0x2a13   :  { %v2011_v32 = vadd.f32 %v3061_v25, %v2010_v31 }
0x2a15   :  { %v2015_v34 = vsel %vm2014_vm12, %v3061_v25, %v2011_v32 }
0x2a16   :  { %v2020_v29 = vsel %vm2017_vm13, %v2019_v51, %v2015_v34 }
0x2a17   :  { %v2043_v35 = vmul.f32 %v2038_v62, %v2020_v29  ;;  %v2057_v20 = vsub.f32 1.0, %v2020_v29 }
0x2a19   :  { %2047 = vrot.lane.b32.xlu1 %v2043_v35, %s3191_s28 }
0x2a74   :  { %v2050_v57 = vpop.permute.xlu0 %2049 }
0x2a75   :  { %v2054_v12 = vadd.f32 %v2050_v57, %v1990_v41  ;;  %v2072_v41 = vmul.f32 %v2020_v29, %v3966_v28  ;;  %v3161_v28 = vld [vmem:[%s4224_s10 + $0x8] sm:$0xff] }
0x2a77   :  { %3062 = vtanh.f32 %v2054_v12 }
0x2a7d   :  { %v3063_v63 = vpop.eup %3062 }
0x2a7e   :  { %2063 = vrot.lane.b32.xlu2 %v3063_v63, %s3192_s29 }
0x2a8b   :  { %v2048_v14 = vpop.permute.xlu1 %2047 }
0x2a8c   :  { %v2053_v23 = vadd.f32 %v2048_v14, %v1989_v43  ;;  %v3159_v43 = vld [vmem:[%s4224_s10 + $0x18] sm:$0xff] }
0x2a8e   :  { %3064 = vtanh.f32 %v2053_v23 }
0x2a94   :  { %v3065_v15 = vpop.eup %3064 }
0x2a95   :  { %2061 = vrot.lane.b32.xlu0 %v3065_v15, %s3192_s29 }
0x2ad8   :  { %v2064_v6 = vpop.permute.xlu2 %2063 }
0x2ad9   :  { %v2068_v9 = vmul.f32 %v2064_v6, %v2058_v21 }
0x2adb   :  { %v2075_v2 = vadd.f32 %v2073_v56, %v2068_v9 }
0x2add   :  { %v2078_v52 = vrot.slane %v2075_v2, 7 }
0x2b07   :  { %v2062_v22 = vpop.permute.xlu0 %2061 }
0x2b08   :  { %v2067_v24 = vmul.f32 %v2062_v22, %v2057_v20 }
0x2b0a   :  { %v2074_v27 = vadd.f32 %v2072_v41, %v2067_v24 }
0x2b0c   :  { %v2079_v30 = vsel %vm260_vm6, %v2078_v52, %v2074_v27 }
0x2b0d   :  { %2080 = vrot.lane.b32.xlu1 %v2079_v30, %s3192_s29 }
0x2b7f   :  { %v2081_v33 = vpop.permute.xlu1 %2080 }
0x2b80   :  { %2844 = vmatmul.msk.f32.vlgmr.msrb.gmra.mxu1 %vm51_vm0, %v2081_v33 }
0x2b81   :  { %2750 = vmatpush.msrb.mxu1 %v3159_v43 }
0x2b83   :  { %2751 = vmatpush.msrb.mxu1 %v3160_v46 }
0x2b85   :  { %2752 = vmatpush.msrb.mxu1 %v3161_v28 }
0x2b87   :  { %2753 = vmatpush.msrb.mxu1 %v3162_v44 }
0x2bfd   :  { %v2101_v39 = vpop.f32.mrf.mxu1 }
0x2bfe   :  { %v4051_v49 = vadd.f32 %v3881_v42, %v2101_v39 }
0x2c00   :  { %3066 = vtanh.f32 %v4051_v49 }
0x2c06   :  { %v3067_v38 = vpop.eup %3066 }
0x2c07   :  { %v2115_v48 = vsel %vm51_vm0, %v3067_v38, %v2079_v30 }
0x2c08   :  { %2846 = vmatmul.msk.f32.vlgmr.msra.gmra.mxu3 %vm146_vm1, %v2115_v48 }
0x2c8b   :  { %v2136_v54 = vpop.f32.mrf.mxu3 }
0x2c8c   :  { %v2137_v37 = vadd.f32 %v3960_v13, %v2136_v54 }
0x2c8e   :  { %2159 = vrot.lane.b32.xlu2 %v2137_v37, %s3190_s27  ;;  %v2847_v58 = vmul.f32 -1.442695, %v2137_v37 }
0x2c90   :  { %3068 = vpow2.f32 %v2847_v58 }
0x2c96   :  { %v3069_v55 = vpop.eup %3068 }
0x2c97   :  { %v2142_v36 = vadd.f32 1.0, %v3069_v55 }
0x2c99   :  { %3070 = vrcp.f32 %v2142_v36  ;;  %v2154_v25 = vand.u32 2147483648, %v2142_v36  ;;  %vm2148_vm15 = vweird.f32 %v2142_v36  ;;  %v2152_v7 = vand.u32 2147483647, %v2142_v36 }
0x2c9b   :  { %v2155_v8 = vor.u32 1.1754944e-38, %v2154_v25  ;;  %vm2153_vm4 = vcmp.eq.f32.partialorder %v2152_v7, 8.507059e+37 }
0x2c9f   :  { %v3071_v61 = vpop.eup %3070 }
0x2ca0   :  { %v2144_v42 = vmul.f32 %v3071_v61, %v2142_v36  ;;  %vm2149_vm14 = vweird.f32 %v3071_v61 }
0x2ca1   :  { %vm2150_vm3 = vmor %vm2148_vm15, %vm2149_vm14 }
0x2ca2   :  { %v2145_v3 = vsub.f32 1.0, %v2144_v42 }
0x2ca4   :  { %v2146_v60 = vmul.f32 %v3071_v61, %v2145_v3 }
0x2ca6   :  { %v2147_v5 = vadd.f32 %v3071_v61, %v2146_v60 }
0x2ca8   :  { %v2151_v59 = vsel %vm2150_vm3, %v3071_v61, %v2147_v5 }
0x2ca9   :  { %v2156_v40 = vsel %vm2153_vm4, %v2155_v8, %v2151_v59 }
0x2caa   :  { %v2169_v29 = vsub.f32 1.0, %v2156_v40  ;;  %v2175_v57 = vmul.f32 %v2156_v40, %v2079_v30 }
0x2ce8   :  { %v2160_v31 = vpop.permute.xlu2 %2159 }
0x2ce9   :  { %v2162_v32 = vmul.f32 %v2160_v31, %v2156_v40 }
0x2ceb   :  { %2164 = vrot.lane.b32.xlu0 %v2162_v32, %s3191_s28 }
0x2d5d   :  { %v2165_v51 = vpop.permute.xlu0 %2164 }
0x2d5e   :  { %v2167_v34 = vadd.f32 %v2165_v51, %v2137_v37 }
0x2d60   :  { %3072 = vtanh.f32 %v2167_v34 }
0x2d66   :  { %v3073_v62 = vpop.eup %3072 }
0x2d67   :  { %2171 = vrot.lane.b32.xlu1 %v3073_v62, %s3192_s29 }
0x2dd9   :  { %v2172_v35 = vpop.permute.xlu1 %2171 }
0x2dda   :  { %v2174_v12 = vmul.f32 %v2172_v35, %v2169_v29 }
0x2ddc   :  { %v4060_v63 = vadd.f32 %v2175_v57, %v2174_v12 }
0x2dde   :  { %2178 = vrot.lane.b32.xlu2 %v4060_v63, %s3192_s29 }
0x2e38   :  { %v2179_v14 = vpop.permute.xlu2 %2178 }
0x2e39   :  { %2848 = vmatmul.msk.f32.vlgmr.msra.gmra.mxu0 %vm51_vm0, %v2179_v14 }
0x2eb6   :  { %v2199_v23 = vpop.f32.mrf.mxu0 }
0x2eb7   :  { %v4066_v15 = vadd.f32 %v3986_v50, %v2199_v23 }
0x2eb9   :  { %v2203_v6 = vrot.slane %v4066_v15, 1  ;;  %v2204_v21 = vperm.slane %v4066_v15, 0 }
0x2ebb   :  { %v2208_v9 = vadd.f32 %v2204_v21, %v3394_v47  ;;  %v2205_v0 = vperm.slane %v2203_v6, 0 }
0x2ebd   :  { %3074 = vtanh.f32 %v2208_v9  ;;  %v2209_v56 = vadd.f32 %v2205_v0, %v3408_v53 }
0x2ebf   :  { %3076 = vtanh.f32 %v2209_v56 }
0x2ec3   :  { %v3075_v2 = vpop.eup %3074 }
0x2ec4   :  { %v2212_v20 = vmul.f32 %v3998_v26, %v3075_v2 }
0x2ec5   :  { %v3077_v22 = vpop.eup %3076 }
0x2ec6   :  { %v2214_v41 = vsel %vm51_vm0, %v2212_v20, 0.0  ;;  %v2213_v24 = vmul.f32 %v3998_v26, %v3077_v22 }
0x2ec7   :  { %2215 = vadd.xlane.f32.xlu0 %v2214_v41 }
0x2ec8   :  { %v2217_v52 = vsel %vm51_vm0, %v2213_v24, 0.0 }
0x2ec9   :  { %2218 = vadd.xlane.f32.xlu1 %v2217_v52 }
0x2f3a   :  { %v2216_v27 = vpop.xlane.xlu0 %2215 }
0x2f3b   :  { %v2222_v33 = vperm.slane %v2216_v27, %v3422_v11 }
0x2f3c   :  { %v2219_v30 = vpop.xlane.xlu1 %2218 }
0x2f3d   :  { %v2223_v43 = vperm.slane %v2219_v30, %v3422_v11 }
0x2f3f   :  { %v2224_v46 = vsel %vm260_vm6, %v2223_v43, %v2222_v33 }
0x2f40   :  { %v2226_v28 = vsel %vm263_vm7, %v2224_v46, -inf }
0x2f41   :  { %2227 = vmax.xlane.f32.xlu2 %v2226_v28 }
0x2fb4   :  { %v2228_v44 = vpop.xlane.xlu2 %2227 }
0x2fb5   :  { %v2230_v39 = vperm.slane %v2228_v44, 0  ;;  %v2231_v38 = vperm.slane %v2228_v44, 1 }
0x2fb7   :  { %v2234_v48 = vsub.f32 %v2216_v27, %v2230_v39  ;;  %v2235_v54 = vsub.f32 %v2219_v30, %v2231_v38 }
0x2fb9   :  { %v2236_v37 = vmul.f32 1.442695, %v2234_v48  ;;  %v2238_v58 = vmul.f32 1.442695, %v2235_v54 }
0x2fbb   :  { %3078 = vpow2.f32 %v2236_v37 }
0x2fbc   :  { %3080 = vpow2.f32 %v2238_v58 }
0x2fc1   :  { %v3079_v55 = vpop.eup %3078 }
0x2fc2   :  { %v3081_v36 = vpop.eup %3080  ;;  %2243 = vperm.xlu0 %2869, %v3079_v55  }
0x2fc3   :  { %2246 = vperm.xlu1 %2867, %v3081_v36  }
0x2fcb   :  { %2320 = vrot.lane.b32.xlu1 %v2203_v6, %s3192_s29 }
0x2fd3   :  { %2366 = vrot.lane.b32.xlu1 %v2203_v6, %s3190_s27 }
0x3034   :  { %v2244_v61 = vpop.permute.xlu0 %2243 }
0x3035   :  { %v2247_v42 = vpop.permute.xlu1 %2246  ;;  %v2248_v3 = vperm.slane %v2244_v61, %v3422_v11 }
0x3036   :  { %v2249_v60 = vperm.slane %v2247_v42, %v3422_v11 }
0x3038   :  { %v2250_v5 = vsel %vm260_vm6, %v2249_v60, %v2248_v3 }
0x3039   :  { %v2252_v25 = vsel %vm263_vm7, %v2250_v5, 0.0 }
0x303a   :  { %2253 = vadd.xlane.f32.xlu2 %v2252_v25 }
0x303d   :  { %v2321_v48 = vpop.permute.xlu1 %2320 }
0x30ad   :  { %v2254_v7 = vpop.xlane.xlu2 %2253 }
0x30ae   :  { %v2256_v59 = vperm.slane %v2254_v7, 0  ;;  %v2257_v8 = vperm.slane %v2254_v7, 1 }
0x30b0   :  { %3082 = vrcp.f32 %v2256_v59  ;;  %v2271_v29 = vand.u32 2147483648, %v2256_v59  ;;  %v2286_v35 = vand.u32 2147483648, %v2257_v8  ;;  %v2269_v12 = vand.u32 2147483647, %v2256_v59 }
0x30b1   :  { %3084 = vrcp.f32 %v2257_v8  ;;  %v2284_v23 = vand.u32 2147483647, %v2257_v8  ;;  %vm2265_vm9 = vweird.f32 %v2256_v59  ;;  %vm2280_vm10 = vweird.f32 %v2257_v8 }
0x30b2   :  { %v2272_v9 = vor.u32 1.1754944e-38, %v2271_v29  ;;  %v2287_v0 = vor.u32 1.1754944e-38, %v2286_v35  ;;  %vm2270_vm13 = vcmp.eq.f32.partialorder %v2269_v12, 8.507059e+37 }
0x30b3   :  { %vm2285_vm14 = vcmp.eq.f32.partialorder %v2284_v23, 8.507059e+37  ;;  %v2367_v23 = vpop.permute.xlu1 %2366 }
0x30b6   :  { %v3083_v31 = vpop.eup %3082 }
0x30b7   :  { %v3085_v40 = vpop.eup %3084  ;;  %v2261_v32 = vmul.f32 %v3083_v31, %v2256_v59  ;;  %vm2266_vm5 = vweird.f32 %v3083_v31 }
0x30b8   :  { %v2276_v51 = vmul.f32 %v3085_v40, %v2257_v8  ;;  %vm2281_vm8 = vweird.f32 %v3085_v40  ;;  %vm2267_vm11 = vmor %vm2265_vm9, %vm2266_vm5 }
0x30b9   :  { %v2262_v34 = vsub.f32 1.0, %v2261_v32  ;;  %vm2282_vm12 = vmor %vm2280_vm10, %vm2281_vm8 }
0x30ba   :  { %v2277_v62 = vsub.f32 1.0, %v2276_v51 }
0x30bb   :  { %v2263_v57 = vmul.f32 %v3083_v31, %v2262_v34 }
0x30bc   :  { %v2278_v14 = vmul.f32 %v3085_v40, %v2277_v62 }
0x30bd   :  { %v2264_v6 = vadd.f32 %v3083_v31, %v2263_v57 }
0x30be   :  { %v2279_v21 = vadd.f32 %v3085_v40, %v2278_v14 }
0x30bf   :  { %v2268_v56 = vsel %vm2267_vm11, %v3083_v31, %v2264_v6 }
0x30c0   :  { %v2283_v2 = vsel %vm2282_vm12, %v3085_v40, %v2279_v21  ;;  %v2273_v20 = vsel %vm2270_vm13, %v2272_v9, %v2268_v56 }
0x30c1   :  { %v2288_v22 = vsel %vm2285_vm14, %v2287_v0, %v2283_v2  ;;  %v2274_v41 = vmul.f32 %v3079_v55, %v2273_v20 }
0x30c2   :  { %v2289_v24 = vmul.f32 %v3081_v36, %v2288_v22 }
0x30c3   :  { %2292 = vperm.xlu0 %2869, %v2274_v41  }
0x30c4   :  { %2297 = vperm.xlu2 %2868, %v2289_v24  }
0x30cb   :  { %2318 = vrot.lane.b32.xlu0 %v4066_v15, %s3192_s29 }
0x30d3   :  { %2364 = vrot.lane.b32.xlu0 %v4066_v15, %s3190_s27 }
0x311e   :  { %v2298_v52 = vpop.permute.xlu2 %2297 }
0x311f   :  { %v2301_v27 = vmul.f32 %v2298_v52, %v3462_v19 }
0x3121   :  { %v2309_v30 = vsel %vm340_vm2, %v2301_v27, 0.0 }
0x3122   :  { %v2310_v33 = vrot.slane %v2309_v30, 4 }
0x3124   :  { %v2311_v43 = vadd.f32 %v2310_v33, %v2309_v30 }
0x3126   :  { %v2312_v46 = vrot.slane %v2311_v43, 2 }
0x3128   :  { %v2313_v28 = vadd.f32 %v2312_v46, %v2311_v43 }
0x312a   :  { %v2314_v44 = vrot.slane %v2313_v28, 1 }
0x312c   :  { %v2315_v39 = vadd.f32 %v2314_v44, %v2313_v28 }
0x312e   :  { %v2317_v38 = vadd.f32 %v4023_v17, %v2315_v39 }
0x3130   :  { %v2325_v54 = vadd.f32 %v2321_v48, %v2317_v38 }
0x3132   :  { %v2850_v37 = vmul.f32 -1.442695, %v2325_v54 }
0x3134   :  { %3086 = vpow2.f32 %v2850_v37 }
0x3135   :  { %v2293_v58 = vpop.permute.xlu0 %2292 }
0x3136   :  { %v2300_v15 = vmul.f32 %v2293_v58, %v3460_v18 }
0x3138   :  { %v2302_v55 = vsel %vm340_vm2, %v2300_v15, 0.0 }
0x3139   :  { %v2303_v36 = vrot.slane %v2302_v55, 4 }
0x313a   :  { %v3087_v61 = vpop.eup %3086 }
0x313b   :  { %v2333_v42 = vadd.f32 1.0, %v3087_v61  ;;  %v2304_v3 = vadd.f32 %v2303_v36, %v2302_v55  ;;  %v2396_v36 = vrot.slane %v4060_v63, 1 }
0x313d   :  { %3088 = vrcp.f32 %v2333_v42  ;;  %v2305_v60 = vrot.slane %v2304_v3, 2  ;;  %v2319_v40 = vpop.permute.xlu0 %2318  ;;  %v2360_v34 = vand.u32 2147483648, %v2333_v42  ;;  %v2358_v29 = vand.u32 2147483647, %v2333_v42 }
0x313e   :  { %vm2354_vm3 = vweird.f32 %v2333_v42 }
0x313f   :  { %v2306_v5 = vadd.f32 %v2305_v60, %v2304_v3  ;;  %v2361_v12 = vor.u32 1.1754944e-38, %v2360_v34  ;;  %vm2359_vm5 = vcmp.eq.f32.partialorder %v2358_v29, 8.507059e+37 }
0x3141   :  { %v2307_v25 = vrot.slane %v2306_v5, 1 }
0x3143   :  { %v3089_v7 = vpop.eup %3088  ;;  %v2308_v59 = vadd.f32 %v2307_v25, %v2306_v5 }
0x3144   :  { %v2350_v8 = vmul.f32 %v3089_v7, %v2333_v42  ;;  %vm2355_vm15 = vweird.f32 %v3089_v7 }
0x3145   :  { %v2316_v31 = vadd.f32 %v4023_v17, %v2308_v59  ;;  %vm2356_vm4 = vmor %vm2354_vm3, %vm2355_vm15  ;;  %v2365_v43 = vpop.permute.xlu0 %2364 }
0x3146   :  { %v2351_v32 = vsub.f32 1.0, %v2350_v8 }
0x3147   :  { %v2324_v51 = vadd.f32 %v2319_v40, %v2316_v31  ;;  %v4108_v40 = vld [vmem:[%s4225_s11] ss:$0 sm:$0xff] }
0x3148   :  { %v2352_v62 = vmul.f32 %v3089_v7, %v2351_v32 }
0x3149   :  { %v2849_v35 = vmul.f32 -1.442695, %v2324_v51 }
0x314a   :  { %v2353_v57 = vadd.f32 %v3089_v7, %v2352_v62 }
0x314b   :  { %3090 = vpow2.f32 %v2849_v35 }
0x314c   :  { %v2357_v14 = vsel %vm2356_vm4, %v3089_v7, %v2353_v57 }
0x314d   :  { %v2362_v6 = vsel %vm2359_vm5, %v2361_v12, %v2357_v14 }
0x314e   :  { %v2371_v21 = vmul.f32 %v2367_v23, %v2362_v6  ;;  %v2385_v15 = vsub.f32 1.0, %v2362_v6  ;;  %v2400_v61 = vmul.f32 %v2396_v36, %v2362_v6 }
0x3150   :  { %2376 = vrot.lane.b32.xlu2 %v2371_v21, %s3191_s28 }
0x3151   :  { %v3091_v9 = vpop.eup %3090 }
0x3152   :  { %v2332_v0 = vadd.f32 1.0, %v3091_v9 }
0x3154   :  { %3092 = vrcp.f32 %v2332_v0  ;;  %v2345_v22 = vand.u32 2147483648, %v2332_v0  ;;  %v2343_v24 = vand.u32 2147483647, %v2332_v0  ;;  %vm2339_vm9 = vweird.f32 %v2332_v0 }
0x3156   :  { %v2346_v27 = vor.u32 1.1754944e-38, %v2345_v22  ;;  %vm2344_vm11 = vcmp.eq.f32.partialorder %v2343_v24, 8.507059e+37 }
0x315a   :  { %v3093_v56 = vpop.eup %3092 }
0x315b   :  { %v2335_v2 = vmul.f32 %v3093_v56, %v2332_v0  ;;  %vm2340_vm8 = vweird.f32 %v3093_v56 }
0x315c   :  { %vm2341_vm10 = vmor %vm2339_vm9, %vm2340_vm8 }
0x315d   :  { %v2336_v20 = vsub.f32 1.0, %v2335_v2 }
0x315f   :  { %v2337_v41 = vmul.f32 %v3093_v56, %v2336_v20 }
0x3161   :  { %v2338_v52 = vadd.f32 %v3093_v56, %v2337_v41 }
0x3163   :  { %v2342_v30 = vsel %vm2341_vm10, %v3093_v56, %v2338_v52 }
0x3164   :  { %v2347_v33 = vsel %vm2344_vm11, %v2346_v27, %v2342_v30 }
0x3165   :  { %v2370_v46 = vmul.f32 %v2365_v43, %v2347_v33  ;;  %v2384_v3 = vsub.f32 1.0, %v2347_v33 }
0x3167   :  { %2374 = vrot.lane.b32.xlu1 %v2370_v46, %s3191_s28 }
0x31aa   :  { %v2377_v28 = vpop.permute.xlu2 %2376 }
0x31ab   :  { %v2381_v44 = vadd.f32 %v2377_v28, %v2317_v38  ;;  %v2399_v38 = vmul.f32 %v2347_v33, %v4060_v63 }
0x31ad   :  { %3094 = vtanh.f32 %v2381_v44 }
0x31b3   :  { %v3095_v39 = vpop.eup %3094 }
0x31b4   :  { %2390 = vrot.lane.b32.xlu0 %v3095_v39, %s3192_s29 }
0x31d9   :  { %v2375_v48 = vpop.permute.xlu1 %2374 }
0x31da   :  { %v2380_v54 = vadd.f32 %v2375_v48, %v2316_v31 }
0x31dc   :  { %3096 = vtanh.f32 %v2380_v54 }
0x31e2   :  { %v3097_v37 = vpop.eup %3096 }
0x31e3   :  { %2388 = vrot.lane.b32.xlu2 %v3097_v37, %s3192_s29 }
0x3226   :  { %v2391_v58 = vpop.permute.xlu0 %2390 }
0x3227   :  { %v2395_v55 = vmul.f32 %v2391_v58, %v2385_v15 }
0x3229   :  { %v2402_v42 = vadd.f32 %v2400_v61, %v2395_v55 }
0x322b   :  { %v2405_v25 = vrot.slane %v2402_v42, 7 }
0x323d   :  { %v2389_v60 = vpop.permute.xlu2 %2388 }
0x323e   :  { %v2394_v5 = vmul.f32 %v2389_v60, %v2384_v3 }
0x3240   :  { %v2401_v7 = vadd.f32 %v2399_v38, %v2394_v5 }
0x3242   :  { %v2406_v59 = vsel %vm260_vm6, %v2405_v25, %v2401_v7 }
0x3243   :  { %2407 = vrot.lane.b32.xlu1 %v2406_v59, %s3192_s29 }
0x32b5   :  { %v2408_v8 = vpop.permute.xlu1 %2407 }
0x32b6   :  { %2851 = vmatmul.msk.f32.vlgmr.msra.gmra.mxu1 %vm51_vm0, %v2408_v8 }
0x3333   :  { %v2428_v31 = vpop.f32.mrf.mxu1 }
0x3334   :  { %v4111_v32 = vadd.f32 %v4108_v40, %v2428_v31 }
0x3336   :  { %3098 = vtanh.f32 %v4111_v32 }
0x333c   :  { %v3099_v63 = vpop.eup %3098 }
0x333d   :  { %v2442_v51 = vsel %vm51_vm0, %v3099_v63, %v2406_v59 }
0x333e   :  { %2853 = vmatmul.msk.f32.vlgmr.msra.gmra.mxu2 %vm146_vm1, %v2442_v51 }
0x33c1   :  { %v2463_v34 = vpop.f32.mrf.mxu2 }
0x33c2   :  { %v2464_v62 = vadd.f32 %v3960_v13, %v2463_v34 }
0x33c4   :  { %2486 = vrot.lane.b32.xlu0 %v2464_v62, %s3190_s27  ;;  %v2854_v29 = vmul.f32 -1.442695, %v2464_v62 }
0x33c6   :  { %3100 = vpow2.f32 %v2854_v29 }
0x33cc   :  { %v3101_v35 = vpop.eup %3100 }
0x33cd   :  { %v2469_v57 = vadd.f32 1.0, %v3101_v35 }
0x33cf   :  { %3102 = vrcp.f32 %v2469_v57  ;;  %v2481_v9 = vand.u32 2147483648, %v2469_v57  ;;  %vm2475_vm13 = vweird.f32 %v2469_v57  ;;  %v2479_v0 = vand.u32 2147483647, %v2469_v57 }
0x33d1   :  { %v2482_v2 = vor.u32 1.1754944e-38, %v2481_v9  ;;  %vm2480_vm14 = vcmp.eq.f32.partialorder %v2479_v0, 8.507059e+37 }
0x33d5   :  { %v3103_v12 = vpop.eup %3102 }
0x33d6   :  { %v2471_v14 = vmul.f32 %v3103_v12, %v2469_v57  ;;  %vm2476_vm12 = vweird.f32 %v3103_v12 }
0x33d7   :  { %vm2477_vm1 = vmor %vm2475_vm13, %vm2476_vm12 }
0x33d8   :  { %v2472_v23 = vsub.f32 1.0, %v2471_v14 }
0x33da   :  { %v2473_v6 = vmul.f32 %v3103_v12, %v2472_v23 }
0x33dc   :  { %v2474_v21 = vadd.f32 %v3103_v12, %v2473_v6 }
0x33de   :  { %v2478_v56 = vsel %vm2477_vm1, %v3103_v12, %v2474_v21 }
0x33df   :  { %v2483_v20 = vsel %vm2480_vm14, %v2482_v2, %v2478_v56 }
0x33e0   :  { %v2496_v27 = vsub.f32 1.0, %v2483_v20  ;;  %v2502_v33 = vmul.f32 %v2483_v20, %v2406_v59 }
0x3436   :  { %v2487_v13 = vpop.permute.xlu0 %2486 }
0x3437   :  { %v2489_v22 = vmul.f32 %v2487_v13, %v2483_v20 }
0x3439   :  { %2491 = vrot.lane.b32.xlu2 %v2489_v22, %s3191_s28 }
0x3493   :  { %v2492_v41 = vpop.permute.xlu2 %2491 }
0x3494   :  { %v2494_v24 = vadd.f32 %v2492_v41, %v2464_v62 }
0x3496   :  { %3104 = vtanh.f32 %v2494_v24 }
0x349c   :  { %v3105_v52 = vpop.eup %3104 }
0x349d   :  { %2498 = vrot.lane.b32.xlu1 %v3105_v52, %s3192_s29 }
0x350f   :  { %v2499_v30 = vpop.permute.xlu1 %2498 }
0x3510   :  { %v2501_v43 = vmul.f32 %v2499_v30, %v2496_v27 }
0x3512   :  { %v4120_v46 = vadd.f32 %v2502_v33, %v2501_v43 }
0x3514   :  { %2505 = vrot.lane.b32.xlu0 %v4120_v46, %s3192_s29 }
0x3586   :  { %v2506_v28 = vpop.permute.xlu0 %2505 }
0x3587   :  { %2855 = vmatmul.msk.f32.vlgmr.msrb.gmra.mxu0 %vm51_vm0, %v2506_v28 }
0x3604   :  { %v2526_v44 = vpop.f32.mrf.mxu0 }
0x3605   :  { %v4126_v39 = vadd.f32 %v3986_v50, %v2526_v44 }
0x3607   :  { %v4129_v48 = vrot.slane %v4126_v39, 1  ;;  %v2531_v54 = vperm.slane %v4126_v39, 0 }
0x3609   :  { %v2535_v37 = vadd.f32 %v2531_v54, %v3394_v47  ;;  %v2532_v58 = vperm.slane %v4129_v48, 0 }
0x360b   :  { %3106 = vtanh.f32 %v2535_v37  ;;  %v2536_v15 = vadd.f32 %v2532_v58, %v3408_v53 }
0x360d   :  { %3108 = vtanh.f32 %v2536_v15 }
0x3611   :  { %v3107_v55 = vpop.eup %3106 }
0x3612   :  { %v2539_v36 = vmul.f32 %v3998_v26, %v3107_v55 }
0x3613   :  { %v3109_v61 = vpop.eup %3108 }
0x3614   :  { %v2541_v50 = vsel %vm51_vm0, %v2539_v36, 0.0  ;;  %v2540_v42 = vmul.f32 %v3998_v26, %v3109_v61 }
0x3615   :  { %2542 = vadd.xlane.f32.xlu2 %v2541_v50 }
0x3616   :  { %v2544_v3 = vsel %vm51_vm0, %v2540_v42, 0.0 }
0x3617   :  { %2545 = vadd.xlane.f32.xlu1 %v2544_v3 }
0x3688   :  { %v2543_v60 = vpop.xlane.xlu2 %2542 }
0x3689   :  { %v2549_v38 = vperm.slane %v2543_v60, %v3422_v11 }
0x368a   :  { %v2546_v47 = vpop.xlane.xlu1 %2545 }
0x368b   :  { %v2550_v5 = vperm.slane %v2546_v47, %v3422_v11 }
0x368d   :  { %v2551_v53 = vsel %vm260_vm6, %v2550_v5, %v2549_v38 }
0x368e   :  { %v2553_v25 = vsel %vm263_vm7, %v2551_v53, -inf }
0x368f   :  { %2554 = vmax.xlane.f32.xlu0 %v2553_v25 }
0x3702   :  { %v2555_v7 = vpop.xlane.xlu0 %2554 }
0x3703   :  { %v2557_v59 = vperm.slane %v2555_v7, 0  ;;  %v2558_v8 = vperm.slane %v2555_v7, 1 }
0x3705   :  { %v2561_v31 = vsub.f32 %v2543_v60, %v2557_v59  ;;  %v2562_v26 = vsub.f32 %v2546_v47, %v2558_v8 }
0x3707   :  { %v2563_v63 = vmul.f32 1.442695, %v2561_v31  ;;  %v2565_v51 = vmul.f32 1.442695, %v2562_v26 }
0x3709   :  { %3110 = vpow2.f32 %v2563_v63 }
0x370a   :  { %3112 = vpow2.f32 %v2565_v51 }
0x370f   :  { %v3111_v34 = vpop.eup %3110 }
0x3710   :  { %v3113_v62 = vpop.eup %3112  ;;  %2570 = vperm.xlu2 %2868, %v3111_v34  }
0x3711   :  { %2573 = vperm.xlu1 %2867, %v3113_v62  }
0x3719   :  { %2645 = vrot.lane.b32.xlu1 %v4126_v39, %s3192_s29 }
0x376a   :  { %v2571_v29 = vpop.permute.xlu2 %2570 }
0x376b   :  { %v2575_v57 = vperm.slane %v2571_v29, %v3422_v11 }
0x3783   :  { %v2574_v35 = vpop.permute.xlu1 %2573 }
0x3784   :  { %v2576_v12 = vperm.slane %v2574_v35, %v3422_v11 }
0x3786   :  { %v2577_v14 = vsel %vm260_vm6, %v2576_v12, %v2575_v57 }
0x3787   :  { %v2579_v23 = vsel %vm263_vm7, %v2577_v14, 0.0 }
0x3788   :  { %2580 = vadd.xlane.f32.xlu0 %v2579_v23 }
0x378b   :  { %v2646_v7 = vpop.permute.xlu1 %2645 }
0x37fb   :  { %v2581_v6 = vpop.xlane.xlu0 %2580 }
0x37fc   :  { %v2583_v21 = vperm.slane %v2581_v6, 0  ;;  %v2584_v9 = vperm.slane %v2581_v6, 1 }
0x37fe   :  { %3114 = vrcp.f32 %v2583_v21  ;;  %v2598_v41 = vand.u32 2147483648, %v2583_v21  ;;  %v2613_v52 = vand.u32 2147483648, %v2584_v9  ;;  %v2596_v11 = vand.u32 2147483647, %v2583_v21 }
0x37ff   :  { %3116 = vrcp.f32 %v2584_v9  ;;  %v2611_v30 = vand.u32 2147483647, %v2584_v9  ;;  %vm2592_vm7 = vweird.f32 %v2583_v21  ;;  %vm2607_vm4 = vweird.f32 %v2584_v9 }
0x3800   :  { %v2599_v28 = vor.u32 1.1754944e-38, %v2598_v41  ;;  %v2614_v44 = vor.u32 1.1754944e-38, %v2613_v52  ;;  %vm2597_vm9 = vcmp.eq.f32.partialorder %v2596_v11, 8.507059e+37 }
0x3801   :  { %vm2612_vm10 = vcmp.eq.f32.partialorder %v2611_v30, 8.507059e+37 }
0x3804   :  { %v3115_v0 = vpop.eup %3114 }
0x3805   :  { %v3117_v56 = vpop.eup %3116  ;;  %v2588_v2 = vmul.f32 %v3115_v0, %v2583_v21  ;;  %vm2593_vm15 = vweird.f32 %v3115_v0 }
0x3806   :  { %v2603_v13 = vmul.f32 %v3117_v56, %v2584_v9  ;;  %vm2608_vm3 = vweird.f32 %v3117_v56  ;;  %vm2594_vm5 = vmor %vm2592_vm7, %vm2593_vm15 }
0x3807   :  { %v2589_v20 = vsub.f32 1.0, %v2588_v2  ;;  %vm2609_vm8 = vmor %vm2607_vm4, %vm2608_vm3 }
0x3808   :  { %v2604_v22 = vsub.f32 1.0, %v2603_v13 }
0x3809   :  { %v2590_v24 = vmul.f32 %v3115_v0, %v2589_v20 }
0x380a   :  { %v2605_v27 = vmul.f32 %v3117_v56, %v2604_v22 }
0x380b   :  { %v2591_v33 = vadd.f32 %v3115_v0, %v2590_v24 }
0x380c   :  { %v2606_v43 = vadd.f32 %v3117_v56, %v2605_v27 }
0x380d   :  { %v2595_v54 = vsel %vm2594_vm5, %v3115_v0, %v2591_v33 }
0x380e   :  { %v2610_v37 = vsel %vm2609_vm8, %v3117_v56, %v2606_v43  ;;  %v2600_v58 = vsel %vm2597_vm9, %v2599_v28, %v2595_v54 }
0x380f   :  { %v2615_v15 = vsel %vm2612_vm10, %v2614_v44, %v2610_v37  ;;  %v2601_v55 = vmul.f32 %v3111_v34, %v2600_v58 }
0x3810   :  { %v2616_v36 = vmul.f32 %v3113_v62, %v2615_v15 }
0x3811   :  { %2619 = vperm.xlu2 %2868, %v2601_v55  }
0x3812   :  { %2624 = vperm.xlu0 %2869, %v2616_v36  }
0x3819   :  { %2647 = vrot.lane.b32.xlu2 %v4129_v48, %s3192_s29 }
0x381a   :  { %2693 = vrot.lane.b32.xlu0 %v4129_v48, %s3190_s27 }
0x3821   :  { %2691 = vrot.lane.b32.xlu2 %v4126_v39, %s3190_s27 }
0x386b   :  { %v2620_v61 = vpop.permute.xlu2 %2619 }
0x386c   :  { %v2627_v50 = vmul.f32 %v2620_v61, %v3460_v18 }
0x386e   :  { %v2629_v42 = vsel %vm340_vm2, %v2627_v50, 0.0 }
0x386f   :  { %v2630_v3 = vrot.slane %v2629_v42, 4 }
0x3871   :  { %v2631_v60 = vadd.f32 %v2630_v3, %v2629_v42  ;;  %v2817_v42 = vld [vmem:[%s4215_s1 + $0x2] sm:$0x3]  ;;  %v2838_v3 = vld [vmem:[%s4215_s1 + $0x8] sm:$0x3] }
0x3873   :  { %v2632_v47 = vrot.slane %v2631_v60, 2  ;;  %v2648_v35 = vpop.permute.xlu2 %2647 }
0x3875   :  { %v2633_v38 = vadd.f32 %v2632_v47, %v2631_v60 }
0x3877   :  { %v2634_v5 = vrot.slane %v2633_v38, 1 }
0x3879   :  { %v2635_v53 = vadd.f32 %v2634_v5, %v2633_v38  ;;  %v471_v5 = vld [vmem:[%s4215_s1] sm:$0x3] }
0x387b   :  { %v2643_v25 = vadd.f32 %v4023_v17, %v2635_v53  ;;  %v2692_v41 = vpop.permute.xlu2 %2691  ;;  %v2831_v53 = vld [vmem:[%s4215_s1 + $0x6] sm:$0x3] }
0x387d   :  { %v2651_v59 = vadd.f32 %v2646_v7, %v2643_v25 }
0x387f   :  { %v2856_v8 = vmul.f32 -1.442695, %v2651_v59 }
0x3881   :  { %3118 = vpow2.f32 %v2856_v8 }
0x3884   :  { %v2625_v48 = vpop.permute.xlu0 %2624 }
0x3885   :  { %v2628_v39 = vmul.f32 %v2625_v48, %v3462_v19  ;;  %v2723_v48 = vrot.slane %v4120_v46, 1 }
0x3887   :  { %v3119_v31 = vpop.eup %3118  ;;  %v2636_v18 = vsel %vm340_vm2, %v2628_v39, 0.0 }
0x3888   :  { %v2659_v26 = vadd.f32 1.0, %v3119_v31  ;;  %v2637_v63 = vrot.slane %v2636_v18, 4 }
0x388a   :  { %3120 = vrcp.f32 %v2659_v26  ;;  %v2638_v51 = vadd.f32 %v2637_v63, %v2636_v18  ;;  %v2672_v6 = vand.u32 2147483648, %v2659_v26  ;;  %v2670_v9 = vand.u32 2147483647, %v2659_v26 }
0x388b   :  { %vm2666_vm2 = vweird.f32 %v2659_v26 }
0x388c   :  { %v2639_v34 = vrot.slane %v2638_v51, 2  ;;  %v2673_v2 = vor.u32 1.1754944e-38, %v2672_v6  ;;  %vm2671_vm13 = vcmp.eq.f32.partialorder %v2670_v9, 8.507059e+37  ;;  %v2694_v58 = vpop.permute.xlu0 %2693 }
0x388e   :  { %v2640_v62 = vadd.f32 %v2639_v34, %v2638_v51 }
0x3890   :  { %v3121_v29 = vpop.eup %3120  ;;  %v2641_v12 = vrot.slane %v2640_v62, 1 }
0x3891   :  { %v2662_v57 = vmul.f32 %v3121_v29, %v2659_v26  ;;  %vm2667_vm11 = vweird.f32 %v3121_v29 }
0x3892   :  { %v2642_v23 = vadd.f32 %v2641_v12, %v2640_v62  ;;  %vm2668_vm12 = vmor %vm2666_vm2, %vm2667_vm11 }
0x3893   :  { %v2663_v14 = vsub.f32 1.0, %v2662_v57  ;;  %v2845_v57 = vld [vmem:[%s4215_s1 + $0xa] sm:$0x3] }
0x3894   :  { %v2644_v19 = vadd.f32 %v4023_v17, %v2642_v23 }
0x3895   :  { %v2664_v21 = vmul.f32 %v3121_v29, %v2663_v14 }
0x3896   :  { %v2652_v56 = vadd.f32 %v2648_v35, %v2644_v19  ;;  %v2824_v35 = vld [vmem:[%s4215_s1 + $0x4] sm:$0x3] }
0x3897   :  { %v2665_v0 = vadd.f32 %v3121_v29, %v2664_v21 }
0x3898   :  { %v2857_v20 = vmul.f32 -1.442695, %v2652_v56 }
0x3899   :  { %v2669_v13 = vsel %vm2668_vm12, %v3121_v29, %v2665_v0 }
0x389a   :  { %v2674_v22 = vsel %vm2671_vm13, %v2673_v2, %v2669_v13  ;;  %3122 = vpow2.f32 %v2857_v20 }
0x389b   :  { %v2697_v24 = vmul.f32 %v2692_v41, %v2674_v22  ;;  %v2711_v59 = vsub.f32 1.0, %v2674_v22  ;;  %v2726_v63 = vmul.f32 %v2674_v22, %v4120_v46  ;;  %v2859_v46 = vld [vmem:[%s4215_s1 + $0xe] sm:$0x3] }
0x389d   :  { %2701 = vrot.lane.b32.xlu0 %v2697_v24, %s3191_s28 }
0x38a0   :  { %v3123_v52 = vpop.eup %3122 }
0x38a1   :  { %v2660_v11 = vadd.f32 1.0, %v3123_v52 }
0x38a3   :  { %3124 = vrcp.f32 %v2660_v11  ;;  %v2687_v33 = vand.u32 2147483648, %v2660_v11  ;;  %v2685_v28 = vand.u32 2147483647, %v2660_v11  ;;  %vm2681_vm14 = vweird.f32 %v2660_v11 }
0x38a5   :  { %v2688_v54 = vor.u32 1.1754944e-38, %v2687_v33  ;;  %vm2686_vm3 = vcmp.eq.f32.partialorder %v2685_v28, 8.507059e+37 }
0x38a9   :  { %v3125_v27 = vpop.eup %3124 }
0x38aa   :  { %v2677_v30 = vmul.f32 %v3125_v27, %v2660_v11  ;;  %vm2682_vm1 = vweird.f32 %v3125_v27 }
0x38ab   :  { %vm2683_vm15 = vmor %vm2681_vm14, %vm2682_vm1 }
0x38ac   :  { %v2678_v17 = vsub.f32 1.0, %v2677_v30 }
0x38ae   :  { %v2679_v43 = vmul.f32 %v3125_v27, %v2678_v17 }
0x38b0   :  { %v2680_v44 = vadd.f32 %v3125_v27, %v2679_v43 }
0x38b2   :  { %v2684_v37 = vsel %vm2683_vm15, %v3125_v27, %v2680_v44 }
0x38b3   :  { %v2689_v15 = vsel %vm2686_vm3, %v2688_v54, %v2684_v37 }
0x38b4   :  { %v2698_v55 = vmul.f32 %v2694_v58, %v2689_v15  ;;  %v2712_v8 = vsub.f32 1.0, %v2689_v15  ;;  %v2727_v26 = vmul.f32 %v2723_v48, %v2689_v15 }
0x38b6   :  { %2703 = vrot.lane.b32.xlu1 %v2698_v55, %s3191_s28 }
0x390f   :  { %v2702_v36 = vpop.permute.xlu0 %2701 }
0x3910   :  { %v2707_v61 = vadd.f32 %v2702_v36, %v2643_v25  ;;  %v2852_v25 = vld [vmem:[%s4215_s1 + $0xc] sm:$0x3]  ;;  %s3194_s1 = smov [#allocation2]  }
0x3912   :  { %3126 = vtanh.f32 %v2707_v61 }
0x3918   :  { %v3127_v50 = vpop.eup %3126 }
0x3919   :  { %2715 = vrot.lane.b32.xlu1 %v3127_v50, %s3192_s29 }
0x3921   :  { %800 = vrot.lane.b32.xlu1 %v2817_v42, %s3190_s27 }
0x3928   :  { %v2704_v60 = vpop.permute.xlu1 %2703 }
0x3929   :  { %1781 = vrot.lane.b32.xlu1 %v2838_v3, %s3190_s27  ;;  %v2708_v47 = vadd.f32 %v2704_v60, %v2644_v19 }
0x392b   :  { %3128 = vtanh.f32 %v2708_v47 }
0x3931   :  { %v3129_v38 = vpop.eup %3128  ;;  %2761 = vrot.lane.b32.xlu1 %v2859_v46, %s3190_s27 }
0x3932   :  { %2717 = vrot.lane.b32.xlu2 %v3129_v38, %s3192_s29 }
0x393a   :  { %473 = vrot.lane.b32.xlu2 %v471_v5, %s3190_s27 }
0x3942   :  { %1454 = vrot.lane.b32.xlu2 %v2831_v53, %s3190_s27 }
0x394a   :  { %2435 = vrot.lane.b32.xlu2 %v2852_v25, %s3190_s27 }
0x398b   :  { %v2716_v7 = vpop.permute.xlu1 %2715 }
0x398c   :  { %v2718_v39 = vpop.permute.xlu2 %2717  ;;  %v2721_v31 = vmul.f32 %v2716_v7, %v2711_v59 }
0x398d   :  { %v2722_v18 = vmul.f32 %v2718_v39, %v2712_v8 }
0x398e   :  { %v2728_v34 = vadd.f32 %v2726_v63, %v2721_v31 }
0x398f   :  { %v2729_v51 = vadd.f32 %v2727_v26, %v2722_v18 }
0x3991   :  { %v2732_v62 = vrot.slane %v2729_v51, 7 }
0x3993   :  { %v2733_v29 = vsel %vm260_vm6, %v2732_v62, %v2728_v34  ;;  %v801_v23 = vpop.permute.xlu1 %800  ;;  %vm2783_vm6 = vcmask 0  }
0x3994   :  { %2734 = vrot.lane.b32.xlu0 %v2733_v29, %s3192_s29  ;;  %v474_v14 = vpop.permute.xlu2 %473  ;;  %v803_v21 = vsub.f32 %v3670_v4, %v801_v23 }
0x3995   :  { %v476_v9 = vsub.f32 %v3551_v1, %v474_v14 }
0x3996   :  { %v804_v0 = vmul.f32 %v803_v21, %v803_v21 }
0x3997   :  { %v477_v56 = vmul.f32 %v476_v9, %v476_v9 }
0x3999   :  { %v805_v20 = vadd.f32 %v804_v0, %v477_v56 }
0x399b   :  { %v1782_v41 = vpop.permute.xlu1 %1781 }
0x399c   :  { %1127 = vrot.lane.b32.xlu0 %v2824_v35, %s3190_s27  ;;  %v1455_v2 = vpop.permute.xlu2 %1454  ;;  %v1784_v11 = vsub.f32 %v3952_v10, %v1782_v41 }
0x399d   :  { %v1457_v22 = vsub.f32 %v3884_v45, %v1455_v2 }
0x399e   :  { %v1785_v1 = vmul.f32 %v1784_v11, %v1784_v11 }
0x399f   :  { %v1458_v27 = vmul.f32 %v1457_v22, %v1457_v22 }
0x39a3   :  { %v2762_v44 = vpop.permute.xlu1 %2761 }
0x39a4   :  { %2108 = vrot.lane.b32.xlu0 %v2845_v57, %s3190_s27  ;;  %v2436_v17 = vpop.permute.xlu2 %2435  ;;  %s2790_s27 = sshll.u32 %s3194_s1, 4  ;;  %s2791_s27 = int_to_ptr.vmem [resolvable:$true] %s2790_s27 }
0x3a06   :  { %v2735_v12 = vpop.permute.xlu0 %2734 }
0x3a07   :  { %2858 = vmatmul.msk.f32.vlgmr.msrb.gmra.mxu1 %vm51_vm0, %v2735_v12  ;;  %vm2771_vm0 = vcmask 123904  }
0x3a0e   :  { %v1128_v6 = vpop.permute.xlu0 %1127 }
0x3a0f   :  { %v1130_v19 = vsub.f32 %v3803_v16, %v1128_v6  ;;  %v2438_v16 = vsub.f32 %v4111_v32, %v2436_v17 }
0x3a11   :  { %v1131_v13 = vmul.f32 %v1130_v19, %v1130_v19  ;;  %v2439_v37 = vmul.f32 %v2438_v16, %v2438_v16 }
0x3a13   :  { %v1132_v52 = vadd.f32 %v1131_v13, %v805_v20 }
0x3a15   :  { %v1459_v4 = vadd.f32 %v1458_v27, %v1132_v52 }
0x3a16   :  { %v2109_v24 = vpop.permute.xlu0 %2108 }
0x3a17   :  { %v2111_v30 = vsub.f32 %v4051_v49, %v2109_v24  ;;  %v1786_v43 = vadd.f32 %v1785_v1, %v1459_v4 }
0x3a19   :  { %v2112_v33 = vmul.f32 %v2111_v30, %v2111_v30 }
0x3a1b   :  { %v2113_v54 = vadd.f32 %v2112_v33, %v1786_v43 }
0x3a1d   :  { %v2440_v15 = vadd.f32 %v2439_v37, %v2113_v54 }
0x3a84   :  { %v2755_v28 = vpop.f32.mrf.mxu1 }
0x3a85   :  { %v2756_v45 = vadd.f32 %v4108_v40, %v2755_v28 }
0x3a87   :  { %v2764_v58 = vsub.f32 %v2756_v45, %v2762_v44 }
0x3a89   :  { %v2765_v55 = vmul.f32 %v2764_v58, %v2764_v58 }
0x3a8b   :  { %v2766_v10 = vadd.f32 %v2765_v55, %v2440_v15 }
0x3a8d   :  { %2768 = vrot.lane.b32.xlu0 %v2766_v10, %s3192_s29 }
0x3aff   :  { %v2769_v49 = vpop.permute.xlu0 %2768 }
0x3b00   :  { %v2772_v36 = vsel %vm2771_vm0, %v2769_v49, 0.0 }
0x3b01   :  { %2773 = vadd.xlane.f32.xlu2 %v2772_v36 }
0x3b74   :  { %v2774_v61 = vpop.xlane.xlu2 %2773 }
0x3b75   :  { %v2775_v50 = vrot.slane %v2774_v61, 4 }
0x3b77   :  { %v2776_v32 = vadd.f32 %v2775_v50, %v2774_v61 }
0x3b79   :  { %v2777_v42 = vrot.slane %v2776_v32, 2 }
0x3b7b   :  { %v2778_v3 = vadd.f32 %v2777_v42, %v2776_v32 }
0x3b7d   :  { %v2779_v60 = vrot.slane %v2778_v3, 1 }
0x3b7f   :  { %v2780_v47 = vadd.f32 %v2779_v60, %v2778_v3 }
0x3b81   :  { %2860 = vpush %v2780_v47 }
0x3bb2   :  { %s2861_s29 = spop %2860 }
0x3bb3   :  { %v2782_v40 = vstv %s2861_s29 }
0x3bb4   :  { %2784 = vst.msk [vmem:[#allocation2] sm:$0x1] %vm2783_vm6, %v2782_v40 }
0x3bb5   :  { %2795 = dma.vmem_to_hbm [thread:$0]  %s2791_s27, 16, %s2793_s4, [#allocation3]  }
0x3bb6   :  { %3188 = dma.done.wait [#allocation3], 16  }
0x3bb7   :  { %3189 = vsyncadd [#allocation3], 4294967280 }
0x3bb8   :  { %2800 = vsyncpa [#allocation3], 1 }

</bundles_post_ra>
